<compile_context>
chip_gen: v7x
topology: tpu7x:2x2x1
jax: 0.10.0
libtpu: 0.0.40
codegen_flags: <defaults>
</compile_context>

<pallas_src>
import functools

import jax
import jax.numpy as jnp
from jax import lax
from jax.experimental import pallas as pl
from jax.experimental.pallas import tpu as pltpu


def _round_up(x, m):
    return (x + m - 1) // m * m


def _pick_divisor(dim, candidates):
    for c in candidates:
        if dim % c == 0:
            return c
    return dim


# ---------------------------------------------------------------------------
# Kernel 1: tiled matmul + shift [+ residual] [+ ReLU]
#   used for every 1x1 convolution (conv1, conv3, downsample conv).
#   BN scale is already folded into the weights; shift = beta - mean*scale.
# ---------------------------------------------------------------------------
def _mm_bias_kernel(*refs, n_k, relu, has_res):
    if has_res:
        a_ref, w_ref, b_ref, r_ref, o_ref, acc_ref = refs
    else:
        a_ref, w_ref, b_ref, o_ref, acc_ref = refs
        r_ref = None
    k = pl.program_id(2)

    @pl.when(k == 0)
    def _():
        acc_ref[...] = jnp.zeros_like(acc_ref)

    acc_ref[...] += jnp.dot(a_ref[...], w_ref[...],
                            preferred_element_type=jnp.float32)

    @pl.when(k == n_k - 1)
    def _():
        y = acc_ref[...] + b_ref[...]
        if has_res:
            y = y + r_ref[...].astype(jnp.float32)
        if relu:
            y = jnp.maximum(y, 0.0)
        o_ref[...] = y.astype(o_ref.dtype)


def _matmul_bias_act(a, w, shift, residual=None, relu=True):
    """act((a @ w) + shift [+ residual]); bf16 operands, f32 accumulate."""
    M, K = a.shape
    Np = w.shape[1]                       # already a multiple of 128
    Mp = _round_up(M, 16)                 # bf16 packs 2 rows / sublane
    if Mp != M:                           # rare; only when n*h*w % 16 != 0
        a = jnp.pad(a, ((0, Mp - M), (0, 0)))
        if residual is not None:
            residual = jnp.pad(residual, ((0, Mp - M), (0, 0)))

    tm = _pick_divisor(Mp, (1024, 512, 256, 128, 64, 32, 16))
    tn = _pick_divisor(Np, (256, 128))
    tk = _pick_divisor(K, (512, 256, 128)) if K % 128 == 0 else K
    gm, gn, gk = Mp // tm, Np // tn, K // tk

    b2 = shift.reshape(1, Np).astype(jnp.float32)
    inputs = [a, w, b2]
    in_specs = [
        pl.BlockSpec((tm, tk), lambda i, j, k: (i, k)),
        pl.BlockSpec((tk, tn), lambda i, j, k: (k, j)),
        pl.BlockSpec((1, tn), lambda i, j, k: (0, j)),
    ]
    has_res = residual is not None
    if has_res:
        inputs.append(residual)
        in_specs.append(pl.BlockSpec((tm, tn), lambda i, j, k: (i, j)))

    kernel = functools.partial(_mm_bias_kernel, n_k=gk, relu=relu,
                               has_res=has_res)
    out = pl.pallas_call(
        kernel,
        out_shape=jax.ShapeDtypeStruct((Mp, Np), jnp.bfloat16),
        grid_spec=pltpu.PrefetchScalarGridSpec(
            num_scalar_prefetch=0,
            grid=(gm, gn, gk),
            in_specs=in_specs,
            out_specs=pl.BlockSpec((tm, tn), lambda i, j, k: (i, j)),
            scratch_shapes=[pltpu.VMEM((tm, tn), jnp.float32)],
        ),
        compiler_params=pltpu.CompilerParams(
            dimension_semantics=("parallel", "parallel", "arbitrary")),
    )(*inputs)
    return out[:M] if Mp != M else out


def conv1x1_bn_act(x, wmat, shift, relu=True, residual=None):
    """1x1 conv (bias-free, scale-folded) + shift [+ residual] [+ ReLU]."""
    n, h, w, cin = x.shape
    coutp = wmat.shape[1]
    a = x.reshape(n * h * w, cin)
    r = residual.reshape(n * h * w, coutp) if residual is not None else None
    y = _matmul_bias_act(a, wmat, shift, residual=r, relu=relu)
    return y.reshape(n, h, w, coutp)


# ---------------------------------------------------------------------------
# Kernel 2: 3x3 conv (padding=1) + shift + ReLU.
#   Width taps are packed into the channel/contraction dim -> 3 row-shifted
#   matmuls per output tile.  The flattened row axis is grid-tiled.
# ---------------------------------------------------------------------------
def _pick_row_tile(h, w_out, target=512):
    """Image rows per 3x3-conv grid step (tile = th * w_out flattened rows)."""
    for th in range(h, 0, -1):
        if h % th:
            continue
        tm = th * w_out
        if tm <= target and (th == h or tm % 8 == 0):
            return th
    return h


def _conv3x3_kernel(x_ref, w_ref, b_ref, o_ref, *, tm, row_off, relu):
    i = pl.program_id(1)
    base = i * tm
    acc = jnp.zeros(o_ref.shape, jnp.float32)
    for di in range(3):                                # 3 height taps, unrolled
        start = base + di * row_off
        if row_off % 8 == 0 and tm % 8 == 0:
            start = pl.multiple_of(start, 8)
        a = x_ref[pl.ds(start, tm), :]                 # (tm, 3*cin)
        acc = acc + jnp.dot(a, w_ref[di], preferred_element_type=jnp.float32)
    y = acc + b_ref[...]
    if relu:
        y = jnp.maximum(y, 0.0)
    o_ref[...] = y.astype(o_ref.dtype)


def conv3x3_bn_act(x, w2, shift, stride=1, relu=True):
    """3x3 conv (padding=1) + folded-BN shift + ReLU, NHWC bf16.

    x:     (n, h, w, cinp)      cinp = (padded) input channels
    w2:    (3, 3*cinp, coutp)   BN scale folded in, channels zero-padded
    shift: (coutp,)
    """
    n, h, w, cinp = x.shape
    coutp = w2.shape[2]
    assert w2.shape[1] == 3 * cinp
    w_out = (w - 1) // stride + 1
    hp = h + 2

    # Spatial zero pad (== conv padding), then pack the 3 width taps into the
    # channel dim, folding the width stride.  The conv becomes 3 row-shifted
    # matmuls with contraction depth 3*cinp.
    xp = jnp.pad(x, ((0, 0), (1, 1), (1, 1), (0, 0)))
    lastcol = (w_out - 1) * stride + 1
    xw = jnp.concatenate(
        [xp[:, :, dj:dj + lastcol:stride, :] for dj in range(3)], axis=-1)
    xwf = xw.reshape(n, hp * w_out, 3 * cinp)           # (n, L_in, 3*cinp)

    L_out = h * w_out
    th = _pick_row_tile(h, w_out)
    tm = th * w_out
    gm = h // th
    tn = _pick_divisor(coutp, (256, 128))
    gj = coutp // tn
    b2 = shift.reshape(1, coutp).astype(jnp.float32)

    kernel = functools.partial(_conv3x3_kernel, tm=tm, row_off=w_out, relu=relu)
    yf = pl.pallas_call(
        kernel,
        out_shape=jax.ShapeDtypeStruct((n, L_out, coutp), jnp.bfloat16),
        grid_spec=pltpu.PrefetchScalarGridSpec(
            num_scalar_prefetch=0,
            grid=(n, gm, gj),
            in_specs=[
                # full per-batch packed image; stays VMEM-resident across (i, j)
                pl.BlockSpec((None, hp * w_out, 3 * cinp),
                             lambda b, i, j: (b, 0, 0)),
                pl.BlockSpec((3, 3 * cinp, tn), lambda b, i, j: (0, 0, j)),
                pl.BlockSpec((1, tn), lambda b, i, j: (0, j)),
            ],
            out_specs=pl.BlockSpec((None, tm, tn), lambda b, i, j: (b, i, j)),
        ),
        compiler_params=pltpu.CompilerParams(
            dimension_semantics=("parallel", "parallel", "parallel"),
            vmem_limit_bytes=48 * 1024 * 1024),
    )(xwf, w2, b2)

    y = yf.reshape(n, h, w_out, coutp)
    if stride > 1:
        # TODO(synk): fold the height stride into the kernel row indexing
        # (strided pl.ds) instead of computing every row and subsampling.
        y = y[:, ::stride, :, :]
    return y


# ---------------------------------------------------------------------------
# Parameters (deterministic, torch OIHW layout) + kernel-ready preparation
# ---------------------------------------------------------------------------
def init_bottleneck_raw(inplanes, planes, stride=1, downsample=None, seed=0):
    if downsample is None:
        downsample = (stride != 1) or (inplanes != planes * 4)
    key = [jax.random.PRNGKey(seed)]

    def nxt():
        key[0], sub = jax.random.split(key[0])
        return sub

    def conv(cout, cin, kh, kw):
        std = (2.0 / (cin * kh * kw)) ** 0.5
        return std * jax.random.normal(nxt(), (cout, cin, kh, kw), jnp.float32)

    def bn(c):
        gamma = 1.0 + 0.05 * jax.random.normal(nxt(), (c,), jnp.float32)
        beta = 0.05 * jax.random.normal(nxt(), (c,), jnp.float32)
        mean = 0.05 * jax.random.normal(nxt(), (c,), jnp.float32)
        var = 0.9 + 0.2 * jax.random.uniform(nxt(), (c,), jnp.float32)
        return (gamma, beta, mean, var)

    return dict(
        stride=stride,
        w1=conv(planes, inplanes, 1, 1), bn1=bn(planes),
        w2=conv(planes, planes, 3, 3), bn2=bn(planes),
        w3=conv(planes * 4, planes, 1, 1), bn3=bn(planes * 4),
        ds_w=conv(planes * 4, inplanes, 1, 1) if downsample else None,
        ds_bn=bn(planes * 4) if downsample else None,
    )


def _fold_bn(stats, eps=1e-5):
    gamma, beta, mean, var = stats
    s = gamma / jnp.sqrt(var + eps)
    return s, beta - mean * s


def prepare_bottleneck_params(raw):
    """Fold eval-mode BN scale into the weights, zero-pad channels to multiples
    of 128 (lane-dense), and lay weights out for the Pallas kernels (bf16)."""
    inplanes = raw['w1'].shape[1]
    planes = raw['w1'].shape[0]
    cout = raw['w3'].shape[0]                 # = 4 * planes
    c1p = _round_up(planes, 128)              # conv1/conv2 padded channels
    c3p = _round_up(cout, 128)                # block output padded channels

    def mat1x1(wt, scale, cin_pad, cout_pad):
        m = (wt[:, :, 0, 0] * scale[:, None]).T          # (cin, cout)
        m = jnp.pad(m, ((0, cin_pad - m.shape[0]), (0, cout_pad - m.shape[1])))
        return m.astype(jnp.bfloat16)

    def vec(shift, cpad):
        return jnp.pad(shift, (0, cpad - shift.shape[0])).astype(jnp.float32)

    s1, b1 = _fold_bn(raw['bn1'])
    s2, b2 = _fold_bn(raw['bn2'])
    s3, b3 = _fold_bn(raw['bn3'])

    # conv2: (cout, cin, 3, 3) -> fold scale -> pad channels ->
    # (kh, kw, cin_p, cout_p) -> (3, 3*cin_p, cout_p), matching the width-tap
    # packed activation channel layout [dj=0 | dj=1 | dj=2].
    w2 = raw['w2'] * s2[:, None, None, None]
    w2 = jnp.pad(w2, ((0, c1p - planes), (0, c1p - planes), (0, 0), (0, 0)))
    w2 = jnp.transpose(w2, (2, 3, 1, 0)).reshape(3, 3 * c1p, c1p)
    w2 = w2.astype(jnp.bfloat16)

    p = dict(stride=raw['stride'], cout=cout, c3p=c3p,
             w1=mat1x1(raw['w1'], s1, inplanes, c1p), b1=vec(b1, c1p),
             w2=w2, b2=vec(b2, c1p),
             w3=mat1x1(raw['w3'], s3, c1p, c3p), b3=vec(b3, c3p))
    if raw['ds_w'] is not None:
        sd, bd = _fold_bn(raw['ds_bn'])
        p['downsample'] = dict(w=mat1x1(raw['ds_w'], sd, inplanes, c3p),
                               shift=vec(bd, c3p))
    else:
        p['downsample'] = None
    return p


# ---------------------------------------------------------------------------
# Bottleneck forward (matches the PyTorch module in eval mode)
# ---------------------------------------------------------------------------
def bottleneck_forward_nhwc(params, x):
    """x: (n, h, w, inplanes) bf16 NHWC -> (n, h_out, w_out, 4*planes) bf16."""
    stride = params['stride']
    c3p, cout = params['c3p'], params['cout']

    ds = params['downsample']
    if ds is None:
        residual = x                               # inplanes == 4*planes here
        if residual.shape[-1] != c3p:              # only for tiny test configs
            residual = jnp.pad(
                residual,
                ((0, 0), (0, 0), (0, 0), (0, c3p - residual.shape[-1])))
    else:
        xr = x[:, ::stride, ::stride, :] if stride > 1 else x  # exact for 1x1
        residual = conv1x1_bn_act(xr, ds['w'], ds['shift'], relu=False)

    out = conv1x1_bn_act(x, params['w1'], params['b1'], relu=True)
    out = conv3x3_bn_act(out, params['w2'], params['b2'], stride=stride,
                         relu=True)
    out = conv1x1_bn_act(out, params['w3'], params['b3'], relu=True,
                         residual=residual)
    return out[..., :cout]


def bottleneck_forward(params, x_nchw):
    # Layout transpose + dtype cast live only in this thin wrapper; chain
    # blocks through bottleneck_forward_nhwc to amortize them over a network.
    x = jnp.transpose(x_nchw, (0, 2, 3, 1)).astype(jnp.bfloat16)
    y = bottleneck_forward_nhwc(params, x)
    return jnp.transpose(y, (0, 3, 1, 2)).astype(jnp.float32)


# Pure-JAX f32 reference for correctness checking.
def bottleneck_reference(raw, x_nchw):
    stride = raw['stride']

    def conv(x, wt, s=1, p=0):
        return lax.conv_general_dilated(
            x, wt, (s, s), [(p, p), (p, p)],
            dimension_numbers=('NCHW', 'OIHW', 'NCHW'))

    def bn(x, stats):
        s, b = _fold_bn(stats)
        return x * s[None, :, None, None] + b[None, :, None, None]

    out = jax.nn.relu(bn(conv(x_nchw, raw['w1']), raw['bn1']))
    out = jax.nn.relu(bn(conv(out, raw['w2'], s=stride, p=1), raw['bn2']))
    out = bn(conv(out, raw['w3']), raw['bn3'])
    if raw['ds_w'] is not None:
        residual = bn(conv(x_nchw, raw['ds_w'], s=stride), raw['ds_bn'])
    else:
        residual = x_nchw
    return jax.nn.relu(out + residual)


if __name__ == "__main__":
    def run_case(name, inplanes, planes, stride, n, hw, seed):
        raw = init_bottleneck_raw(inplanes, planes, stride, seed=seed)
        params = prepare_bottleneck_params(raw)
        x = jax.random.normal(jax.random.PRNGKey(0), (n, inplanes, hw, hw),
                              jnp.float32)
        fwd = jax.jit(functools.partial(bottleneck_forward, params))
        y = jax.block_until_ready(fwd(x))

        h_out = (hw - 1) // stride + 1
        assert y.shape == (n, planes * 4, h_out, h_out), (name, y.shape)
        assert y.dtype == jnp.float32, name
        assert bool(jnp.all(jnp.isfinite(y))), name

        # Loose check vs. pure-JAX f32 reference (kernels run in bf16).
        ref = bottleneck_reference(raw, x)
        err = float(jnp.max(jnp.abs(y - ref)))
        scl = float(jnp.max(jnp.abs(ref)))
        assert err <= 0.08 * scl + 0.05, (name, err, scl)

    # Identity-residual path (inplanes == planes*4), stride 1.
    run_case("identity", inplanes=64, planes=16, stride=1, n=2, hw=16, seed=0)
    # Downsample + stride-2 path.
    run_case("downsample", inplanes=32, planes=16, stride=2, n=2, hw=8, seed=1)

    print("KERNEL_OK")
</pallas_src>

<mosaic_0001>
module attributes {stable_mosaic.version = 11 : i64} {
  func.func @_mm_bias_kernel(%arg0: i32, %arg1: i32, %arg2: i32, %arg3: memref<512x64xbf16, #tpu.memory_space<vmem>>, %arg4: memref<64x128xbf16, #tpu.memory_space<vmem>>, %arg5: memref<1x128xf32, #tpu.memory_space<vmem>>, %arg6: memref<512x128xbf16, #tpu.memory_space<vmem>>, %arg7: memref<512x128xf32, #tpu.memory_space<vmem>>) attributes {dimension_semantics = [#tpu.dimension_semantics<parallel>, #tpu.dimension_semantics<parallel>, #tpu.dimension_semantics<arbitrary>], iteration_bounds = array<i64: 1, 1, 1>, scalar_prefetch = 0 : i64, scratch_operands = 1 : i64, tpu.core_type = #tpu.core_type<tc>, window_params = [{transform_indices = @transform_0, window_bounds = array<i64: 512, 64>}, {transform_indices = @transform_1, window_bounds = array<i64: 64, 128>}, {transform_indices = @transform_2, window_bounds = array<i64: 1, 128>}, {transform_indices = @transform_3, window_bounds = array<i64: 512, 128>}]} {
    %c0_i32 = arith.constant 0 : i32
    %0 = arith.cmpi eq, %arg2, %c0_i32 : i32
    %1 = arith.extui %0 : i1 to i32
    %c0_i32_0 = arith.constant 0 : i32
    %2 = arith.cmpi ne, %1, %c0_i32_0 : i32
    scf.if %2 {
      %cst_10 = arith.constant 0.000000e+00 : f32
      %12 = vector.broadcast %cst_10 : f32 to vector<512x128xf32>
      %c0_11 = arith.constant 0 : index
      %c0_12 = arith.constant 0 : index
      %13 = vector.load %arg7[%c0_11, %c0_12] : memref<512x128xf32, #tpu.memory_space<vmem>>, vector<512x128xf32>
      tpu.vector_store %arg7[%c0_11, %c0_12], %12 {strides = array<i32>} : memref<512x128xf32, #tpu.memory_space<vmem>>, vector<512x128xf32>,
    } else {
    }
    %c0 = arith.constant 0 : index
    %c0_1 = arith.constant 0 : index
    %3 = vector.load %arg7[%c0, %c0_1] : memref<512x128xf32, #tpu.memory_space<vmem>>, vector<512x128xf32>
    %c0_2 = arith.constant 0 : index
    %c0_3 = arith.constant 0 : index
    %4 = vector.load %arg3[%c0_2, %c0_3] : memref<512x64xbf16, #tpu.memory_space<vmem>>, vector<512x64xbf16>
    %c0_4 = arith.constant 0 : index
    %c0_5 = arith.constant 0 : index
    %5 = vector.load %arg4[%c0_4, %c0_5] : memref<64x128xbf16, #tpu.memory_space<vmem>>, vector<64x128xbf16>
    %cst = arith.constant dense<0.000000e+00> : vector<512x128xf32>
    %6 = tpu.matmul %4, %5, %cst {dimension_numbers = #tpu.dot_dimension_numbers<[1], [0], [0], [1], [0, 0, 1, 1], [], []>} : vector<512x64xbf16>, vector<64x128xbf16>, vector<512x128xf32> -> vector<512x128xf32>
    %7 = arith.addf %3, %6 : vector<512x128xf32>
    %c0_6 = arith.constant 0 : index
    %c0_7 = arith.constant 0 : index
    %8 = vector.load %arg7[%c0_6, %c0_7] : memref<512x128xf32, #tpu.memory_space<vmem>>, vector<512x128xf32>
    tpu.vector_store %arg7[%c0_6, %c0_7], %7 {strides = array<i32>} : memref<512x128xf32, #tpu.memory_space<vmem>>, vector<512x128xf32>,
    %c0_i32_8 = arith.constant 0 : i32
    %9 = arith.cmpi eq, %arg2, %c0_i32_8 : i32
    %10 = arith.extui %9 : i1 to i32
    %c0_i32_9 = arith.constant 0 : i32
    %11 = arith.cmpi ne, %10, %c0_i32_9 : i32
    scf.if %11 {
      %c0_10 = arith.constant 0 : index
      %c0_11 = arith.constant 0 : index
      %12 = vector.load %arg7[%c0_10, %c0_11] : memref<512x128xf32, #tpu.memory_space<vmem>>, vector<512x128xf32>
      %c0_12 = arith.constant 0 : index
      %c0_13 = arith.constant 0 : index
      %13 = vector.load %arg5[%c0_12, %c0_13] : memref<1x128xf32, #tpu.memory_space<vmem>>, vector<1x128xf32>
      %14 = vector.broadcast %13 : vector<1x128xf32> to vector<512x128xf32>
      %15 = arith.addf %12, %14 : vector<512x128xf32>
      %cst_14 = arith.constant 0.000000e+00 : f32
      %16 = vector.broadcast %cst_14 : f32 to vector<512x128xf32>
      %17 = arith.maximumf %15, %16 : vector<512x128xf32>
      %18 = arith.truncf %17 : vector<512x128xf32> to vector<512x128xbf16>
      %c0_15 = arith.constant 0 : index
      %c0_16 = arith.constant 0 : index
      %19 = vector.load %arg6[%c0_15, %c0_16] : memref<512x128xbf16, #tpu.memory_space<vmem>>, vector<512x128xbf16>
      tpu.vector_store %arg6[%c0_15, %c0_16], %18 {strides = array<i32>} : memref<512x128xbf16, #tpu.memory_space<vmem>>, vector<512x128xbf16>,
    } else {
    }
    return
  }
  func.func @transform_0(%arg0: i32, %arg1: i32, %arg2: i32) -> (i32, i32) {
    %c0_i32 = arith.constant 0 : i32
    return %arg0, %arg2 : i32, i32
  }
  func.func @transform_1(%arg0: i32, %arg1: i32, %arg2: i32) -> (i32, i32) {
    %c0_i32 = arith.constant 0 : i32
    return %arg2, %arg1 : i32, i32
  }
  func.func @transform_2(%arg0: i32, %arg1: i32, %arg2: i32) -> (i32, i32) {
    %c0_i32 = arith.constant 0 : i32
    %c0_i32_0 = arith.constant 0 : i32
    return %c0_i32, %arg1 : i32, i32
  }
  func.func @transform_3(%arg0: i32, %arg1: i32, %arg2: i32) -> (i32, i32) {
    %c0_i32 = arith.constant 0 : i32
    return %arg0, %arg1 : i32, i32
  }
}

module attributes {stable_mosaic.version = 11 : i64} {
  func.func @_conv3x3_kernel(%arg0: i32, %arg1: i32, %arg2: i32, %arg3: memref<1x288x384xbf16, #tpu.memory_space<vmem>>, %arg4: memref<3x384x128xbf16, #tpu.memory_space<vmem>>, %arg5: memref<1x128xf32, #tpu.memory_space<vmem>>, %arg6: memref<1x256x128xbf16, #tpu.memory_space<vmem>>) attributes {dimension_semantics = [#tpu.dimension_semantics<parallel>, #tpu.dimension_semantics<parallel>, #tpu.dimension_semantics<parallel>], iteration_bounds = array<i64: 2, 1, 1>, scalar_prefetch = 0 : i64, scratch_operands = 0 : i64, tpu.core_type = #tpu.core_type<tc>, window_params = [{transform_indices = @transform_0, window_bounds = array<i64: 1, 288, 384>}, {transform_indices = @transform_1, window_bounds = array<i64: 3, 384, 128>}, {transform_indices = @transform_2, window_bounds = array<i64: 1, 128>}, {transform_indices = @transform_3, window_bounds = array<i64: 1, 256, 128>}]} {
    %c256_i32 = arith.constant 256 : i32
    %0 = arith.muli %arg1, %c256_i32 : i32
    %cst = arith.constant 0.000000e+00 : f32
    %1 = vector.broadcast %cst : f32 to vector<256x128xf32>
    %c0_i32 = arith.constant 0 : i32
    %2 = arith.addi %0, %c0_i32 : i32
    %3 = tpu.assume_multiple %2, 8 : i32
    %c0 = arith.constant 0 : index
    %4 = arith.index_cast %3 : i32 to index
    %c0_0 = arith.constant 0 : index
    %5 = vector.load %arg3[%c0, %4, %c0_0] : memref<1x288x384xbf16, #tpu.memory_space<vmem>>, vector<1x256x384xbf16>
    %6 = vector.shape_cast %5 : vector<1x256x384xbf16> to vector<256x384xbf16>
    %c0_1 = arith.constant 0 : index
    %c0_2 = arith.constant 0 : index
    %c0_3 = arith.constant 0 : index
    %7 = vector.load %arg4[%c0_1, %c0_2, %c0_3] : memref<3x384x128xbf16, #tpu.memory_space<vmem>>, vector<1x384x128xbf16>
    %8 = vector.shape_cast %7 : vector<1x384x128xbf16> to vector<384x128xbf16>
    %cst_4 = arith.constant dense<0.000000e+00> : vector<256x128xf32>
    %9 = tpu.matmul %6, %8, %cst_4 {dimension_numbers = #tpu.dot_dimension_numbers<[1], [0], [0], [1], [0, 0, 1, 1], [], []>} : vector<256x384xbf16>, vector<384x128xbf16>, vector<256x128xf32> -> vector<256x128xf32>
    %10 = arith.addf %1, %9 : vector<256x128xf32>
    %c16_i32 = arith.constant 16 : i32
    %11 = arith.addi %0, %c16_i32 : i32
    %12 = tpu.assume_multiple %11, 8 : i32
    %c0_5 = arith.constant 0 : index
    %13 = arith.index_cast %12 : i32 to index
    %c0_6 = arith.constant 0 : index
    %14 = vector.load %arg3[%c0_5, %13, %c0_6] : memref<1x288x384xbf16, #tpu.memory_space<vmem>>, vector<1x256x384xbf16>
    %15 = vector.shape_cast %14 : vector<1x256x384xbf16> to vector<256x384xbf16>
    %c1 = arith.constant 1 : index
    %c0_7 = arith.constant 0 : index
    %c0_8 = arith.constant 0 : index
    %16 = vector.load %arg4[%c1, %c0_7, %c0_8] : memref<3x384x128xbf16, #tpu.memory_space<vmem>>, vector<1x384x128xbf16>
    %17 = vector.shape_cast %16 : vector<1x384x128xbf16> to vector<384x128xbf16>
    %cst_9 = arith.constant dense<0.000000e+00> : vector<256x128xf32>
    %18 = tpu.matmul %15, %17, %cst_9 {dimension_numbers = #tpu.dot_dimension_numbers<[1], [0], [0], [1], [0, 0, 1, 1], [], []>} : vector<256x384xbf16>, vector<384x128xbf16>, vector<256x128xf32> -> vector<256x128xf32>
    %19 = arith.addf %10, %18 : vector<256x128xf32>
    %c32_i32 = arith.constant 32 : i32
    %20 = arith.addi %0, %c32_i32 : i32
    %21 = tpu.assume_multiple %20, 8 : i32
    %c0_10 = arith.constant 0 : index
    %22 = arith.index_cast %21 : i32 to index
    %c0_11 = arith.constant 0 : index
    %23 = vector.load %arg3[%c0_10, %22, %c0_11] : memref<1x288x384xbf16, #tpu.memory_space<vmem>>, vector<1x256x384xbf16>
    %24 = vector.shape_cast %23 : vector<1x256x384xbf16> to vector<256x384xbf16>
    %c2 = arith.constant 2 : index
    %c0_12 = arith.constant 0 : index
    %c0_13 = arith.constant 0 : index
    %25 = vector.load %arg4[%c2, %c0_12, %c0_13] : memref<3x384x128xbf16, #tpu.memory_space<vmem>>, vector<1x384x128xbf16>
    %26 = vector.shape_cast %25 : vector<1x384x128xbf16> to vector<384x128xbf16>
    %cst_14 = arith.constant dense<0.000000e+00> : vector<256x128xf32>
    %27 = tpu.matmul %24, %26, %cst_14 {dimension_numbers = #tpu.dot_dimension_numbers<[1], [0], [0], [1], [0, 0, 1, 1], [], []>} : vector<256x384xbf16>, vector<384x128xbf16>, vector<256x128xf32> -> vector<256x128xf32>
    %28 = arith.addf %19, %27 : vector<256x128xf32>
    %c0_15 = arith.constant 0 : index
    %c0_16 = arith.constant 0 : index
    %29 = vector.load %arg5[%c0_15, %c0_16] : memref<1x128xf32, #tpu.memory_space<vmem>>, vector<1x128xf32>
    %30 = vector.broadcast %29 : vector<1x128xf32> to vector<256x128xf32>
    %31 = arith.addf %28, %30 : vector<256x128xf32>
    %cst_17 = arith.constant 0.000000e+00 : f32
    %32 = vector.broadcast %cst_17 : f32 to vector<256x128xf32>
    %33 = arith.maximumf %31, %32 : vector<256x128xf32>
    %34 = arith.truncf %33 : vector<256x128xf32> to vector<256x128xbf16>
    %c0_18 = arith.constant 0 : index
    %c0_19 = arith.constant 0 : index
    %c0_20 = arith.constant 0 : index
    %35 = vector.load %arg6[%c0_18, %c0_19, %c0_20] : memref<1x256x128xbf16, #tpu.memory_space<vmem>>, vector<1x256x128xbf16>
    %36 = vector.shape_cast %35 : vector<1x256x128xbf16> to vector<256x128xbf16>
    %37 = vector.shape_cast %34 : vector<256x128xbf16> to vector<1x256x128xbf16>
    tpu.vector_store %arg6[%c0_18, %c0_19, %c0_20], %37 {strides = array<i32>} : memref<1x256x128xbf16, #tpu.memory_space<vmem>>, vector<1x256x128xbf16>,
    return
  }
  func.func @transform_0(%arg0: i32, %arg1: i32, %arg2: i32) -> (i32, i32, i32) {
    %c0_i32 = arith.constant 0 : i32
    %c0_i32_0 = arith.constant 0 : i32
    %c0_i32_1 = arith.constant 0 : i32
    return %arg0, %c0_i32, %c0_i32_0 : i32, i32, i32
  }
  func.func @transform_1(%arg0: i32, %arg1: i32, %arg2: i32) -> (i32, i32, i32) {
    %c0_i32 = arith.constant 0 : i32
    %c0_i32_0 = arith.constant 0 : i32
    %c0_i32_1 = arith.constant 0 : i32
    return %c0_i32, %c0_i32_0, %arg2 : i32, i32, i32
  }
  func.func @transform_2(%arg0: i32, %arg1: i32, %arg2: i32) -> (i32, i32) {
    %c0_i32 = arith.constant 0 : i32
    %c0_i32_0 = arith.constant 0 : i32
    return %c0_i32, %arg2 : i32, i32
  }
  func.func @transform_3(%arg0: i32, %arg1: i32, %arg2: i32) -> (i32, i32, i32) {
    %c0_i32 = arith.constant 0 : i32
    return %arg0, %arg1, %arg2 : i32, i32, i32
  }
}

module attributes {stable_mosaic.version = 11 : i64} {
  func.func @_mm_bias_kernel(%arg0: i32, %arg1: i32, %arg2: i32, %arg3: memref<512x128xbf16, #tpu.memory_space<vmem>>, %arg4: memref<128x128xbf16, #tpu.memory_space<vmem>>, %arg5: memref<1x128xf32, #tpu.memory_space<vmem>>, %arg6: memref<512x128xbf16, #tpu.memory_space<vmem>>, %arg7: memref<512x128xbf16, #tpu.memory_space<vmem>>, %arg8: memref<512x128xf32, #tpu.memory_space<vmem>>) attributes {dimension_semantics = [#tpu.dimension_semantics<parallel>, #tpu.dimension_semantics<parallel>, #tpu.dimension_semantics<arbitrary>], iteration_bounds = array<i64: 1, 1, 1>, scalar_prefetch = 0 : i64, scratch_operands = 1 : i64, tpu.core_type = #tpu.core_type<tc>, window_params = [{transform_indices = @transform_0, window_bounds = array<i64: 512, 128>}, {transform_indices = @transform_1, window_bounds = array<i64: 128, 128>}, {transform_indices = @transform_2, window_bounds = array<i64: 1, 128>}, {transform_indices = @transform_3, window_bounds = array<i64: 512, 128>}, {transform_indices = @transform_4, window_bounds = array<i64: 512, 128>}]} {
    %c0_i32 = arith.constant 0 : i32
    %0 = arith.cmpi eq, %arg2, %c0_i32 : i32
    %1 = arith.extui %0 : i1 to i32
    %c0_i32_0 = arith.constant 0 : i32
    %2 = arith.cmpi ne, %1, %c0_i32_0 : i32
    scf.if %2 {
      %cst_10 = arith.constant 0.000000e+00 : f32
      %12 = vector.broadcast %cst_10 : f32 to vector<512x128xf32>
      %c0_11 = arith.constant 0 : index
      %c0_12 = arith.constant 0 : index
      %13 = vector.load %arg8[%c0_11, %c0_12] : memref<512x128xf32, #tpu.memory_space<vmem>>, vector<512x128xf32>
      tpu.vector_store %arg8[%c0_11, %c0_12], %12 {strides = array<i32>} : memref<512x128xf32, #tpu.memory_space<vmem>>, vector<512x128xf32>,
    } else {
    }
    %c0 = arith.constant 0 : index
    %c0_1 = arith.constant 0 : index
    %3 = vector.load %arg8[%c0, %c0_1] : memref<512x128xf32, #tpu.memory_space<vmem>>, vector<512x128xf32>
    %c0_2 = arith.constant 0 : index
    %c0_3 = arith.constant 0 : index
    %4 = vector.load %arg3[%c0_2, %c0_3] : memref<512x128xbf16, #tpu.memory_space<vmem>>, vector<512x128xbf16>
    %c0_4 = arith.constant 0 : index
    %c0_5 = arith.constant 0 : index
    %5 = vector.load %arg4[%c0_4, %c0_5] : memref<128x128xbf16, #tpu.memory_space<vmem>>, vector<128x128xbf16>
    %cst = arith.constant dense<0.000000e+00> : vector<512x128xf32>
    %6 = tpu.matmul %4, %5, %cst {dimension_numbers = #tpu.dot_dimension_numbers<[1], [0], [0], [1], [0, 0, 1, 1], [], []>} : vector<512x128xbf16>, vector<128x128xbf16>, vector<512x128xf32> -> vector<512x128xf32>
    %7 = arith.addf %3, %6 : vector<512x128xf32>
    %c0_6 = arith.constant 0 : index
    %c0_7 = arith.constant 0 : index
    %8 = vector.load %arg8[%c0_6, %c0_7] : memref<512x128xf32, #tpu.memory_space<vmem>>, vector<512x128xf32>
    tpu.vector_store %arg8[%c0_6, %c0_7], %7 {strides = array<i32>} : memref<512x128xf32, #tpu.memory_space<vmem>>, vector<512x128xf32>,
    %c0_i32_8 = arith.constant 0 : i32
    %9 = arith.cmpi eq, %arg2, %c0_i32_8 : i32
    %10 = arith.extui %9 : i1 to i32
    %c0_i32_9 = arith.constant 0 : i32
    %11 = arith.cmpi ne, %10, %c0_i32_9 : i32
    scf.if %11 {
      %c0_10 = arith.constant 0 : index
      %c0_11 = arith.constant 0 : index
      %12 = vector.load %arg8[%c0_10, %c0_11] : memref<512x128xf32, #tpu.memory_space<vmem>>, vector<512x128xf32>
      %c0_12 = arith.constant 0 : index
      %c0_13 = arith.constant 0 : index
      %13 = vector.load %arg5[%c0_12, %c0_13] : memref<1x128xf32, #tpu.memory_space<vmem>>, vector<1x128xf32>
      %14 = vector.broadcast %13 : vector<1x128xf32> to vector<512x128xf32>
      %15 = arith.addf %12, %14 : vector<512x128xf32>
      %c0_14 = arith.constant 0 : index
      %c0_15 = arith.constant 0 : index
      %16 = vector.load %arg6[%c0_14, %c0_15] : memref<512x128xbf16, #tpu.memory_space<vmem>>, vector<512x128xbf16>
      %17 = arith.extf %16 : vector<512x128xbf16> to vector<512x128xf32>
      %18 = arith.addf %15, %17 : vector<512x128xf32>
      %cst_16 = arith.constant 0.000000e+00 : f32
      %19 = vector.broadcast %cst_16 : f32 to vector<512x128xf32>
      %20 = arith.maximumf %18, %19 : vector<512x128xf32>
      %21 = arith.truncf %20 : vector<512x128xf32> to vector<512x128xbf16>
      %c0_17 = arith.constant 0 : index
      %c0_18 = arith.constant 0 : index
      %22 = vector.load %arg7[%c0_17, %c0_18] : memref<512x128xbf16, #tpu.memory_space<vmem>>, vector<512x128xbf16>
      tpu.vector_store %arg7[%c0_17, %c0_18], %21 {strides = array<i32>} : memref<512x128xbf16, #tpu.memory_space<vmem>>, vector<512x128xbf16>,
    } else {
    }
    return
  }
  func.func @transform_0(%arg0: i32, %arg1: i32, %arg2: i32) -> (i32, i32) {
    %c0_i32 = arith.constant 0 : i32
    return %arg0, %arg2 : i32, i32
  }
  func.func @transform_1(%arg0: i32, %arg1: i32, %arg2: i32) -> (i32, i32) {
    %c0_i32 = arith.constant 0 : i32
    return %arg2, %arg1 : i32, i32
  }
  func.func @transform_2(%arg0: i32, %arg1: i32, %arg2: i32) -> (i32, i32) {
    %c0_i32 = arith.constant 0 : i32
    %c0_i32_0 = arith.constant 0 : i32
    return %c0_i32, %arg1 : i32, i32
  }
  func.func @transform_3(%arg0: i32, %arg1: i32, %arg2: i32) -> (i32, i32) {
    %c0_i32 = arith.constant 0 : i32
    return %arg0, %arg1 : i32, i32
  }
  func.func @transform_4(%arg0: i32, %arg1: i32, %arg2: i32) -> (i32, i32) {
    %c0_i32 = arith.constant 0 : i32
    return %arg0, %arg1 : i32, i32
  }
}

</mosaic_0001>

<bundles_post_ra>
// kernel: bottleneck_forward.3
= control target key start
LH: loop header
LB: loop body
LE: loop exit
PB: predicated region body
PF: predicated region fallthrough
CT: control target
= control target key end

     0   :  { %vm403_vm0 = vcmask 523264   ;;  %s2308_s1 = inlined_call_operand.vmem [shape: bf16[64,128], index: 1, kind: input, shape index: {}]   ;;  %s2309_s0 = inlined_call_operand.vmem [shape: bf16[512,64], index: 0, kind: input, shape index: {}]   ;;  %s2310_s2 = inlined_call_operand.vmem [shape: f32[1,128], index: 2, kind: input, shape index: {}]   ;;  %s2311_s3 = inlined_call_operand.vmem [shape: bf16[512,128], index: 3, kind: output, shape index: {}]  }
   0x1   :  { %v1947_v0 = vld [vmem:[%s2308_s1] sm:$0xff]   ;;  %v1948_v1 = vld [vmem:[%s2308_s1 + $0x8] sm:$0xff]   ;;  %v1949_v2 = vld [vmem:[%s2308_s1 + $0x10] sm:$0xff]  }
   0x2   :  { %1867 = vmatprep.subr.bf16.mxu0 %v1947_v0  ;;  %1939 = vmatprep.subr.bf16.mxu1 %v1947_v0  ;;  %v1951_v3 = vld [vmem:[%s2309_s0] sm:$0xff]   ;;  %v1950_v5 = vld [vmem:[%s2308_s1 + $0x18] sm:$0xff]   ;;  %v1953_v6 = vld [vmem:[%s2309_s0 + $0x8] sm:$0xff]  }
   0x3   :  { %1868 = vmatpush3.bf16.msra.mxu0 %v1947_v0  ;;  %1943 = vmatpush3.bf16.msra.mxu1 %v1947_v0  ;;  %v1952_v4 = vld [vmem:[%s2309_s0 + $0x80] sm:$0xff]   ;;  %v1954_v7 = vld [vmem:[%s2309_s0 + $0x88] sm:$0xff]   ;;  %v1955_v8 = vld [vmem:[%s2309_s0 + $0x10] sm:$0xff]  }
   0x4   :  { %1869 = vmatprep.subr.bf16.mxu0 %v1948_v1  ;;  %1940 = vmatprep.subr.bf16.mxu1 %v1948_v1  ;;  %v1956_v9 = vld [vmem:[%s2309_s0 + $0x90] sm:$0xff]   ;;  %v1957_v10 = vld [vmem:[%s2309_s0 + $0x18] sm:$0xff]   ;;  %v1959_v12 = vld [vmem:[%s2309_s0 + $0x20] sm:$0xff]  }
   0x5   :  { %1875 = vmatprep.mubr.msk.bf16.mxu0 %vm403_vm0, %v1951_v3  ;;  %1907 = vmatprep.mubr.msk.bf16.mxu1 %vm403_vm0, %v1952_v4  ;;  %v1958_v11 = vld [vmem:[%s2309_s0 + $0x98] sm:$0xff]   ;;  %v1960_v13 = vld [vmem:[%s2309_s0 + $0xa0] sm:$0xff]   ;;  %v1961_v14 = vld [vmem:[%s2309_s0 + $0x28] sm:$0xff]  }
   0x6   :  { %v1962_v15 = vld [vmem:[%s2309_s0 + $0xa8] sm:$0xff]   ;;  %v1963_v16 = vld [vmem:[%s2309_s0 + $0x30] sm:$0xff]   ;;  %v1965_v18 = vld [vmem:[%s2309_s0 + $0x38] sm:$0xff]  }
   0x7   :  { %1870 = vmatpush3.bf16.msra.mxu0 %v1948_v1  ;;  %1944 = vmatpush3.bf16.msra.mxu1 %v1948_v1  ;;  %v1964_v17 = vld [vmem:[%s2309_s0 + $0xb0] sm:$0xff]   ;;  %v1966_v19 = vld [vmem:[%s2309_s0 + $0xb8] sm:$0xff]   ;;  %v1967_v20 = vld [vmem:[%s2309_s0 + $0x40] sm:$0xff]  }
   0x8   :  { %1871 = vmatprep.subr.bf16.mxu0 %v1949_v2  ;;  %1941 = vmatprep.subr.bf16.mxu1 %v1949_v2  ;;  %v1968_v21 = vld [vmem:[%s2309_s0 + $0xc0] sm:$0xff]   ;;  %v1969_v22 = vld [vmem:[%s2309_s0 + $0x48] sm:$0xff]   ;;  %v1971_v24 = vld [vmem:[%s2309_s0 + $0x50] sm:$0xff]  }
   0x9   :  { %v1970_v23 = vld [vmem:[%s2309_s0 + $0xc8] sm:$0xff]   ;;  %v1972_v25 = vld [vmem:[%s2309_s0 + $0xd0] sm:$0xff]   ;;  %v1973_v26 = vld [vmem:[%s2309_s0 + $0x58] sm:$0xff]  }
   0xa   :  { %v1974_v27 = vld [vmem:[%s2309_s0 + $0xd8] sm:$0xff]   ;;  %v1975_v28 = vld [vmem:[%s2309_s0 + $0x60] sm:$0xff]   ;;  %v1977_v30 = vld [vmem:[%s2309_s0 + $0x68] sm:$0xff]  }
   0xb   :  { %1872 = vmatpush3.bf16.msra.mxu0 %v1949_v2  ;;  %1945 = vmatpush3.bf16.msra.mxu1 %v1949_v2  ;;  %v1976_v29 = vld [vmem:[%s2309_s0 + $0xe0] sm:$0xff]   ;;  %v1978_v31 = vld [vmem:[%s2309_s0 + $0xe8] sm:$0xff]   ;;  %v1979_v32 = vld [vmem:[%s2309_s0 + $0x70] sm:$0xff]  }
   0xc   :  { %1873 = vmatprep.subr.bf16.mxu0 %v1950_v5  ;;  %1942 = vmatprep.subr.bf16.mxu1 %v1950_v5  ;;  %v1980_v33 = vld [vmem:[%s2309_s0 + $0xf0] sm:$0xff]   ;;  %v1981_v34 = vld [vmem:[%s2309_s0 + $0x78] sm:$0xff]   ;;  %v2146_v36 = vld [vmem:[%s2310_s2] ss:$0 sm:$0xff] }
   0xd   :  { %v1982_v35 = vld [vmem:[%s2309_s0 + $0xf8] sm:$0xff]  }
   0xf   :  { %1874 = vmatpush3.bf16.msra.mxu0 %v1950_v5  ;;  %1946 = vmatpush3.bf16.msra.mxu1 %v1950_v5 }
  0x12   :  { %1876 = vmatmul.mubr.msk.bf16.vlgmr.msra.gmra.mrb[0].mxu0 %vm403_vm0, %v1953_v6  ;;  %1908 = vmatmul.mubr.msk.bf16.vlgmr.msra.gmra.mrb[0].mxu1 %vm403_vm0, %v1954_v7 }
  0x13   :  { %1879 = vmatprep.mubr.msk.bf16.mxu0 %vm403_vm0, %v1955_v8  ;;  %1911 = vmatprep.mubr.msk.bf16.mxu1 %vm403_vm0, %v1956_v9 }
  0x1a   :  { %1880 = vmatmul.mubr.msk.bf16.gmra.mrb[4].mxu0 %vm403_vm0, %v1957_v10  ;;  %1912 = vmatmul.mubr.msk.bf16.gmra.mrb[4].mxu1 %vm403_vm0, %v1958_v11 }
  0x1b   :  { %1883 = vmatprep.mubr.msk.bf16.mxu0 %vm403_vm0, %v1959_v12  ;;  %1915 = vmatprep.mubr.msk.bf16.mxu1 %vm403_vm0, %v1960_v13 }
  0x22   :  { %1884 = vmatmul.mubr.msk.bf16.gmra.mrb[8].mxu0 %vm403_vm0, %v1961_v14  ;;  %1916 = vmatmul.mubr.msk.bf16.gmra.mrb[8].mxu1 %vm403_vm0, %v1962_v15 }
  0x23   :  { %1887 = vmatprep.mubr.msk.bf16.mxu0 %vm403_vm0, %v1963_v16  ;;  %1919 = vmatprep.mubr.msk.bf16.mxu1 %vm403_vm0, %v1964_v17 }
  0x2a   :  { %1888 = vmatmul.mubr.msk.bf16.gmra.mrb[12].mxu0 %vm403_vm0, %v1965_v18  ;;  %1920 = vmatmul.mubr.msk.bf16.gmra.mrb[12].mxu1 %vm403_vm0, %v1966_v19 }
  0x2b   :  { %1891 = vmatprep.mubr.msk.bf16.mxu0 %vm403_vm0, %v1967_v20  ;;  %1923 = vmatprep.mubr.msk.bf16.mxu1 %vm403_vm0, %v1968_v21 }
  0x32   :  { %1892 = vmatmul.mubr.msk.bf16.gmra.mrb[16].mxu0 %vm403_vm0, %v1969_v22  ;;  %1924 = vmatmul.mubr.msk.bf16.gmra.mrb[16].mxu1 %vm403_vm0, %v1970_v23 }
  0x33   :  { %1895 = vmatprep.mubr.msk.bf16.mxu0 %vm403_vm0, %v1971_v24  ;;  %1927 = vmatprep.mubr.msk.bf16.mxu1 %vm403_vm0, %v1972_v25 }
  0x3a   :  { %1896 = vmatmul.mubr.msk.bf16.gmra.mrb[20].mxu0 %vm403_vm0, %v1973_v26  ;;  %1928 = vmatmul.mubr.msk.bf16.gmra.mrb[20].mxu1 %vm403_vm0, %v1974_v27 }
  0x3b   :  { %1899 = vmatprep.mubr.msk.bf16.mxu0 %vm403_vm0, %v1975_v28  ;;  %1931 = vmatprep.mubr.msk.bf16.mxu1 %vm403_vm0, %v1976_v29 }
  0x42   :  { %1900 = vmatmul.mubr.msk.bf16.gmra.mrb[24].mxu0 %vm403_vm0, %v1977_v30  ;;  %1932 = vmatmul.mubr.msk.bf16.gmra.mrb[24].mxu1 %vm403_vm0, %v1978_v31 }
  0x43   :  { %1903 = vmatprep.mubr.msk.bf16.mxu0 %vm403_vm0, %v1979_v32  ;;  %1935 = vmatprep.mubr.msk.bf16.mxu1 %vm403_vm0, %v1980_v33 }
  0x4a   :  { %1904 = vmatmul.mubr.msk.bf16.gmra.mrb[28].mxu0 %vm403_vm0, %v1981_v34  ;;  %1936 = vmatmul.mubr.msk.bf16.gmra.mrb[28].mxu1 %vm403_vm0, %v1982_v35 }
  0xe5   :  { %v1877_v37 = vpop.f32.mrb[0].mxu0  ;;  %v1909_v38 = vpop.f32.mrb[0].mxu1 }
  0xe6   :  { %v993_v39 = vadd.f32 %v1877_v37, %v2146_v36  ;;  %v1025_v40 = vadd.f32 %v1909_v38, %v2146_v36  ;;  %v534_v41 = vpop.f32.mrb[1].mxu0  ;;  %v662_v42 = vpop.f32.mrb[1].mxu1 }
  0xe7   :  { %v991_v43 = vadd.f32 %v2146_v36, %v534_v41  ;;  %v1023_v44 = vadd.f32 %v2146_v36, %v662_v42  ;;  %v1878_v45 = vpop.f32.mrb[2].mxu0  ;;  %v1910_v46 = vpop.f32.mrb[2].mxu1 }
  0xe8   :  { %v994_v47 = vadd.f32 %v1878_v45, %v2146_v36  ;;  %v1026_v48 = vadd.f32 %v1910_v46, %v2146_v36  ;;  %v537_v49 = vpop.f32.mrb[3].mxu0  ;;  %v665_v50 = vpop.f32.mrb[3].mxu1  ;;  %v1057_v53 = vmax.f32 %v993_v39, 0.0  ;;  %v1089_v54 = vmax.f32 %v1025_v40, 0.0 }
  0xe9   :  { %v992_v51 = vadd.f32 %v2146_v36, %v537_v49  ;;  %v1024_v52 = vadd.f32 %v2146_v36, %v665_v50  ;;  %v1055_v57 = vmax.f32 %v991_v43, 0.0  ;;  %v1087_v58 = vmax.f32 %v1023_v44, 0.0 }
  0xea   :  { %v1058_v55 = vmax.f32 %v994_v47, 0.0  ;;  %v1090_v56 = vmax.f32 %v1026_v48, 0.0 }
  0xeb   :  { %v1056_v59 = vmax.f32 %v992_v51, 0.0  ;;  %v1088_v60 = vmax.f32 %v1024_v52, 0.0 }
  0xec   :  { %v1648_v61 = vpack.c.bf16 %v1058_v55, %v1057_v53  ;;  %v1728_v62 = vpack.c.bf16 %v1090_v56, %v1089_v54 }
  0xed   :  { %v1643_v63 = vpack.c.bf16 %v1056_v59, %v1055_v57  ;;  %v1723_v0 = vpack.c.bf16 %v1088_v60, %v1087_v58  ;;  %v1881_v1 = vpop.f32.mrb[4].mxu0  ;;  %v1913_v2 = vpop.f32.mrb[4].mxu1 }
  0xee   :  { %1800 = vst [vmem:[%s2311_s3 + $0x8] sm:$0xff] %v1648_v61   ;;  %1816 = vst [vmem:[%s2311_s3 + $0x88] sm:$0xff] %v1728_v62   ;;  %v997_v3 = vadd.f32 %v1881_v1, %v2146_v36  ;;  %v1029_v4 = vadd.f32 %v1913_v2, %v2146_v36  ;;  %v550_v5 = vpop.f32.mrb[5].mxu0  ;;  %v678_v6 = vpop.f32.mrb[5].mxu1 }
  0xef   :  { %1644 = vst [vmem:[%s2311_s3] sm:$0xff] %v1643_v63   ;;  %1815 = vst [vmem:[%s2311_s3 + $0x80] sm:$0xff] %v1723_v0   ;;  %v995_v7 = vadd.f32 %v2146_v36, %v550_v5  ;;  %v1027_v8 = vadd.f32 %v2146_v36, %v678_v6  ;;  %v1882_v9 = vpop.f32.mrb[6].mxu0  ;;  %v1914_v10 = vpop.f32.mrb[6].mxu1 }
  0xf0   :  { %v998_v11 = vadd.f32 %v1882_v9, %v2146_v36  ;;  %v1030_v12 = vadd.f32 %v1914_v10, %v2146_v36  ;;  %v553_v13 = vpop.f32.mrb[7].mxu0  ;;  %v681_v14 = vpop.f32.mrb[7].mxu1  ;;  %v1061_v17 = vmax.f32 %v997_v3, 0.0  ;;  %v1093_v18 = vmax.f32 %v1029_v4, 0.0 }
  0xf1   :  { %v996_v15 = vadd.f32 %v2146_v36, %v553_v13  ;;  %v1028_v16 = vadd.f32 %v2146_v36, %v681_v14  ;;  %v1059_v21 = vmax.f32 %v995_v7, 0.0  ;;  %v1091_v22 = vmax.f32 %v1027_v8, 0.0 }
  0xf2   :  { %v1062_v19 = vmax.f32 %v998_v11, 0.0  ;;  %v1094_v20 = vmax.f32 %v1030_v12, 0.0 }
  0xf3   :  { %v1060_v23 = vmax.f32 %v996_v15, 0.0  ;;  %v1092_v24 = vmax.f32 %v1028_v16, 0.0 }
  0xf4   :  { %v1658_v25 = vpack.c.bf16 %v1062_v19, %v1061_v17  ;;  %v1738_v26 = vpack.c.bf16 %v1094_v20, %v1093_v18 }
  0xf5   :  { %v1653_v27 = vpack.c.bf16 %v1060_v23, %v1059_v21  ;;  %v1733_v28 = vpack.c.bf16 %v1092_v24, %v1091_v22  ;;  %v1885_v29 = vpop.f32.mrb[8].mxu0  ;;  %v1917_v30 = vpop.f32.mrb[8].mxu1 }
  0xf6   :  { %1802 = vst [vmem:[%s2311_s3 + $0x18] sm:$0xff] %v1658_v25   ;;  %1818 = vst [vmem:[%s2311_s3 + $0x98] sm:$0xff] %v1738_v26   ;;  %v1001_v31 = vadd.f32 %v1885_v29, %v2146_v36  ;;  %v1033_v32 = vadd.f32 %v1917_v30, %v2146_v36  ;;  %v566_v33 = vpop.f32.mrb[9].mxu0  ;;  %v694_v34 = vpop.f32.mrb[9].mxu1 }
  0xf7   :  { %1801 = vst [vmem:[%s2311_s3 + $0x10] sm:$0xff] %v1653_v27   ;;  %1817 = vst [vmem:[%s2311_s3 + $0x90] sm:$0xff] %v1733_v28   ;;  %v999_v35 = vadd.f32 %v2146_v36, %v566_v33  ;;  %v1031_v37 = vadd.f32 %v2146_v36, %v694_v34  ;;  %v1886_v38 = vpop.f32.mrb[10].mxu0  ;;  %v1918_v39 = vpop.f32.mrb[10].mxu1 }
  0xf8   :  { %v1002_v40 = vadd.f32 %v1886_v38, %v2146_v36  ;;  %v1034_v41 = vadd.f32 %v1918_v39, %v2146_v36  ;;  %v569_v42 = vpop.f32.mrb[11].mxu0  ;;  %v697_v43 = vpop.f32.mrb[11].mxu1  ;;  %v1065_v46 = vmax.f32 %v1001_v31, 0.0  ;;  %v1097_v47 = vmax.f32 %v1033_v32, 0.0 }
  0xf9   :  { %v1000_v44 = vadd.f32 %v2146_v36, %v569_v42  ;;  %v1032_v45 = vadd.f32 %v2146_v36, %v697_v43  ;;  %v1063_v50 = vmax.f32 %v999_v35, 0.0  ;;  %v1095_v51 = vmax.f32 %v1031_v37, 0.0 }
  0xfa   :  { %v1066_v48 = vmax.f32 %v1002_v40, 0.0  ;;  %v1098_v49 = vmax.f32 %v1034_v41, 0.0 }
  0xfb   :  { %v1064_v52 = vmax.f32 %v1000_v44, 0.0  ;;  %v1096_v53 = vmax.f32 %v1032_v45, 0.0 }
  0xfc   :  { %v1668_v54 = vpack.c.bf16 %v1066_v48, %v1065_v46  ;;  %v1748_v55 = vpack.c.bf16 %v1098_v49, %v1097_v47 }
  0xfd   :  { %v1663_v56 = vpack.c.bf16 %v1064_v52, %v1063_v50  ;;  %v1743_v57 = vpack.c.bf16 %v1096_v53, %v1095_v51  ;;  %v1889_v58 = vpop.f32.mrb[12].mxu0  ;;  %v1921_v59 = vpop.f32.mrb[12].mxu1 }
  0xfe   :  { %1804 = vst [vmem:[%s2311_s3 + $0x28] sm:$0xff] %v1668_v54   ;;  %1820 = vst [vmem:[%s2311_s3 + $0xa8] sm:$0xff] %v1748_v55   ;;  %v1005_v60 = vadd.f32 %v1889_v58, %v2146_v36  ;;  %v1037_v61 = vadd.f32 %v1921_v59, %v2146_v36  ;;  %v582_v62 = vpop.f32.mrb[13].mxu0  ;;  %v710_v63 = vpop.f32.mrb[13].mxu1 }
  0xff   :  { %1803 = vst [vmem:[%s2311_s3 + $0x20] sm:$0xff] %v1663_v56   ;;  %1819 = vst [vmem:[%s2311_s3 + $0xa0] sm:$0xff] %v1743_v57   ;;  %v1003_v0 = vadd.f32 %v2146_v36, %v582_v62  ;;  %v1035_v1 = vadd.f32 %v2146_v36, %v710_v63  ;;  %v1890_v2 = vpop.f32.mrb[14].mxu0  ;;  %v1922_v3 = vpop.f32.mrb[14].mxu1 }
 0x100   :  { %v1006_v4 = vadd.f32 %v1890_v2, %v2146_v36  ;;  %v1038_v5 = vadd.f32 %v1922_v3, %v2146_v36  ;;  %v585_v6 = vpop.f32.mrb[15].mxu0  ;;  %v713_v7 = vpop.f32.mrb[15].mxu1  ;;  %v1069_v10 = vmax.f32 %v1005_v60, 0.0  ;;  %v1101_v11 = vmax.f32 %v1037_v61, 0.0 }
 0x101   :  { %v1004_v8 = vadd.f32 %v2146_v36, %v585_v6  ;;  %v1036_v9 = vadd.f32 %v2146_v36, %v713_v7  ;;  %v1067_v14 = vmax.f32 %v1003_v0, 0.0  ;;  %v1099_v15 = vmax.f32 %v1035_v1, 0.0 }
 0x102   :  { %v1070_v12 = vmax.f32 %v1006_v4, 0.0  ;;  %v1102_v13 = vmax.f32 %v1038_v5, 0.0 }
 0x103   :  { %v1068_v16 = vmax.f32 %v1004_v8, 0.0  ;;  %v1100_v17 = vmax.f32 %v1036_v9, 0.0 }
 0x104   :  { %v1678_v18 = vpack.c.bf16 %v1070_v12, %v1069_v10  ;;  %v1758_v19 = vpack.c.bf16 %v1102_v13, %v1101_v11 }
 0x105   :  { %v1673_v20 = vpack.c.bf16 %v1068_v16, %v1067_v14  ;;  %v1753_v21 = vpack.c.bf16 %v1100_v17, %v1099_v15  ;;  %v1893_v22 = vpop.f32.mrb[16].mxu0  ;;  %v1925_v23 = vpop.f32.mrb[16].mxu1 }
 0x106   :  { %1806 = vst [vmem:[%s2311_s3 + $0x38] sm:$0xff] %v1678_v18   ;;  %1822 = vst [vmem:[%s2311_s3 + $0xb8] sm:$0xff] %v1758_v19   ;;  %v1009_v24 = vadd.f32 %v1893_v22, %v2146_v36  ;;  %v1041_v25 = vadd.f32 %v1925_v23, %v2146_v36  ;;  %v598_v26 = vpop.f32.mrb[17].mxu0  ;;  %v726_v27 = vpop.f32.mrb[17].mxu1 }
 0x107   :  { %1805 = vst [vmem:[%s2311_s3 + $0x30] sm:$0xff] %v1673_v20   ;;  %1821 = vst [vmem:[%s2311_s3 + $0xb0] sm:$0xff] %v1753_v21   ;;  %v1007_v28 = vadd.f32 %v2146_v36, %v598_v26  ;;  %v1039_v29 = vadd.f32 %v2146_v36, %v726_v27  ;;  %v1894_v30 = vpop.f32.mrb[18].mxu0  ;;  %v1926_v31 = vpop.f32.mrb[18].mxu1 }
 0x108   :  { %v1010_v32 = vadd.f32 %v1894_v30, %v2146_v36  ;;  %v1042_v33 = vadd.f32 %v1926_v31, %v2146_v36  ;;  %v601_v34 = vpop.f32.mrb[19].mxu0  ;;  %v729_v35 = vpop.f32.mrb[19].mxu1  ;;  %v1073_v39 = vmax.f32 %v1009_v24, 0.0  ;;  %v1105_v40 = vmax.f32 %v1041_v25, 0.0 }
 0x109   :  { %v1008_v37 = vadd.f32 %v2146_v36, %v601_v34  ;;  %v1040_v38 = vadd.f32 %v2146_v36, %v729_v35  ;;  %v1071_v43 = vmax.f32 %v1007_v28, 0.0  ;;  %v1103_v44 = vmax.f32 %v1039_v29, 0.0 }
 0x10a   :  { %v1074_v41 = vmax.f32 %v1010_v32, 0.0  ;;  %v1106_v42 = vmax.f32 %v1042_v33, 0.0 }
 0x10b   :  { %v1072_v45 = vmax.f32 %v1008_v37, 0.0  ;;  %v1104_v46 = vmax.f32 %v1040_v38, 0.0 }
 0x10c   :  { %v1688_v47 = vpack.c.bf16 %v1074_v41, %v1073_v39  ;;  %v1768_v48 = vpack.c.bf16 %v1106_v42, %v1105_v40 }
 0x10d   :  { %v1683_v49 = vpack.c.bf16 %v1072_v45, %v1071_v43  ;;  %v1763_v50 = vpack.c.bf16 %v1104_v46, %v1103_v44  ;;  %v1897_v51 = vpop.f32.mrb[20].mxu0  ;;  %v1929_v52 = vpop.f32.mrb[20].mxu1 }
 0x10e   :  { %1808 = vst [vmem:[%s2311_s3 + $0x48] sm:$0xff] %v1688_v47   ;;  %1824 = vst [vmem:[%s2311_s3 + $0xc8] sm:$0xff] %v1768_v48   ;;  %v1013_v53 = vadd.f32 %v1897_v51, %v2146_v36  ;;  %v1045_v54 = vadd.f32 %v1929_v52, %v2146_v36  ;;  %v614_v55 = vpop.f32.mrb[21].mxu0  ;;  %v742_v56 = vpop.f32.mrb[21].mxu1 }
 0x10f   :  { %1807 = vst [vmem:[%s2311_s3 + $0x40] sm:$0xff] %v1683_v49   ;;  %1823 = vst [vmem:[%s2311_s3 + $0xc0] sm:$0xff] %v1763_v50   ;;  %v1011_v57 = vadd.f32 %v2146_v36, %v614_v55  ;;  %v1043_v58 = vadd.f32 %v2146_v36, %v742_v56  ;;  %v1898_v59 = vpop.f32.mrb[22].mxu0  ;;  %v1930_v60 = vpop.f32.mrb[22].mxu1 }
 0x110   :  { %v1014_v61 = vadd.f32 %v1898_v59, %v2146_v36  ;;  %v1046_v62 = vadd.f32 %v1930_v60, %v2146_v36  ;;  %v617_v63 = vpop.f32.mrb[23].mxu0  ;;  %v745_v0 = vpop.f32.mrb[23].mxu1  ;;  %v1077_v3 = vmax.f32 %v1013_v53, 0.0  ;;  %v1109_v4 = vmax.f32 %v1045_v54, 0.0 }
 0x111   :  { %v1012_v1 = vadd.f32 %v2146_v36, %v617_v63  ;;  %v1044_v2 = vadd.f32 %v2146_v36, %v745_v0  ;;  %v1075_v7 = vmax.f32 %v1011_v57, 0.0  ;;  %v1107_v8 = vmax.f32 %v1043_v58, 0.0 }
 0x112   :  { %v1078_v5 = vmax.f32 %v1014_v61, 0.0  ;;  %v1110_v6 = vmax.f32 %v1046_v62, 0.0 }
 0x113   :  { %v1076_v9 = vmax.f32 %v1012_v1, 0.0  ;;  %v1108_v10 = vmax.f32 %v1044_v2, 0.0 }
 0x114   :  { %v1698_v11 = vpack.c.bf16 %v1078_v5, %v1077_v3  ;;  %v1778_v12 = vpack.c.bf16 %v1110_v6, %v1109_v4 }
 0x115   :  { %v1693_v13 = vpack.c.bf16 %v1076_v9, %v1075_v7  ;;  %v1773_v14 = vpack.c.bf16 %v1108_v10, %v1107_v8  ;;  %v1901_v15 = vpop.f32.mrb[24].mxu0  ;;  %v1933_v16 = vpop.f32.mrb[24].mxu1 }
 0x116   :  { %1810 = vst [vmem:[%s2311_s3 + $0x58] sm:$0xff] %v1698_v11   ;;  %1826 = vst [vmem:[%s2311_s3 + $0xd8] sm:$0xff] %v1778_v12   ;;  %v1017_v17 = vadd.f32 %v1901_v15, %v2146_v36  ;;  %v1049_v18 = vadd.f32 %v1933_v16, %v2146_v36  ;;  %v630_v19 = vpop.f32.mrb[25].mxu0  ;;  %v758_v20 = vpop.f32.mrb[25].mxu1 }
 0x117   :  { %1809 = vst [vmem:[%s2311_s3 + $0x50] sm:$0xff] %v1693_v13   ;;  %1825 = vst [vmem:[%s2311_s3 + $0xd0] sm:$0xff] %v1773_v14   ;;  %v1015_v21 = vadd.f32 %v2146_v36, %v630_v19  ;;  %v1047_v22 = vadd.f32 %v2146_v36, %v758_v20  ;;  %v1902_v23 = vpop.f32.mrb[26].mxu0  ;;  %v1934_v24 = vpop.f32.mrb[26].mxu1 }
 0x118   :  { %v1018_v25 = vadd.f32 %v1902_v23, %v2146_v36  ;;  %v1050_v26 = vadd.f32 %v1934_v24, %v2146_v36  ;;  %v633_v27 = vpop.f32.mrb[27].mxu0  ;;  %v761_v28 = vpop.f32.mrb[27].mxu1  ;;  %v1081_v31 = vmax.f32 %v1017_v17, 0.0  ;;  %v1113_v32 = vmax.f32 %v1049_v18, 0.0 }
 0x119   :  { %v1016_v29 = vadd.f32 %v2146_v36, %v633_v27  ;;  %v1048_v30 = vadd.f32 %v2146_v36, %v761_v28  ;;  %v1079_v35 = vmax.f32 %v1015_v21, 0.0  ;;  %v1111_v37 = vmax.f32 %v1047_v22, 0.0 }
 0x11a   :  { %v1082_v33 = vmax.f32 %v1018_v25, 0.0  ;;  %v1114_v34 = vmax.f32 %v1050_v26, 0.0 }
 0x11b   :  { %v1080_v38 = vmax.f32 %v1016_v29, 0.0  ;;  %v1112_v39 = vmax.f32 %v1048_v30, 0.0 }
 0x11c   :  { %v1708_v40 = vpack.c.bf16 %v1082_v33, %v1081_v31  ;;  %v1788_v41 = vpack.c.bf16 %v1114_v34, %v1113_v32 }
 0x11d   :  { %v1703_v42 = vpack.c.bf16 %v1080_v38, %v1079_v35  ;;  %v1783_v43 = vpack.c.bf16 %v1112_v39, %v1111_v37  ;;  %v1905_v44 = vpop.f32.mrb[28].mxu0  ;;  %v1937_v45 = vpop.f32.mrb[28].mxu1 }
 0x11e   :  { %1812 = vst [vmem:[%s2311_s3 + $0x68] sm:$0xff] %v1708_v40   ;;  %1828 = vst [vmem:[%s2311_s3 + $0xe8] sm:$0xff] %v1788_v41   ;;  %v1021_v46 = vadd.f32 %v1905_v44, %v2146_v36  ;;  %v1053_v47 = vadd.f32 %v1937_v45, %v2146_v36  ;;  %v646_v48 = vpop.f32.mrb[29].mxu0  ;;  %v774_v49 = vpop.f32.mrb[29].mxu1 }
 0x11f   :  { %1811 = vst [vmem:[%s2311_s3 + $0x60] sm:$0xff] %v1703_v42   ;;  %1827 = vst [vmem:[%s2311_s3 + $0xe0] sm:$0xff] %v1783_v43   ;;  %v1019_v50 = vadd.f32 %v2146_v36, %v646_v48  ;;  %v1051_v51 = vadd.f32 %v2146_v36, %v774_v49  ;;  %v1906_v52 = vpop.f32.mrb[30].mxu0  ;;  %v1938_v53 = vpop.f32.mrb[30].mxu1 }
 0x120   :  { %v1022_v54 = vadd.f32 %v1906_v52, %v2146_v36  ;;  %v1054_v55 = vadd.f32 %v1938_v53, %v2146_v36  ;;  %v649_v56 = vpop.f32.mrb[31].mxu0  ;;  %v777_v57 = vpop.f32.mrb[31].mxu1  ;;  %v1085_v60 = vmax.f32 %v1021_v46, 0.0  ;;  %v1117_v61 = vmax.f32 %v1053_v47, 0.0 }
 0x121   :  { %v1020_v58 = vadd.f32 %v2146_v36, %v649_v56  ;;  %v1052_v59 = vadd.f32 %v2146_v36, %v777_v57  ;;  %v1083_v0 = vmax.f32 %v1019_v50, 0.0  ;;  %v1115_v1 = vmax.f32 %v1051_v51, 0.0 }
 0x122   :  { %v1086_v62 = vmax.f32 %v1022_v54, 0.0  ;;  %v1118_v63 = vmax.f32 %v1054_v55, 0.0 }
 0x123   :  { %v1084_v2 = vmax.f32 %v1020_v58, 0.0  ;;  %v1116_v3 = vmax.f32 %v1052_v59, 0.0 }
 0x124   :  { %v1718_v4 = vpack.c.bf16 %v1086_v62, %v1085_v60  ;;  %v1798_v5 = vpack.c.bf16 %v1118_v63, %v1117_v61 }
 0x125   :  { %v1713_v6 = vpack.c.bf16 %v1084_v2, %v1083_v0  ;;  %v1793_v7 = vpack.c.bf16 %v1116_v3, %v1115_v1 }
 0x126   :  { %1814 = vst [vmem:[%s2311_s3 + $0x78] sm:$0xff] %v1718_v4   ;;  %1830 = vst [vmem:[%s2311_s3 + $0xf8] sm:$0xff] %v1798_v5  }
 0x127   :  { %1813 = vst [vmem:[%s2311_s3 + $0x70] sm:$0xff] %v1713_v6   ;;  %1829 = vst [vmem:[%s2311_s3 + $0xf0] sm:$0xff] %v1793_v7  }

// kernel: bottleneck_forward.5
= control target key start
LH: loop header
LB: loop body
LE: loop exit
PB: predicated region body
PF: predicated region fallthrough
CT: control target
= control target key end

     0   :  { %s2950_s1 = inlined_call_operand.vmem [shape: bf16[128,128], index: 1, kind: input, shape index: {}]   ;;  %s2951_s0 = inlined_call_operand.vmem [shape: bf16[512,128], index: 0, kind: input, shape index: {}]   ;;  %s2952_s3 = inlined_call_operand.vmem [shape: bf16[512,128], index: 3, kind: input, shape index: {}]   ;;  %s2953_s2 = inlined_call_operand.vmem [shape: f32[1,128], index: 2, kind: input, shape index: {}]   ;;  %s2954_s4 = inlined_call_operand.vmem [shape: bf16[512,128], index: 4, kind: output, shape index: {}]  }
   0x1   :  { %v2260_v0 = vld [vmem:[%s2950_s1] sm:$0xff]   ;;  %v2261_v1 = vld [vmem:[%s2950_s1 + $0x8] sm:$0xff]   ;;  %v2262_v2 = vld [vmem:[%s2950_s1 + $0x10] sm:$0xff]  }
   0x2   :  { %2164 = vmatprep.subr.bf16.mxu0 %v2260_v0  ;;  %2244 = vmatprep.subr.bf16.mxu1 %v2260_v0  ;;  %v2263_v3 = vld [vmem:[%s2950_s1 + $0x18] sm:$0xff]   ;;  %v2268_v4 = vld [vmem:[%s2951_s0] sm:$0xff]   ;;  %v2265_v7 = vld [vmem:[%s2950_s1 + $0x28] sm:$0xff]  }
   0x3   :  { %2165 = vmatpush3.bf16.msra.mxu0 %v2260_v0  ;;  %2252 = vmatpush3.bf16.msra.mxu1 %v2260_v0  ;;  %v2269_v5 = vld [vmem:[%s2951_s0 + $0x80] sm:$0xff]   ;;  %v2266_v8 = vld [vmem:[%s2950_s1 + $0x30] sm:$0xff]   ;;  %v2267_v9 = vld [vmem:[%s2950_s1 + $0x38] sm:$0xff]  }
   0x4   :  { %2166 = vmatprep.subr.bf16.mxu0 %v2261_v1  ;;  %2245 = vmatprep.subr.bf16.mxu1 %v2261_v1  ;;  %v2264_v6 = vld [vmem:[%s2950_s1 + $0x20] sm:$0xff]   ;;  %v2270_v10 = vld [vmem:[%s2951_s0 + $0x8] sm:$0xff]   ;;  %v2272_v12 = vld [vmem:[%s2951_s0 + $0x10] sm:$0xff]  }
   0x5   :  { %2180 = vmatprep.mubr.bf16.mxu0 %v2268_v4  ;;  %2212 = vmatprep.mubr.bf16.mxu1 %v2269_v5  ;;  %v2271_v11 = vld [vmem:[%s2951_s0 + $0x88] sm:$0xff]   ;;  %v2273_v13 = vld [vmem:[%s2951_s0 + $0x90] sm:$0xff]   ;;  %v2274_v14 = vld [vmem:[%s2951_s0 + $0x18] sm:$0xff]  }
   0x6   :  { %v2275_v15 = vld [vmem:[%s2951_s0 + $0x98] sm:$0xff]   ;;  %v2276_v16 = vld [vmem:[%s2951_s0 + $0x20] sm:$0xff]   ;;  %v2278_v18 = vld [vmem:[%s2951_s0 + $0x28] sm:$0xff]  }
   0x7   :  { %2167 = vmatpush3.bf16.msra.mxu0 %v2261_v1  ;;  %2253 = vmatpush3.bf16.msra.mxu1 %v2261_v1  ;;  %v2277_v17 = vld [vmem:[%s2951_s0 + $0xa0] sm:$0xff]   ;;  %v2279_v19 = vld [vmem:[%s2951_s0 + $0xa8] sm:$0xff]   ;;  %v2280_v20 = vld [vmem:[%s2951_s0 + $0x30] sm:$0xff]  }
   0x8   :  { %2168 = vmatprep.subr.bf16.mxu0 %v2262_v2  ;;  %2246 = vmatprep.subr.bf16.mxu1 %v2262_v2  ;;  %v2281_v21 = vld [vmem:[%s2951_s0 + $0xb0] sm:$0xff]   ;;  %v2282_v22 = vld [vmem:[%s2951_s0 + $0x38] sm:$0xff]   ;;  %v2284_v24 = vld [vmem:[%s2951_s0 + $0x40] sm:$0xff]  }
   0x9   :  { %v2283_v23 = vld [vmem:[%s2951_s0 + $0xb8] sm:$0xff]   ;;  %v2285_v25 = vld [vmem:[%s2951_s0 + $0xc0] sm:$0xff]   ;;  %v2286_v26 = vld [vmem:[%s2951_s0 + $0x48] sm:$0xff]  }
   0xa   :  { %v2287_v27 = vld [vmem:[%s2951_s0 + $0xc8] sm:$0xff]   ;;  %v2288_v28 = vld [vmem:[%s2951_s0 + $0x50] sm:$0xff]   ;;  %v2290_v30 = vld [vmem:[%s2951_s0 + $0x58] sm:$0xff]  }
   0xb   :  { %2169 = vmatpush3.bf16.msra.mxu0 %v2262_v2  ;;  %2254 = vmatpush3.bf16.msra.mxu1 %v2262_v2  ;;  %v2289_v29 = vld [vmem:[%s2951_s0 + $0xd0] sm:$0xff]   ;;  %v2291_v31 = vld [vmem:[%s2951_s0 + $0xd8] sm:$0xff]   ;;  %v2292_v32 = vld [vmem:[%s2951_s0 + $0x60] sm:$0xff]  }
   0xc   :  { %2170 = vmatprep.subr.bf16.mxu0 %v2263_v3  ;;  %2247 = vmatprep.subr.bf16.mxu1 %v2263_v3  ;;  %v2293_v33 = vld [vmem:[%s2951_s0 + $0xe0] sm:$0xff]   ;;  %v2294_v34 = vld [vmem:[%s2951_s0 + $0x68] sm:$0xff]   ;;  %v2296_v36 = vld [vmem:[%s2951_s0 + $0x70] sm:$0xff]  }
   0xd   :  { %v2295_v35 = vld [vmem:[%s2951_s0 + $0xe8] sm:$0xff]   ;;  %v2297_v37 = vld [vmem:[%s2951_s0 + $0xf0] sm:$0xff]   ;;  %v2298_v38 = vld [vmem:[%s2951_s0 + $0x78] sm:$0xff]  }
   0xe   :  { %v2299_v39 = vld [vmem:[%s2951_s0 + $0xf8] sm:$0xff]   ;;  %v2448_v40 = vld [vmem:[%s2952_s3 + $0x8] sm:$0xff]   ;;  %v2458_v42 = vld [vmem:[%s2952_s3] sm:$0xff]  }
   0xf   :  { %2171 = vmatpush3.bf16.msra.mxu0 %v2263_v3  ;;  %2255 = vmatpush3.bf16.msra.mxu1 %v2263_v3  ;;  %v2453_v41 = vld [vmem:[%s2952_s3 + $0x88] sm:$0xff]   ;;  %v2463_v43 = vld [vmem:[%s2952_s3 + $0x80] sm:$0xff]   ;;  %v2468_v44 = vld [vmem:[%s2952_s3 + $0x18] sm:$0xff]   ;;  %v1780_v48 = vunpack.c.l.bf16 %v2448_v40  ;;  %v1776_v50 = vunpack.c.l.bf16 %v2458_v42  ;;  %v1781_v53 = vunpack.c.h.bf16 %v2448_v40  ;;  %v1777_v55 = vunpack.c.h.bf16 %v2458_v42 }
  0x10   :  { %2172 = vmatprep.subr.bf16.mxu0 %v2264_v6  ;;  %2248 = vmatprep.subr.bf16.mxu1 %v2264_v6  ;;  %v2473_v45 = vld [vmem:[%s2952_s3 + $0x98] sm:$0xff]   ;;  %v2478_v46 = vld [vmem:[%s2952_s3 + $0x10] sm:$0xff]   ;;  %v1844_v49 = vunpack.c.l.bf16 %v2453_v41  ;;  %v1840_v51 = vunpack.c.l.bf16 %v2463_v43  ;;  %v2492_v52 = vld [vmem:[%s2952_s3 + $0x28] sm:$0xff]   ;;  %v1845_v54 = vunpack.c.h.bf16 %v2453_v41  ;;  %v1841_v56 = vunpack.c.h.bf16 %v2463_v43 }
  0x11   :  { %v2483_v47 = vld [vmem:[%s2952_s3 + $0x90] sm:$0xff]   ;;  %v2501_v57 = vld [vmem:[%s2952_s3 + $0xa8] sm:$0xff]   ;;  %v2506_v58 = vld [vmem:[%s2952_s3 + $0x20] sm:$0xff]   ;;  %v1788_v60 = vunpack.c.l.bf16 %v2468_v44  ;;  %v1852_v61 = vunpack.c.l.bf16 %v2473_v45  ;;  %v1784_v62 = vunpack.c.l.bf16 %v2478_v46  ;;  %v1789_v1 = vunpack.c.h.bf16 %v2468_v44 }
  0x12   :  { %v2511_v59 = vld [vmem:[%s2952_s3 + $0xa0] sm:$0xff]   ;;  %v1848_v63 = vunpack.c.l.bf16 %v2483_v47  ;;  %v2520_v0 = vld [vmem:[%s2952_s3 + $0x38] sm:$0xff]   ;;  %v1853_v2 = vunpack.c.h.bf16 %v2473_v45  ;;  %v1785_v3 = vunpack.c.h.bf16 %v2478_v46  ;;  %v1849_v4 = vunpack.c.h.bf16 %v2483_v47 }
  0x13   :  { %2173 = vmatpush3.bf16.msra.mxu0 %v2264_v6  ;;  %2256 = vmatpush3.bf16.msra.mxu1 %v2264_v6  ;;  %v2529_v5 = vld [vmem:[%s2952_s3 + $0xb8] sm:$0xff]   ;;  %v2534_v6 = vld [vmem:[%s2952_s3 + $0x30] sm:$0xff]  }
  0x14   :  { %2174 = vmatprep.subr.bf16.mxu0 %v2265_v7  ;;  %2249 = vmatprep.subr.bf16.mxu1 %v2265_v7 }
  0x17   :  { %2175 = vmatpush3.bf16.msra.mxu0 %v2265_v7  ;;  %2257 = vmatpush3.bf16.msra.mxu1 %v2265_v7  ;;  %v2539_v7 = vld [vmem:[%s2952_s3 + $0xb0] sm:$0xff]  }
  0x18   :  { %2176 = vmatprep.subr.bf16.mxu0 %v2266_v8  ;;  %2250 = vmatprep.subr.bf16.mxu1 %v2266_v8 }
  0x1b   :  { %2177 = vmatpush3.bf16.msra.mxu0 %v2266_v8  ;;  %2258 = vmatpush3.bf16.msra.mxu1 %v2266_v8  ;;  %v1796_v8 = vunpack.c.l.bf16 %v2492_v52 }
  0x1c   :  { %2178 = vmatprep.subr.bf16.mxu0 %v2267_v9  ;;  %2251 = vmatprep.subr.bf16.mxu1 %v2267_v9 }
  0x1f   :  { %2179 = vmatpush3.bf16.msra.mxu0 %v2267_v9  ;;  %2259 = vmatpush3.bf16.msra.mxu1 %v2267_v9  ;;  %v1860_v9 = vunpack.c.l.bf16 %v2501_v57 }
  0x22   :  { %2181 = vmatmul.mubr.bf16.vlgmr.msra.gmra.mrb[0].mxu0 %v2270_v10  ;;  %2213 = vmatmul.mubr.bf16.vlgmr.msra.gmra.mrb[0].mxu1 %v2271_v11  ;;  %v1792_v10 = vunpack.c.l.bf16 %v2506_v58  ;;  %v1856_v11 = vunpack.c.l.bf16 %v2511_v59 }
  0x23   :  { %2184 = vmatprep.mubr.bf16.mxu0 %v2272_v12  ;;  %2216 = vmatprep.mubr.bf16.mxu1 %v2273_v13  ;;  %v2548_v12 = vld [vmem:[%s2953_s2] ss:$0 sm:$0xff]  ;;  %v1797_v13 = vunpack.c.h.bf16 %v2492_v52 }
  0x2a   :  { %2185 = vmatmul.mubr.bf16.gmra.mrb[4].mxu0 %v2274_v14  ;;  %2217 = vmatmul.mubr.bf16.gmra.mrb[4].mxu1 %v2275_v15  ;;  %v1861_v14 = vunpack.c.h.bf16 %v2501_v57  ;;  %v1793_v15 = vunpack.c.h.bf16 %v2506_v58 }
  0x2b   :  { %2188 = vmatprep.mubr.bf16.mxu0 %v2276_v16  ;;  %2220 = vmatprep.mubr.bf16.mxu1 %v2277_v17  ;;  %v1857_v16 = vunpack.c.h.bf16 %v2511_v59  ;;  %v2557_v17 = vld [vmem:[%s2952_s3 + $0x48] sm:$0xff]  }
  0x32   :  { %2189 = vmatmul.mubr.bf16.gmra.mrb[8].mxu0 %v2278_v18  ;;  %2221 = vmatmul.mubr.bf16.gmra.mrb[8].mxu1 %v2279_v19  ;;  %v2562_v18 = vld [vmem:[%s2952_s3 + $0xc8] sm:$0xff]   ;;  %v1804_v19 = vunpack.c.l.bf16 %v2520_v0 }
  0x33   :  { %2192 = vmatprep.mubr.bf16.mxu0 %v2280_v20  ;;  %2224 = vmatprep.mubr.bf16.mxu1 %v2281_v21  ;;  %v1868_v20 = vunpack.c.l.bf16 %v2529_v5 }
  0x3a   :  { %2193 = vmatmul.mubr.bf16.gmra.mrb[12].mxu0 %v2282_v22  ;;  %2225 = vmatmul.mubr.bf16.gmra.mrb[12].mxu1 %v2283_v23  ;;  %v2571_v23 = vld [vmem:[%s2952_s3 + $0x40] sm:$0xff]  }
  0x3b   :  { %2196 = vmatprep.mubr.bf16.mxu0 %v2284_v24  ;;  %2228 = vmatprep.mubr.bf16.mxu1 %v2285_v25  ;;  %v2576_v24 = vld [vmem:[%s2952_s3 + $0xc0] sm:$0xff]  }
  0x42   :  { %2197 = vmatmul.mubr.bf16.gmra.mrb[16].mxu0 %v2286_v26  ;;  %2229 = vmatmul.mubr.bf16.gmra.mrb[16].mxu1 %v2287_v27 }
  0x43   :  { %2200 = vmatprep.mubr.bf16.mxu0 %v2288_v28  ;;  %2232 = vmatprep.mubr.bf16.mxu1 %v2289_v29 }
  0x4a   :  { %2201 = vmatmul.mubr.bf16.gmra.mrb[20].mxu0 %v2290_v30  ;;  %2233 = vmatmul.mubr.bf16.gmra.mrb[20].mxu1 %v2291_v31  ;;  %v1872_v30 = vunpack.c.l.bf16 %v2576_v24 }
  0x4b   :  { %2204 = vmatprep.mubr.bf16.mxu0 %v2292_v32  ;;  %2236 = vmatprep.mubr.bf16.mxu1 %v2293_v33 }
  0x52   :  { %2205 = vmatmul.mubr.bf16.gmra.mrb[24].mxu0 %v2294_v34  ;;  %2237 = vmatmul.mubr.bf16.gmra.mrb[24].mxu1 %v2295_v35 }
  0x53   :  { %2208 = vmatprep.mubr.bf16.mxu0 %v2296_v36  ;;  %2240 = vmatprep.mubr.bf16.mxu1 %v2297_v37 }
  0x5a   :  { %2209 = vmatmul.mubr.bf16.gmra.mrb[28].mxu0 %v2298_v38  ;;  %2241 = vmatmul.mubr.bf16.gmra.mrb[28].mxu1 %v2299_v39 }
  0xf5   :  { %v2182_v25 = vpop.f32.mrb[0].mxu0  ;;  %v2214_v26 = vpop.f32.mrb[0].mxu1 }
  0xf6   :  { %v963_v31 = vadd.f32 %v2182_v25, %v2548_v12  ;;  %v995_v32 = vadd.f32 %v2214_v26, %v2548_v12  ;;  %v504_v33 = vpop.f32.mrb[1].mxu0  ;;  %v632_v34 = vpop.f32.mrb[1].mxu1 }
  0xf7   :  { %v961_v37 = vadd.f32 %v2548_v12, %v504_v33  ;;  %v993_v38 = vadd.f32 %v2548_v12, %v632_v34  ;;  %v2183_v39 = vpop.f32.mrb[2].mxu0  ;;  %v2215_v28 = vpop.f32.mrb[2].mxu1 }
  0xf8   :  { %v1155_v27 = vadd.f32 %v1780_v48, %v963_v31  ;;  %v1187_v25 = vadd.f32 %v1844_v49, %v995_v32  ;;  %v964_v26 = vadd.f32 %v2183_v39, %v2548_v12  ;;  %v996_v22 = vadd.f32 %v2215_v28, %v2548_v12  ;;  %v507_v21 = vpop.f32.mrb[3].mxu0  ;;  %v635_v35 = vpop.f32.mrb[3].mxu1 }
  0xf9   :  { %v1153_v36 = vadd.f32 %v1776_v50, %v961_v37  ;;  %v1185_v33 = vadd.f32 %v1840_v51, %v993_v38  ;;  %v962_v34 = vadd.f32 %v2548_v12, %v507_v21  ;;  %v994_v29 = vadd.f32 %v2548_v12, %v635_v35 }
  0xfa   :  { %v1156_v48 = vadd.f32 %v1781_v53, %v964_v26  ;;  %v1188_v49 = vadd.f32 %v1845_v54, %v996_v22  ;;  %v1813_v28 = vunpack.c.h.bf16 %v2557_v17  ;;  %v1809_v21 = vunpack.c.h.bf16 %v2571_v23 }
  0xfb   :  { %v1154_v50 = vadd.f32 %v1777_v55, %v962_v34  ;;  %v1186_v51 = vadd.f32 %v1841_v56, %v994_v29  ;;  %v1219_v35 = vmax.f32 %v1155_v27, 0.0  ;;  %v1251_v40 = vmax.f32 %v1187_v25, 0.0 }
  0xfc   :  { %v1220_v53 = vmax.f32 %v1156_v48, 0.0  ;;  %v1252_v37 = vmax.f32 %v1188_v49, 0.0  ;;  %v1217_v41 = vmax.f32 %v1153_v36, 0.0  ;;  %v1249_v54 = vmax.f32 %v1185_v33, 0.0  ;;  %v2617_v48 = vld [vmem:[%s2952_s3 + $0x58] sm:$0xff]  }
  0xfd   :  { %v1218_v22 = vmax.f32 %v1154_v50, 0.0  ;;  %v1250_v38 = vmax.f32 %v1186_v51, 0.0  ;;  %v2186_v39 = vpop.f32.mrb[4].mxu0  ;;  %v2218_v26 = vpop.f32.mrb[4].mxu1  ;;  %v2622_v49 = vld [vmem:[%s2952_s3 + $0xd8] sm:$0xff]  }
  0xfe   :  { %v1910_v31 = vpack.c.bf16 %v1220_v53, %v1219_v35  ;;  %v1990_v42 = vpack.c.bf16 %v1252_v37, %v1251_v40  ;;  %v967_v55 = vadd.f32 %v2186_v39, %v2548_v12  ;;  %v999_v43 = vadd.f32 %v2218_v26, %v2548_v12  ;;  %v520_v56 = vpop.f32.mrb[5].mxu0  ;;  %v648_v29 = vpop.f32.mrb[5].mxu1 }
  0xff   :  { %v1905_v34 = vpack.c.bf16 %v1218_v22, %v1217_v41  ;;  %v1985_v32 = vpack.c.bf16 %v1250_v38, %v1249_v54  ;;  %v965_v27 = vadd.f32 %v2548_v12, %v520_v56  ;;  %v997_v25 = vadd.f32 %v2548_v12, %v648_v29  ;;  %v2187_v36 = vpop.f32.mrb[6].mxu0  ;;  %v2219_v33 = vpop.f32.mrb[6].mxu1  ;;  %v2644_v41 = vld [vmem:[%s2952_s3 + $0xd0] sm:$0xff]  }
 0x100   :  { %2093 = vst [vmem:[%s2954_s4 + $0x8] sm:$0xff] %v1910_v31   ;;  %2109 = vst [vmem:[%s2954_s4 + $0x88] sm:$0xff] %v1990_v42   ;;  %v1159_v50 = vadd.f32 %v1788_v60, %v967_v55  ;;  %v1191_v51 = vadd.f32 %v1852_v61, %v999_v43  ;;  %v968_v35 = vadd.f32 %v2187_v36, %v2548_v12  ;;  %v523_v53 = vpop.f32.mrb[7].mxu0  ;;  %v651_v37 = vpop.f32.mrb[7].mxu1  ;;  %v2639_v31 = vld [vmem:[%s2952_s3 + $0x50] sm:$0xff]   ;;  %v1820_v26 = vunpack.c.l.bf16 %v2617_v48 }
 0x101   :  { %v1000_v40 = vadd.f32 %v2219_v33, %v2548_v12  ;;  %1906 = vst [vmem:[%s2954_s4] sm:$0xff] %v1905_v34   ;;  %2108 = vst [vmem:[%s2954_s4 + $0x80] sm:$0xff] %v1985_v32   ;;  %v1157_v60 = vadd.f32 %v1784_v62, %v965_v27  ;;  %v1189_v61 = vadd.f32 %v1848_v63, %v997_v25  ;;  %v1884_v32 = vunpack.c.l.bf16 %v2622_v49 }
 0x102   :  { %v966_v54 = vadd.f32 %v2548_v12, %v523_v53  ;;  %v998_v22 = vadd.f32 %v2548_v12, %v651_v37  ;;  %v1160_v38 = vadd.f32 %v1789_v1, %v968_v35  ;;  %v1816_v42 = vunpack.c.l.bf16 %v2639_v31 }
 0x103   :  { %v1192_v39 = vadd.f32 %v1853_v2, %v1000_v40  ;;  %v1880_v55 = vunpack.c.l.bf16 %v2644_v41  ;;  %v1223_v43 = vmax.f32 %v1159_v50, 0.0  ;;  %v1255_v44 = vmax.f32 %v1191_v51, 0.0 }
 0x104   :  { %v1158_v62 = vadd.f32 %v1785_v3, %v966_v54  ;;  %v1190_v63 = vadd.f32 %v1849_v4, %v998_v22  ;;  %v1224_v1 = vmax.f32 %v1160_v38, 0.0  ;;  %v1221_v45 = vmax.f32 %v1157_v60, 0.0 }
 0x105   :  { %v1256_v56 = vmax.f32 %v1192_v39, 0.0  ;;  %v1253_v2 = vmax.f32 %v1189_v61, 0.0  ;;  %v2190_v27 = vpop.f32.mrb[8].mxu0  ;;  %v2222_v25 = vpop.f32.mrb[8].mxu1 }
 0x106   :  { %v1222_v29 = vmax.f32 %v1158_v62, 0.0  ;;  %v1254_v34 = vmax.f32 %v1190_v63, 0.0  ;;  %v1920_v36 = vpack.c.bf16 %v1224_v1, %v1223_v43  ;;  %v971_v3 = vadd.f32 %v2190_v27, %v2548_v12  ;;  %v536_v4 = vpop.f32.mrb[9].mxu0  ;;  %v664_v33 = vpop.f32.mrb[9].mxu1 }
 0x107   :  { %v2000_v46 = vpack.c.bf16 %v1256_v56, %v1255_v44  ;;  %v1003_v47 = vadd.f32 %v2222_v25, %v2548_v12  ;;  %v969_v50 = vadd.f32 %v2548_v12, %v536_v4  ;;  %v1001_v51 = vadd.f32 %v2548_v12, %v664_v33  ;;  %v2191_v53 = vpop.f32.mrb[10].mxu0  ;;  %v2223_v37 = vpop.f32.mrb[10].mxu1 }
 0x108   :  { %v1915_v35 = vpack.c.bf16 %v1222_v29, %v1221_v45  ;;  %v1995_v40 = vpack.c.bf16 %v1254_v34, %v1253_v2  ;;  %2095 = vst [vmem:[%s2954_s4 + $0x18] sm:$0xff] %v1920_v36   ;;  %v1163_v60 = vadd.f32 %v1796_v8, %v971_v3  ;;  %v972_v54 = vadd.f32 %v2191_v53, %v2548_v12  ;;  %v539_v38 = vpop.f32.mrb[11].mxu0  ;;  %v667_v39 = vpop.f32.mrb[11].mxu1  ;;  %v2717_v53 = vld [vmem:[%s2952_s3 + $0x68] sm:$0xff]  }
 0x109   :  { %2111 = vst [vmem:[%s2954_s4 + $0x98] sm:$0xff] %v2000_v46   ;;  %v1195_v61 = vadd.f32 %v1860_v9, %v1003_v47  ;;  %v1004_v22 = vadd.f32 %v2223_v37, %v2548_v12  ;;  %v1161_v8 = vadd.f32 %v1792_v10, %v969_v50  ;;  %v1193_v9 = vadd.f32 %v1856_v11, %v1001_v51  ;;  %v2722_v37 = vld [vmem:[%s2952_s3 + $0xe8] sm:$0xff]  }
 0x10a   :  { %2094 = vst [vmem:[%s2954_s4 + $0x10] sm:$0xff] %v1915_v35   ;;  %2110 = vst [vmem:[%s2954_s4 + $0x90] sm:$0xff] %v1995_v40   ;;  %v970_v62 = vadd.f32 %v2548_v12, %v539_v38  ;;  %v1002_v63 = vadd.f32 %v2548_v12, %v667_v39  ;;  %v1164_v43 = vadd.f32 %v1797_v13, %v972_v54  ;;  %v1821_v1 = vunpack.c.h.bf16 %v2617_v48 }
 0x10b   :  { %v1196_v44 = vadd.f32 %v1861_v14, %v1004_v22  ;;  %v1885_v56 = vunpack.c.h.bf16 %v2622_v49  ;;  %v1817_v45 = vunpack.c.h.bf16 %v2639_v31  ;;  %v1881_v2 = vunpack.c.h.bf16 %v2644_v41 }
 0x10c   :  { %v1162_v10 = vadd.f32 %v1793_v15, %v970_v62  ;;  %v1194_v11 = vadd.f32 %v1857_v16, %v1002_v63  ;;  %v1227_v29 = vmax.f32 %v1163_v60, 0.0  ;;  %v1259_v52 = vmax.f32 %v1195_v61, 0.0 }
 0x10d   :  { %v1228_v13 = vmax.f32 %v1164_v43, 0.0  ;;  %v1260_v34 = vmax.f32 %v1196_v44, 0.0  ;;  %v1225_v57 = vmax.f32 %v1161_v8, 0.0  ;;  %v1257_v14 = vmax.f32 %v1193_v9, 0.0  ;;  %v2194_v36 = vpop.f32.mrb[12].mxu0  ;;  %v2226_v46 = vpop.f32.mrb[12].mxu1 }
 0x10e   :  { %v1226_v27 = vmax.f32 %v1162_v10, 0.0  ;;  %v1258_v25 = vmax.f32 %v1194_v11, 0.0  ;;  %v975_v15 = vadd.f32 %v2194_v36, %v2548_v12  ;;  %v1007_v59 = vadd.f32 %v2226_v46, %v2548_v12  ;;  %v552_v16 = vpop.f32.mrb[13].mxu0  ;;  %v680_v47 = vpop.f32.mrb[13].mxu1  ;;  %v2739_v8 = vld [vmem:[%s2952_s3 + $0x60] sm:$0xff]  }
 0x10f   :  { %v1930_v3 = vpack.c.bf16 %v1228_v13, %v1227_v29  ;;  %v2010_v58 = vpack.c.bf16 %v1260_v34, %v1259_v52  ;;  %v973_v35 = vadd.f32 %v2548_v12, %v552_v16  ;;  %v1005_v40 = vadd.f32 %v2548_v12, %v680_v47  ;;  %v2195_v50 = vpop.f32.mrb[14].mxu0  ;;  %v2227_v51 = vpop.f32.mrb[14].mxu1  ;;  %v2744_v9 = vld [vmem:[%s2952_s3 + $0xe0] sm:$0xff]  }
 0x110   :  { %v1925_v4 = vpack.c.bf16 %v1226_v27, %v1225_v57  ;;  %v2005_v33 = vpack.c.bf16 %v1258_v25, %v1257_v14  ;;  %v1167_v60 = vadd.f32 %v1804_v19, %v975_v15  ;;  %v1199_v61 = vadd.f32 %v1868_v20, %v1007_v59  ;;  %v555_v38 = vpop.f32.mrb[15].mxu0  ;;  %v683_v39 = vpop.f32.mrb[15].mxu1 }
 0x111   :  { %2097 = vst [vmem:[%s2954_s4 + $0x28] sm:$0xff] %v1930_v3   ;;  %2113 = vst [vmem:[%s2954_s4 + $0xa8] sm:$0xff] %v2010_v58   ;;  %v976_v54 = vadd.f32 %v2195_v50, %v2548_v12  ;;  %v1008_v22 = vadd.f32 %v2227_v51, %v2548_v12  ;;  %v2955_v19 = vunpack.c.l.bf16 %v2534_v6  ;;  %v2956_v62 = vunpack.c.l.bf16 %v2539_v7 }
 0x112   :  { %2096 = vst [vmem:[%s2954_s4 + $0x20] sm:$0xff] %v1925_v4   ;;  %2112 = vst [vmem:[%s2954_s4 + $0xa0] sm:$0xff] %v2005_v33   ;;  %v974_v43 = vadd.f32 %v2548_v12, %v555_v38  ;;  %v1006_v44 = vadd.f32 %v2548_v12, %v683_v39  ;;  %v2957_v10 = vunpack.c.h.bf16 %v2520_v0  ;;  %v2958_v29 = vunpack.c.h.bf16 %v2529_v5 }
 0x113   :  { %v1165_v20 = vadd.f32 %v2955_v19, %v973_v35  ;;  %v1197_v63 = vadd.f32 %v2956_v62, %v1005_v40  ;;  %v1828_v13 = vunpack.c.l.bf16 %v2717_v53  ;;  %v1892_v34 = vunpack.c.l.bf16 %v2722_v37 }
 0x114   :  { %v1168_v11 = vadd.f32 %v2957_v10, %v976_v54  ;;  %v1200_v52 = vadd.f32 %v2958_v29, %v1008_v22  ;;  %v2959_v57 = vunpack.c.h.bf16 %v2534_v6  ;;  %v2960_v27 = vunpack.c.h.bf16 %v2539_v7 }
 0x115   :  { %v1824_v36 = vunpack.c.l.bf16 %v2739_v8  ;;  %v1888_v46 = vunpack.c.l.bf16 %v2744_v9  ;;  %v1231_v3 = vmax.f32 %v1167_v60, 0.0  ;;  %v1263_v0 = vmax.f32 %v1199_v61, 0.0  ;;  %v2198_v4 = vpop.f32.mrb[16].mxu0  ;;  %v2230_v33 = vpop.f32.mrb[16].mxu1 }
 0x116   :  { %v1166_v14 = vadd.f32 %v2959_v57, %v974_v43  ;;  %v1198_v25 = vadd.f32 %v2960_v27, %v1006_v44  ;;  %v1232_v58 = vmax.f32 %v1168_v11, 0.0  ;;  %v1264_v15 = vmax.f32 %v1200_v52, 0.0  ;;  %v568_v50 = vpop.f32.mrb[17].mxu0  ;;  %v696_v51 = vpop.f32.mrb[17].mxu1 }
 0x117   :  { %v1229_v5 = vmax.f32 %v1165_v20, 0.0  ;;  %v1261_v59 = vmax.f32 %v1197_v63, 0.0  ;;  %v979_v40 = vadd.f32 %v2198_v4, %v2548_v12  ;;  %v1011_v7 = vadd.f32 %v2230_v33, %v2548_v12  ;;  %v2199_v38 = vpop.f32.mrb[18].mxu0  ;;  %v2231_v39 = vpop.f32.mrb[18].mxu1 }
 0x118   :  { %v1230_v16 = vmax.f32 %v1166_v14, 0.0  ;;  %v1262_v47 = vmax.f32 %v1198_v25, 0.0  ;;  %v1940_v35 = vpack.c.bf16 %v1232_v58, %v1231_v3  ;;  %v2020_v6 = vpack.c.bf16 %v1264_v15, %v1263_v0  ;;  %v571_v10 = vpop.f32.mrb[19].mxu0  ;;  %v699_v11 = vpop.f32.mrb[19].mxu1 }
 0x119   :  { %v977_v60 = vadd.f32 %v2548_v12, %v568_v50  ;;  %v1009_v61 = vadd.f32 %v2548_v12, %v696_v51  ;;  %v2961_v19 = vunpack.c.l.bf16 %v2557_v17  ;;  %v2962_v62 = vunpack.c.l.bf16 %v2562_v18 }
 0x11a   :  { %v1935_v54 = vpack.c.bf16 %v1230_v16, %v1229_v5  ;;  %v2015_v22 = vpack.c.bf16 %v1262_v47, %v1261_v59  ;;  %2099 = vst [vmem:[%s2954_s4 + $0x38] sm:$0xff] %v1940_v35   ;;  %2115 = vst [vmem:[%s2954_s4 + $0xb8] sm:$0xff] %v2020_v6   ;;  %v980_v43 = vadd.f32 %v2199_v38, %v2548_v12  ;;  %v2963_v29 = vunpack.c.l.bf16 %v2571_v23 }
 0x11b   :  { %v1171_v20 = vadd.f32 %v2961_v19, %v979_v40  ;;  %v1203_v63 = vadd.f32 %v2962_v62, %v1011_v7  ;;  %v1012_v44 = vadd.f32 %v2231_v39, %v2548_v12  ;;  %v1201_v57 = vadd.f32 %v1872_v30, %v1009_v61  ;;  %v2817_v62 = vld [vmem:[%s2952_s3 + $0x78] sm:$0xff]  }
 0x11c   :  { %2098 = vst [vmem:[%s2954_s4 + $0x30] sm:$0xff] %v1935_v54   ;;  %2114 = vst [vmem:[%s2954_s4 + $0xb0] sm:$0xff] %v2015_v22   ;;  %v1169_v52 = vadd.f32 %v2963_v29, %v977_v60  ;;  %v978_v14 = vadd.f32 %v2548_v12, %v571_v10  ;;  %v1010_v27 = vadd.f32 %v2548_v12, %v699_v11  ;;  %v2964_v3 = vunpack.c.h.bf16 %v2562_v18 }
 0x11d   :  { %v1172_v25 = vadd.f32 %v1813_v28, %v980_v43  ;;  %v1829_v58 = vunpack.c.h.bf16 %v2717_v53  ;;  %v1893_v15 = vunpack.c.h.bf16 %v2722_v37  ;;  %v2965_v59 = vunpack.c.h.bf16 %v2576_v24  ;;  %v2202_v7 = vpop.f32.mrb[20].mxu0  ;;  %v2234_v50 = vpop.f32.mrb[20].mxu1 }
 0x11e   :  { %v1204_v0 = vadd.f32 %v2964_v3, %v1012_v44  ;;  %v1170_v5 = vadd.f32 %v1809_v21, %v978_v14  ;;  %v1825_v16 = vunpack.c.h.bf16 %v2739_v8  ;;  %v1889_v47 = vunpack.c.h.bf16 %v2744_v9  ;;  %v584_v54 = vpop.f32.mrb[21].mxu0  ;;  %v712_v22 = vpop.f32.mrb[21].mxu1  ;;  %v2844_v14 = vld [vmem:[%s2952_s3 + $0xf0] sm:$0xff]  }
 0x11f   :  { %v1202_v30 = vadd.f32 %v2965_v59, %v1010_v27  ;;  %v1235_v4 = vmax.f32 %v1171_v20, 0.0  ;;  %v1267_v17 = vmax.f32 %v1203_v63, 0.0  ;;  %v1236_v28 = vmax.f32 %v1172_v25, 0.0  ;;  %v2203_v19 = vpop.f32.mrb[22].mxu0  ;;  %v2235_v20 = vpop.f32.mrb[22].mxu1  ;;  %v2822_v63 = vld [vmem:[%s2952_s3 + $0xf8] sm:$0xff]  }
 0x120   :  { %v1268_v33 = vmax.f32 %v1204_v0, 0.0  ;;  %v1233_v18 = vmax.f32 %v1169_v52, 0.0  ;;  %v1265_v35 = vmax.f32 %v1201_v57, 0.0  ;;  %v1234_v6 = vmax.f32 %v1170_v5, 0.0  ;;  %v587_v29 = vpop.f32.mrb[23].mxu0  ;;  %v715_v52 = vpop.f32.mrb[23].mxu1 }
 0x121   :  { %v1266_v40 = vmax.f32 %v1202_v30, 0.0  ;;  %v1950_v51 = vpack.c.bf16 %v1236_v28, %v1235_v4  ;;  %v983_v21 = vadd.f32 %v2202_v7, %v2548_v12  ;;  %v1015_v24 = vadd.f32 %v2234_v50, %v2548_v12  ;;  %v2839_v57 = vld [vmem:[%s2952_s3 + $0x70] sm:$0xff]  }
 0x122   :  { %v2030_v23 = vpack.c.bf16 %v1268_v33, %v1267_v17  ;;  %v1945_v60 = vpack.c.bf16 %v1234_v6, %v1233_v18  ;;  %v981_v38 = vadd.f32 %v2548_v12, %v584_v54  ;;  %v1013_v39 = vadd.f32 %v2548_v12, %v712_v22 }
 0x123   :  { %v2025_v61 = vpack.c.bf16 %v1266_v40, %v1265_v35  ;;  %2101 = vst [vmem:[%s2954_s4 + $0x48] sm:$0xff] %v1950_v51   ;;  %v1175_v43 = vadd.f32 %v1820_v26, %v983_v21  ;;  %v1207_v44 = vadd.f32 %v1884_v32, %v1015_v24  ;;  %v984_v10 = vadd.f32 %v2203_v19, %v2548_v12 }
 0x124   :  { %2117 = vst [vmem:[%s2954_s4 + $0xc8] sm:$0xff] %v2030_v23   ;;  %v1016_v11 = vadd.f32 %v2235_v20, %v2548_v12  ;;  %2100 = vst [vmem:[%s2954_s4 + $0x40] sm:$0xff] %v1945_v60   ;;  %v1173_v26 = vadd.f32 %v1816_v42, %v981_v38  ;;  %v1205_v32 = vadd.f32 %v1880_v55, %v1013_v39  ;;  %v1836_v5 = vunpack.c.l.bf16 %v2817_v62 }
 0x125   :  { %2116 = vst [vmem:[%s2954_s4 + $0xc0] sm:$0xff] %v2025_v61   ;;  %v982_v27 = vadd.f32 %v2548_v12, %v587_v29  ;;  %v1014_v25 = vadd.f32 %v2548_v12, %v715_v52  ;;  %v1176_v3 = vadd.f32 %v1821_v1, %v984_v10  ;;  %v1900_v59 = vunpack.c.l.bf16 %v2822_v63  ;;  %v2206_v35 = vpop.f32.mrb[24].mxu0  ;;  %v2238_v6 = vpop.f32.mrb[24].mxu1 }
 0x126   :  { %v1208_v0 = vadd.f32 %v1885_v56, %v1016_v11  ;;  %v1832_v30 = vunpack.c.l.bf16 %v2839_v57  ;;  %v1896_v4 = vunpack.c.l.bf16 %v2844_v14  ;;  %v1239_v17 = vmax.f32 %v1175_v43, 0.0  ;;  %v728_v7 = vpop.f32.mrb[25].mxu1 }
 0x127   :  { %v1174_v42 = vadd.f32 %v1817_v45, %v982_v27  ;;  %v1206_v55 = vadd.f32 %v1881_v2, %v1014_v25  ;;  %v1271_v48 = vmax.f32 %v1207_v44, 0.0  ;;  %v1240_v1 = vmax.f32 %v1176_v3, 0.0  ;;  %v600_v2 = vpop.f32.mrb[25].mxu0  ;;  %v2239_v54 = vpop.f32.mrb[26].mxu1 }
 0x128   :  { %v1272_v28 = vmax.f32 %v1208_v0, 0.0  ;;  %v1237_v49 = vmax.f32 %v1173_v26, 0.0  ;;  %v1269_v56 = vmax.f32 %v1205_v32, 0.0  ;;  %v987_v45 = vadd.f32 %v2206_v35, %v2548_v12  ;;  %v2207_v24 = vpop.f32.mrb[26].mxu0  ;;  %v731_v19 = vpop.f32.mrb[27].mxu1 }
 0x129   :  { %v1238_v33 = vmax.f32 %v1174_v42, 0.0  ;;  %v1270_v18 = vmax.f32 %v1206_v55, 0.0  ;;  %v1960_v40 = vpack.c.bf16 %v1240_v1, %v1239_v17  ;;  %v1019_v41 = vadd.f32 %v2238_v6, %v2548_v12  ;;  %v603_v39 = vpop.f32.mrb[27].mxu0 }
 0x12a   :  { %v2040_v31 = vpack.c.bf16 %v1272_v28, %v1271_v48  ;;  %v985_v23 = vadd.f32 %v2548_v12, %v600_v2  ;;  %v1017_v21 = vadd.f32 %v2548_v12, %v728_v7  ;;  %v1179_v22 = vadd.f32 %v1828_v13, %v987_v45 }
 0x12b   :  { %v1955_v50 = vpack.c.bf16 %v1238_v33, %v1237_v49  ;;  %v2035_v51 = vpack.c.bf16 %v1270_v18, %v1269_v56  ;;  %2103 = vst [vmem:[%s2954_s4 + $0x58] sm:$0xff] %v1960_v40   ;;  %v1211_v60 = vadd.f32 %v1892_v34, %v1019_v41  ;;  %v988_v61 = vadd.f32 %v2207_v24, %v2548_v12 }
 0x12c   :  { %2119 = vst [vmem:[%s2954_s4 + $0xd8] sm:$0xff] %v2040_v31   ;;  %v1020_v38 = vadd.f32 %v2239_v54, %v2548_v12  ;;  %v1177_v13 = vadd.f32 %v1824_v36, %v985_v23  ;;  %v1209_v34 = vadd.f32 %v1888_v46, %v1017_v21  ;;  %v986_v20 = vadd.f32 %v2548_v12, %v603_v39 }
 0x12d   :  { %2102 = vst [vmem:[%s2954_s4 + $0x50] sm:$0xff] %v1955_v50   ;;  %2118 = vst [vmem:[%s2954_s4 + $0xd0] sm:$0xff] %v2035_v51   ;;  %v1018_v43 = vadd.f32 %v2548_v12, %v731_v19  ;;  %v1180_v44 = vadd.f32 %v1829_v58, %v988_v61  ;;  %v1837_v11 = vunpack.c.h.bf16 %v2817_v62  ;;  %v1901_v29 = vunpack.c.h.bf16 %v2822_v63  ;;  %v2210_v0 = vpop.f32.mrb[28].mxu0  ;;  %v2242_v42 = vpop.f32.mrb[28].mxu1 }
 0x12e   :  { %v1212_v10 = vadd.f32 %v1893_v15, %v1020_v38  ;;  %v1178_v36 = vadd.f32 %v1825_v16, %v986_v20  ;;  %v1833_v52 = vunpack.c.h.bf16 %v2839_v57  ;;  %v1897_v26 = vunpack.c.h.bf16 %v2844_v14  ;;  %v744_v17 = vpop.f32.mrb[29].mxu1 }
 0x12f   :  { %v1210_v46 = vadd.f32 %v1889_v47, %v1018_v43  ;;  %v1243_v32 = vmax.f32 %v1179_v22, 0.0  ;;  %v1275_v53 = vmax.f32 %v1211_v60, 0.0  ;;  %v1244_v58 = vmax.f32 %v1180_v44, 0.0  ;;  %v616_v47 = vpop.f32.mrb[29].mxu0  ;;  %v2243_v33 = vpop.f32.mrb[30].mxu1 }
 0x130   :  { %v1276_v27 = vmax.f32 %v1212_v10, 0.0  ;;  %v1241_v37 = vmax.f32 %v1177_v13, 0.0  ;;  %v1273_v15 = vmax.f32 %v1209_v34, 0.0  ;;  %v1242_v25 = vmax.f32 %v1178_v36, 0.0  ;;  %v2211_v56 = vpop.f32.mrb[30].mxu0  ;;  %v747_v45 = vpop.f32.mrb[31].mxu1 }
 0x131   :  { %v1274_v3 = vmax.f32 %v1210_v46, 0.0  ;;  %v1970_v55 = vpack.c.bf16 %v1244_v58, %v1243_v32  ;;  %v991_v16 = vadd.f32 %v2210_v0, %v2548_v12  ;;  %v1023_v9 = vadd.f32 %v2242_v42, %v2548_v12  ;;  %v619_v31 = vpop.f32.mrb[31].mxu0 }
 0x132   :  { %v2050_v8 = vpack.c.bf16 %v1276_v27, %v1275_v53  ;;  %v1965_v48 = vpack.c.bf16 %v1242_v25, %v1241_v37  ;;  %v989_v28 = vadd.f32 %v2548_v12, %v616_v47  ;;  %v1021_v49 = vadd.f32 %v2548_v12, %v744_v17 }
 0x133   :  { %v2045_v1 = vpack.c.bf16 %v1274_v3, %v1273_v15  ;;  %2105 = vst [vmem:[%s2954_s4 + $0x68] sm:$0xff] %v1970_v55   ;;  %v1183_v18 = vadd.f32 %v1836_v5, %v991_v16  ;;  %v1215_v35 = vadd.f32 %v1900_v59, %v1023_v9  ;;  %v992_v6 = vadd.f32 %v2211_v56, %v2548_v12 }
 0x134   :  { %2121 = vst [vmem:[%s2954_s4 + $0xe8] sm:$0xff] %v2050_v8   ;;  %v1024_v40 = vadd.f32 %v2243_v33, %v2548_v12  ;;  %2104 = vst [vmem:[%s2954_s4 + $0x60] sm:$0xff] %v1965_v48   ;;  %v1181_v62 = vadd.f32 %v1832_v30, %v989_v28  ;;  %v1213_v63 = vadd.f32 %v1896_v4, %v1021_v49 }
 0x135   :  { %2120 = vst [vmem:[%s2954_s4 + $0xe0] sm:$0xff] %v2045_v1   ;;  %v990_v5 = vadd.f32 %v2548_v12, %v619_v31  ;;  %v1022_v59 = vadd.f32 %v2548_v12, %v747_v45  ;;  %v1184_v41 = vadd.f32 %v1837_v11, %v992_v6  ;;  %v1247_v51 = vmax.f32 %v1183_v18, 0.0 }
 0x136   :  { %v1216_v2 = vadd.f32 %v1901_v29, %v1024_v40  ;;  %v1279_v23 = vmax.f32 %v1215_v35, 0.0  ;;  %v1245_v54 = vmax.f32 %v1181_v62, 0.0  ;;  %v1277_v22 = vmax.f32 %v1213_v63, 0.0 }
 0x137   :  { %v1182_v7 = vadd.f32 %v1833_v52, %v990_v5  ;;  %v1214_v50 = vadd.f32 %v1897_v26, %v1022_v59  ;;  %v1248_v21 = vmax.f32 %v1184_v41, 0.0 }
 0x138   :  { %v1280_v24 = vmax.f32 %v1216_v2, 0.0 }
 0x139   :  { %v1246_v60 = vmax.f32 %v1182_v7, 0.0  ;;  %v1278_v57 = vmax.f32 %v1214_v50, 0.0  ;;  %v1980_v30 = vpack.c.bf16 %v1248_v21, %v1247_v51 }
 0x13a   :  { %v2060_v61 = vpack.c.bf16 %v1280_v24, %v1279_v23 }
 0x13b   :  { %v1975_v14 = vpack.c.bf16 %v1246_v60, %v1245_v54  ;;  %v2055_v4 = vpack.c.bf16 %v1278_v57, %v1277_v22  ;;  %2107 = vst [vmem:[%s2954_s4 + $0x78] sm:$0xff] %v1980_v30  }
 0x13c   :  { %2123 = vst [vmem:[%s2954_s4 + $0xf8] sm:$0xff] %v2060_v61  }
 0x13d   :  { %2106 = vst [vmem:[%s2954_s4 + $0x70] sm:$0xff] %v1975_v14   ;;  %2122 = vst [vmem:[%s2954_s4 + $0xf0] sm:$0xff] %v2055_v4  }

// kernel: bottleneck_forward.4
= control target key start
LH: loop header
LB: loop body
LE: loop exit
PB: predicated region body
PF: predicated region fallthrough
CT: control target
= control target key end

     0   :  { %s4737_s12 = smov 0   ;;  %s4739_s13 = smov 0   ;;  %s5610_s0 = inlined_call_operand.vmem [shape: bf16[2,288,384], index: 0, kind: input, shape index: {}]   ;;  %s5611_s1 = inlined_call_operand.vmem [shape: bf16[3,384,128], index: 1, kind: input, shape index: {}]   ;;  %s5612_s2 = inlined_call_operand.vmem [shape: f32[1,128], index: 2, kind: input, shape index: {}]   ;;  %s5613_s3 = inlined_call_operand.vmem [shape: bf16[2,256,128], index: 3, kind: output, shape index: {}]  }
   0x1   :  { %s4741_s14 = smov 0  }
   0x2 LB: > { %s32_s15 = sadd.s32 1, %s4711_s13  ;;  %p3159_p0 = scmp.ge.s32.totalorder %s4715_s14, 1  ;;  %s4715_s14 = sphi %s4741_s14, %s13_s14   ;;  %s4711_s13 = sphi %s4739_s13, %s5619_s13   ;;  %s4707_s12 = sphi %s4737_s12, %s5618_s12  }
   0x3   : > { %p34_p1 = scmp.ge.s32.totalorder %s32_s15, 2  ;;  %p177_p2 = scmp.lt.s32.totalorder %s4715_s14, 3 }
   0x5   : > { %s5621_s15 = smov (%p34_p1, %s32_s15), 0  ;;  %p178_p3 = pnand %p3159_p0, %p177_p2 }
   0x7   : > { %181 = sbr.rel (%p178_p3) target bundleno = 556 (0x22c), region = 32 }
   0xe   : > { %v4519_v0 = vld [vmem:[%s5611_s1 + $0x100] sm:$0xff]   ;;  %v4522_v3 = vld [vmem:[%s5611_s1 + $0x108] sm:$0xff]   ;;  %v4525_v6 = vld [vmem:[%s5611_s1 + $0x110] sm:$0xff]   ;;  %p215_p4 = scmp.lt.s32.totalorder %s4707_s12, 1 }
   0xf   : > { %v4763_v1 = vld [vmem:[%s5611_s1 + $0x140] sm:$0xff]   ;;  %3766 = vmatprep.subr.bf16.mxu0 %v4519_v0  ;;  %v4776_v4 = vld [vmem:[%s5611_s1 + $0x148] sm:$0xff]   ;;  %v4788_v7 = vld [vmem:[%s5611_s1 + $0x150] sm:$0xff]  }
  0x10   : > { %v4521_v2 = vld [vmem:[%s5611_s1 + $0xc0] sm:$0xff]   ;;  %4318 = vmatprep.subr.bf16.mxu1 %v4763_v1  ;;  %v4524_v5 = vld [vmem:[%s5611_s1 + $0xc8] sm:$0xff]   ;;  %v4527_v8 = vld [vmem:[%s5611_s1 + $0xd0] sm:$0xff]   ;;  %s5623_s12 = smov (!%p215_p4, %s4707_s12), 1 }
  0x11   : > { %3767 = vmatpush3.bf16.msra.mxu0 %v4521_v2  ;;  %4326 = vmatpush3.bf16.msra.mxu1 %v4763_v1  ;;  %v4528_v9 = vld [vmem:[%s5611_s1 + $0x118] sm:$0xff]   ;;  %v4531_v12 = vld [vmem:[%s5611_s1 + $0x120] sm:$0xff]   ;;  %v4534_v15 = vld [vmem:[%s5611_s1 + $0x128] sm:$0xff]   ;;  %s4494_s27 = smul.u32 432, %s5623_s12  ;;  %s3638_s4 = sshll.u32 %s5623_s12, 7 }
  0x12   : > { %3768 = vmatprep.subr.bf16.mxu0 %v4522_v3  ;;  %4319 = vmatprep.subr.bf16.mxu1 %v4776_v4  ;;  %v4801_v10 = vld [vmem:[%s5611_s1 + $0x158] sm:$0xff]   ;;  %v4815_v13 = vld [vmem:[%s5611_s1 + $0x160] sm:$0xff]   ;;  %v4831_v16 = vld [vmem:[%s5611_s1 + $0x168] sm:$0xff]   ;;  %s5515_s7 = scalar_lea.vmem %s5613_s3, %s3638_s4 }
  0x13   : > { %v4530_v11 = vld [vmem:[%s5611_s1 + $0xd8] sm:$0xff]   ;;  %v4533_v14 = vld [vmem:[%s5611_s1 + $0xe0] sm:$0xff]   ;;  %v4536_v17 = vld [vmem:[%s5611_s1 + $0xe8] sm:$0xff]   ;;  %s4853_s11 = scalar_lea.vmem %s5610_s0, %s4494_s27 }
  0x14   : > { %v4537_v18 = vld [vmem:[%s5611_s1 + $0x130] sm:$0xff]   ;;  %v4540_v21 = vld [vmem:[%s5611_s1 + $0x138] sm:$0xff]   ;;  %v4546_v24 = vld [vmem:[%s4853_s11 + $0xe0] ss:$12 sps:$4 sm:$0xff]  }
  0x15   : > { %3769 = vmatpush3.bf16.msra.mxu0 %v4524_v5  ;;  %4327 = vmatpush3.bf16.msra.mxu1 %v4776_v4  ;;  %v4845_v19 = vld [vmem:[%s5611_s1 + $0x170] sm:$0xff]   ;;  %v4862_v22 = vld [vmem:[%s5611_s1 + $0x178] sm:$0xff]   ;;  %v4548_v26 = vld [vmem:[%s5611_s1 + $0x40] sm:$0xff]  }
  0x16   : > { %3770 = vmatprep.subr.bf16.mxu0 %v4525_v6  ;;  %4320 = vmatprep.subr.bf16.mxu1 %v4788_v7  ;;  %v4539_v20 = vld [vmem:[%s5611_s1 + $0xf0] sm:$0xff]   ;;  %v4866_v23 = vld [vmem:[%s4853_s11 + $0x1c] ss:$12 sps:$4 sm:$0xff]   ;;  %v4879_v27 = vld [vmem:[%s4853_s11 + $0x18] ss:$12 sps:$4 sm:$0xff]  }
  0x17   : > { %910 = vmatprep.mubr.bf16.mxu0 %v4866_v23  ;;  %v4542_v25 = vld [vmem:[%s5611_s1 + $0xf8] sm:$0xff]   ;;  %4206 = vmatprep.mubr.bf16.mxu1 %v4546_v24  ;;  %v4549_v29 = vld [vmem:[%s5611_s1] sm:$0xff]   ;;  %v4550_v30 = vld [vmem:[%s5611_s1 + $0x48] sm:$0xff]  }
  0x18   : > { %v4547_v28 = vld [vmem:[%s4853_s11 + $0xf8] ss:$12 sps:$4 sm:$0xff]   ;;  %v4891_v31 = vld [vmem:[%s4853_s11 + $0x34] ss:$12 sps:$4 sm:$0xff]   ;;  %v4554_v32 = vld [vmem:[%s4853_s11 + $0x110] ss:$12 sps:$4 sm:$0xff]  }
  0x19   : > { %3771 = vmatpush3.bf16.msra.mxu0 %v4527_v8  ;;  %4328 = vmatpush3.bf16.msra.mxu1 %v4788_v7  ;;  %v4551_v33 = vld [vmem:[%s5611_s1 + $0x8] sm:$0xff]   ;;  %v4901_v34 = vld [vmem:[%s4853_s11 + $0x30] ss:$12 sps:$4 sm:$0xff]   ;;  %v4565_v43 = vld [vmem:[%s4853_s11 + $0x158] ss:$12 sps:$4 sm:$0xff]  }
  0x1a   : > { %3772 = vmatprep.subr.bf16.mxu0 %v4528_v9  ;;  %4321 = vmatprep.subr.bf16.mxu1 %v4801_v10  ;;  %v4557_v35 = vld [vmem:[%s5611_s1 + $0x50] sm:$0xff]   ;;  %v4559_v38 = vld [vmem:[%s5611_s1 + $0x58] sm:$0xff]   ;;  %v4563_v40 = vld [vmem:[%s4853_s11 + $0x140] ss:$12 sps:$4 sm:$0xff]  }
  0x1b   : > { %v4556_v36 = vld [vmem:[%s4853_s11 + $0x128] ss:$12 sps:$4 sm:$0xff]   ;;  %v4915_v39 = vld [vmem:[%s4853_s11 + $0x4c] ss:$12 sps:$4 sm:$0xff]   ;;  %v4566_v44 = vld [vmem:[%s5611_s1 + $0x60] sm:$0xff]  }
  0x1c   : > { %v4558_v37 = vld [vmem:[%s5611_s1 + $0x10] sm:$0xff]   ;;  %v4560_v41 = vld [vmem:[%s5611_s1 + $0x18] sm:$0xff]   ;;  %v4567_v45 = vld [vmem:[%s5611_s1 + $0x20] sm:$0xff]  }
  0x1d   : > { %3773 = vmatpush3.bf16.msra.mxu0 %v4530_v11  ;;  %4329 = vmatpush3.bf16.msra.mxu1 %v4801_v10  ;;  %v4926_v42 = vld [vmem:[%s4853_s11 + $0x48] ss:$12 sps:$4 sm:$0xff]   ;;  %v4941_v47 = vld [vmem:[%s4853_s11 + $0x64] ss:$12 sps:$4 sm:$0xff]   ;;  %v4954_v51 = vld [vmem:[%s4853_s11 + $0x60] ss:$12 sps:$4 sm:$0xff]  }
  0x1e   : > { %3774 = vmatprep.subr.bf16.mxu0 %v4531_v12  ;;  %4322 = vmatprep.subr.bf16.mxu1 %v4815_v13  ;;  %v4568_v46 = vld [vmem:[%s5611_s1 + $0x68] sm:$0xff]   ;;  %v4572_v48 = vld [vmem:[%s4853_s11 + $0x170] ss:$12 sps:$4 sm:$0xff]   ;;  %v4585_v58 = vld [vmem:[%s5611_s1 + $0x80] sm:$0xff]  }
  0x1f   : > { %v4569_v49 = vld [vmem:[%s5611_s1 + $0x28] sm:$0xff]   ;;  %v4575_v50 = vld [vmem:[%s5611_s1 + $0x70] sm:$0xff]   ;;  %v4577_v54 = vld [vmem:[%s5611_s1 + $0x78] sm:$0xff]  }
  0x20   : > { %v4574_v52 = vld [vmem:[%s4853_s11 + $0x188] ss:$12 sps:$4 sm:$0xff]   ;;  %v4583_v56 = vld [vmem:[%s4853_s11 + $0x4] ss:$12 sps:$4 sm:$0xff]   ;;  %v4578_v57 = vld [vmem:[%s5611_s1 + $0x38] sm:$0xff]  }
  0x21   : > { %3775 = vmatpush3.bf16.msra.mxu0 %v4533_v14  ;;  %4330 = vmatpush3.bf16.msra.mxu1 %v4815_v13  ;;  %v4576_v53 = vld [vmem:[%s5611_s1 + $0x30] sm:$0xff]   ;;  %v4966_v55 = vld [vmem:[%s4853_s11 + $0x7c] ss:$12 sps:$4 sm:$0xff]   ;;  %v4581_v59 = vld [vmem:[%s4853_s11] ss:$12 sps:$4 sm:$0xff]  }
  0x22   : > { %3776 = vmatprep.subr.bf16.mxu0 %v4534_v15  ;;  %4323 = vmatprep.subr.bf16.mxu1 %v4831_v16  ;;  %v4981_v60 = vld [vmem:[%s4853_s11 + $0x78] ss:$12 sps:$4 sm:$0xff]   ;;  %v4985_v61 = vld [vmem:[%s4853_s11 + $0x94] ss:$12 sps:$4 sm:$0xff]   ;;  %v4592_v62 = vld [vmem:[%s5611_s1 + $0x88] sm:$0xff]  }
  0x23   : > { %v4599_v63 = vld [vmem:[%s5611_s1 + $0x90] sm:$0xff]   ;;  %v4606_v2 = vld [vmem:[%s5611_s1 + $0x98] sm:$0xff]   ;;  %v4626_v5 = vld [vmem:[%s5611_s1 + $0x1c0] sm:$0xff]  }
  0x24   : > { %v4999_v0 = vld [vmem:[%s4853_s11 + $0x90] ss:$12 sps:$4 sm:$0xff]   ;;  %v5013_v3 = vld [vmem:[%s4853_s11 + $0xa8] ss:$12 sps:$4 sm:$0xff]   ;;  %v5035_v9 = vld [vmem:[%s4853_s11 + $0xc0] ss:$12 sps:$4 sm:$0xff]  }
  0x25   : > { %3777 = vmatpush3.bf16.msra.mxu0 %v4536_v17  ;;  %4331 = vmatpush3.bf16.msra.mxu1 %v4831_v16  ;;  %v5022_v6 = vld [vmem:[%s4853_s11 + $0xc4] ss:$12 sps:$4 sm:$0xff]   ;;  %v4641_v11 = vld [vmem:[%s5611_s1 + $0xb8] sm:$0xff]   ;;  %v5074_v17 = vld [vmem:[%s4853_s11 + $0x108] ss:$12 sps:$4 sm:$0xff]  }
  0x26   : > { %3778 = vmatprep.subr.bf16.mxu0 %v4537_v18  ;;  %4324 = vmatprep.subr.bf16.mxu1 %v4845_v19  ;;  %v4628_v8 = vld [vmem:[%s5611_s1 + $0xb0] sm:$0xff]   ;;  %v5048_v12 = vld [vmem:[%s4853_s11 + $0xd8] ss:$12 sps:$4 sm:$0xff]  }
  0x27   : > { %v5058_v14 = vld [vmem:[%s4853_s11 + $0xf0] ss:$12 sps:$4 sm:$0xff]   ;;  %v5061_v15 = vld [vmem:[%s4853_s11 + $0x10c] ss:$12 sps:$4 sm:$0xff]  }
  0x28   : > { %v5077_v18 = vld [vmem:[%s4853_s11 + $0x124] ss:$12 sps:$4 sm:$0xff]   ;;  %v5107_v24 = vld [vmem:[%s4853_s11 + $0x16c] ss:$12 sps:$4 sm:$0xff]  }
  0x29   : > { %3779 = vmatpush3.bf16.msra.mxu0 %v4539_v20  ;;  %4332 = vmatpush3.bf16.msra.mxu1 %v4845_v19  ;;  %v5087_v20 = vld [vmem:[%s4853_s11 + $0x13c] ss:$12 sps:$4 sm:$0xff]  }
  0x2a   : > { %3780 = vmatprep.subr.bf16.mxu0 %v4540_v21  ;;  %4325 = vmatprep.subr.bf16.mxu1 %v4862_v22  ;;  %v5094_v21 = vld [vmem:[%s4853_s11 + $0x138] ss:$12 sps:$4 sm:$0xff]  }
  0x2d   : > { %3781 = vmatpush3.bf16.msra.mxu0 %v4542_v25  ;;  %4333 = vmatpush3.bf16.msra.mxu1 %v4862_v22  ;;  %v5114_v25 = vld [vmem:[%s4853_s11 + $0x168] ss:$12 sps:$4 sm:$0xff]  }
  0x2e   : > { %4174 = vmatprep.subr.bf16.mxu0 %v4763_v1  ;;  %3902 = vmatprep.subr.bf16.mxu1 %v4548_v26  ;;  %v5117_v26 = vld [vmem:[%s4853_s11 + $0x184] ss:$12 sps:$4 sm:$0xff]  }
  0x30   : > { %911 = vmatmul.mubr.bf16.vlgmr.msra.gmra.mrb[0].mxu0 %v4879_v27  ;;  %4207 = vmatmul.mubr.bf16.vlgmr.msra.gmra.mrb[0].mxu1 %v4547_v28  ;;  %v4624_v28 = vld [vmem:[%s4853_s11 + $0x20] ss:$12 sps:$4 sm:$0xff]  }
  0x31   : > { %4175 = vmatpush3.bf16.msra.mxu0 %v4763_v1  ;;  %3903 = vmatpush3.bf16.msra.mxu1 %v4549_v29  ;;  %v5003_v1 = vld [vmem:[%s4853_s11 + $0xac] ss:$12 sps:$4 sm:$0xff]  }
  0x32   : > { %3904 = vmatprep.subr.bf16.mxu1 %v4550_v30  ;;  %918 = vmatprep.mubr.bf16.mxu0 %v4891_v31  ;;  %v4625_v29 = vld [vmem:[%s4853_s11 + $0x38] ss:$12 sps:$4 sm:$0xff]  }
  0x33   : > { %4210 = vmatprep.mubr.bf16.mxu1 %v4554_v32  ;;  %4176 = vmatprep.subr.bf16.mxu0 %v4776_v4  ;;  %v4627_v30 = vld [vmem:[%s5611_s1 + $0x180] sm:$0xff]   ;;  %v4631_v32 = vld [vmem:[%s4853_s11 + $0x50] ss:$12 sps:$4 sm:$0xff]  }
  0x35   : > { %3905 = vmatpush3.bf16.msra.mxu1 %v4551_v33  ;;  %4177 = vmatpush3.bf16.msra.mxu0 %v4776_v4  ;;  %v4613_v4 = vld [vmem:[%s5611_s1 + $0xa0] sm:$0xff]   ;;  %v4629_v33 = vld [vmem:[%s5611_s1 + $0x1c8] sm:$0xff]  }
  0x36   : > { %3906 = vmatprep.subr.bf16.mxu1 %v4557_v35  ;;  %4178 = vmatprep.subr.bf16.mxu0 %v4788_v7  ;;  %v4630_v35 = vld [vmem:[%s5611_s1 + $0x188] sm:$0xff]  }
  0x38   : > { %919 = vmatmul.mubr.bf16.gmra.mrb[4].mxu0 %v4901_v34  ;;  %4211 = vmatmul.mubr.bf16.gmra.mrb[4].mxu1 %v4556_v36  ;;  %v4633_v36 = vld [vmem:[%s5611_s1 + $0x1d0] sm:$0xff]  }
  0x39   : > { %3907 = vmatpush3.bf16.msra.mxu1 %v4558_v37  ;;  %926 = vmatprep.mubr.bf16.mxu0 %v4915_v39  ;;  %v4632_v37 = vld [vmem:[%s4853_s11 + $0x68] ss:$12 sps:$4 sm:$0xff]  }
  0x3a   : > { %3908 = vmatprep.subr.bf16.mxu1 %v4559_v38  ;;  %4214 = vmatprep.mubr.bf16.mxu1 %v4563_v40  ;;  %v4634_v38 = vld [vmem:[%s5611_s1 + $0x190] sm:$0xff]   ;;  %v4637_v40 = vld [vmem:[%s4853_s11 + $0x80] ss:$12 sps:$4 sm:$0xff]  }
  0x3b   : > { %4179 = vmatpush3.bf16.msra.mxu0 %v4788_v7  ;;  %v4620_v7 = vld [vmem:[%s5611_s1 + $0xa8] sm:$0xff]  }
  0x3c   : > { %4180 = vmatprep.subr.bf16.mxu0 %v4801_v10 }
  0x3d   : > { %3909 = vmatpush3.bf16.msra.mxu1 %v4560_v41  ;;  %v4635_v41 = vld [vmem:[%s5611_s1 + $0x1d8] sm:$0xff]  }
  0x3e   : > { %3910 = vmatprep.subr.bf16.mxu1 %v4566_v44  ;;  %v4639_v44 = vld [vmem:[%s5611_s1 + $0x1e0] sm:$0xff]  }
  0x3f   : > { %4181 = vmatpush3.bf16.msra.mxu0 %v4801_v10  ;;  %v5038_v10 = vld [vmem:[%s4853_s11 + $0xdc] ss:$12 sps:$4 sm:$0xff]  }
  0x40   : > { %927 = vmatmul.mubr.bf16.gmra.mrb[8].mxu0 %v4926_v42  ;;  %4215 = vmatmul.mubr.bf16.gmra.mrb[8].mxu1 %v4565_v43  ;;  %v4636_v43 = vld [vmem:[%s5611_s1 + $0x198] sm:$0xff]  }
  0x41   : > { %3911 = vmatpush3.bf16.msra.mxu1 %v4567_v45  ;;  %934 = vmatprep.mubr.bf16.mxu0 %v4941_v47  ;;  %v4638_v45 = vld [vmem:[%s4853_s11 + $0x98] ss:$12 sps:$4 sm:$0xff]  }
  0x42   : > { %3912 = vmatprep.subr.bf16.mxu1 %v4568_v46  ;;  %4218 = vmatprep.mubr.bf16.mxu1 %v4572_v48  ;;  %v4640_v46 = vld [vmem:[%s5611_s1 + $0x1a0] sm:$0xff]   ;;  %v4644_v48 = vld [vmem:[%s4853_s11 + $0xb0] ss:$12 sps:$4 sm:$0xff]  }
  0x43   : > { %4182 = vmatprep.subr.bf16.mxu0 %v4815_v13 }
  0x44   : > { %4183 = vmatpush3.bf16.msra.mxu0 %v4815_v13  ;;  %v5051_v13 = vld [vmem:[%s4853_s11 + $0xf4] ss:$12 sps:$4 sm:$0xff]  }
  0x45   : > { %3913 = vmatpush3.bf16.msra.mxu1 %v4569_v49  ;;  %4184 = vmatprep.subr.bf16.mxu0 %v4831_v16  ;;  %v4642_v49 = vld [vmem:[%s5611_s1 + $0x1e8] sm:$0xff]  }
  0x46   : > { %3914 = vmatprep.subr.bf16.mxu1 %v4575_v50  ;;  %v4643_v50 = vld [vmem:[%s5611_s1 + $0x1a8] sm:$0xff]  }
  0x48   : > { %935 = vmatmul.mubr.bf16.gmra.mrb[12].mxu0 %v4954_v51  ;;  %4219 = vmatmul.mubr.bf16.gmra.mrb[12].mxu1 %v4574_v52  ;;  %v4646_v52 = vld [vmem:[%s5611_s1 + $0x1f0] sm:$0xff]  }
  0x49   : > { %3915 = vmatpush3.bf16.msra.mxu1 %v4576_v53  ;;  %942 = vmatprep.mubr.bf16.mxu0 %v4966_v55  ;;  %v4645_v53 = vld [vmem:[%s4853_s11 + $0xc8] ss:$12 sps:$4 sm:$0xff]  }
  0x4a   : > { %3916 = vmatprep.subr.bf16.mxu1 %v4577_v54  ;;  %1632 = vmatprep.mubr.bf16.mxu1 %v4583_v56  ;;  %v4647_v54 = vld [vmem:[%s5611_s1 + $0x1b0] sm:$0xff]  }
  0x4b   : > { %4185 = vmatpush3.bf16.msra.mxu0 %v4831_v16  ;;  %v5066_v16 = vld [vmem:[%s5611_s1 + $0x200] sm:$0xff]   ;;  %v4650_v56 = vld [vmem:[%s4853_s11 + $0x8] ss:$12 sps:$4 sm:$0xff]  }
  0x4c   : > { %4186 = vmatprep.subr.bf16.mxu0 %v4845_v19 }
  0x4d   : > { %3917 = vmatpush3.bf16.msra.mxu1 %v4578_v57  ;;  %v4648_v57 = vld [vmem:[%s5611_s1 + $0x1f8] sm:$0xff]  }
  0x4e   : > { %4222 = vmatprep.subr.bf16.mxu1 %v4585_v58 }
  0x4f   : > { %4187 = vmatpush3.bf16.msra.mxu0 %v4845_v19  ;;  %v5084_v19 = vld [vmem:[%s4853_s11 + $0x120] ss:$12 sps:$4 sm:$0xff]  }
  0x50   : > { %943 = vmatmul.mubr.bf16.gmra.mrb[16].mxu0 %v4981_v60  ;;  %1633 = vmatmul.mubr.bf16.vlgmr.msra.gmra.mrb[16].mxu1 %v4581_v59  ;;  %v4651_v59 = vld [vmem:[%s4853_s11 + $0x20] ss:$12 sps:$4 sm:$0xff]  }
  0x51   : > { %4223 = vmatpush3.bf16.msra.mxu1 %v4585_v58  ;;  %950 = vmatprep.mubr.bf16.mxu0 %v4985_v61  ;;  %v4649_v58 = vld [vmem:[%s5611_s1 + $0x1b8] sm:$0xff]  }
  0x52   : > { %1640 = vmatprep.mubr.bf16.mxu1 %v4866_v23  ;;  %4224 = vmatprep.subr.bf16.mxu1 %v4592_v62  ;;  %v5104_v23 = vld [vmem:[%s4853_s11 + $0x150] ss:$12 sps:$4 sm:$0xff]  }
  0x53   : > { %4188 = vmatprep.subr.bf16.mxu0 %v4862_v22 }
  0x54   : > { %4189 = vmatpush3.bf16.msra.mxu0 %v4862_v22  ;;  %v5097_v22 = vld [vmem:[%s4853_s11 + $0x154] ss:$12 sps:$4 sm:$0xff]  }
  0x55   : > { %4225 = vmatpush3.bf16.msra.mxu1 %v4592_v62  ;;  %4038 = vmatprep.subr.bf16.mxu0 %v4626_v5  ;;  %v4653_v62 = vld [vmem:[%s4853_s11 + $0x38] ss:$12 sps:$4 sm:$0xff]   ;;  %v4657_v5 = vld [vmem:[%s4853_s11 + $0x80] ss:$12 sps:$4 sm:$0xff]  }
  0x56   : > { %4226 = vmatprep.subr.bf16.mxu1 %v4599_v63 }
  0x58   : > { %951 = vmatmul.mubr.bf16.gmra.mrb[20].mxu0 %v4999_v0  ;;  %1641 = vmatmul.mubr.bf16.gmra.mrb[20].mxu1 %v4879_v27  ;;  %v5124_v27 = vld [vmem:[%s4853_s11 + $0x180] ss:$12 sps:$4 sm:$0xff]  }
  0x59   : > { %958 = vmatprep.mubr.bf16.mxu0 %v5003_v1  ;;  %1648 = vmatprep.mubr.bf16.mxu1 %v4891_v31 }
  0x5a   : > { %4227 = vmatpush3.bf16.msra.mxu1 %v4599_v63  ;;  %v4655_v63 = vld [vmem:[%s5611_s1 + $0x208] sm:$0xff]  }
  0x5b   : > { %4228 = vmatprep.subr.bf16.mxu1 %v4606_v2 }
  0x5e   : > { %4229 = vmatpush3.bf16.msra.mxu1 %v4606_v2  ;;  %v4654_v2 = vld [vmem:[%s4853_s11 + $0x50] ss:$12 sps:$4 sm:$0xff]  }
  0x5f   : > { %4230 = vmatprep.subr.bf16.mxu1 %v4613_v4 }
  0x60   : > { %959 = vmatmul.mubr.bf16.gmra.mrb[24].mxu0 %v5013_v3  ;;  %1649 = vmatmul.mubr.bf16.gmra.mrb[24].mxu1 %v4901_v34 }
  0x61   : > { %966 = vmatprep.mubr.bf16.mxu0 %v5022_v6  ;;  %1656 = vmatprep.mubr.bf16.mxu1 %v4915_v39 }
  0x62   : > { %4231 = vmatpush3.bf16.msra.mxu1 %v4613_v4  ;;  %v4656_v4 = vld [vmem:[%s4853_s11 + $0x68] ss:$12 sps:$4 sm:$0xff]  }
  0x63   : > { %4232 = vmatprep.subr.bf16.mxu1 %v4620_v7 }
  0x66   : > { %4233 = vmatpush3.bf16.msra.mxu1 %v4620_v7  ;;  %v4659_v7 = vld [vmem:[%s4853_s11 + $0x98] ss:$12 sps:$4 sm:$0xff]  }
  0x67   : > { %4234 = vmatprep.subr.bf16.mxu1 %v4628_v8 }
  0x68   : > { %967 = vmatmul.mubr.bf16.gmra.mrb[28].mxu0 %v5035_v9  ;;  %1657 = vmatmul.mubr.bf16.gmra.mrb[28].mxu1 %v4926_v42 }
  0x69   : > { %974 = vmatprep.mubr.bf16.mxu0 %v5038_v10  ;;  %1664 = vmatprep.mubr.bf16.mxu1 %v4941_v47 }
  0x6a   : > { %4235 = vmatpush3.bf16.msra.mxu1 %v4628_v8  ;;  %v4667_v8 = vld [vmem:[%s5611_s1 + $0x228] sm:$0xff]  }
  0x6b   : > { %4236 = vmatprep.subr.bf16.mxu1 %v4641_v11 }
  0x6e   : > { %4237 = vmatpush3.bf16.msra.mxu1 %v4641_v11  ;;  %v4662_v11 = vld [vmem:[%s4853_s11 + $0xc8] ss:$12 sps:$4 sm:$0xff]  }
  0x6f   : > { %4270 = vmatprep.subr.bf16.mxu1 %v5066_v16 }
  0x70   : > { %975 = vmatmul.mubr.bf16.gmra.mrb[32].mxu0 %v5048_v12  ;;  %1665 = vmatmul.mubr.bf16.gmra.mrb[32].mxu1 %v4954_v51 }
  0x71   : > { %982 = vmatprep.mubr.bf16.mxu0 %v5051_v13  ;;  %1672 = vmatprep.mubr.bf16.mxu1 %v4966_v55 }
  0x78   : > { %983 = vmatmul.mubr.bf16.gmra.mrb[36].mxu0 %v5058_v14  ;;  %1673 = vmatmul.mubr.bf16.gmra.mrb[36].mxu1 %v4981_v60 }
  0x79   : > { %990 = vmatprep.mubr.bf16.mxu0 %v5061_v15  ;;  %1680 = vmatprep.mubr.bf16.mxu1 %v4985_v61 }
  0x80   : > { %991 = vmatmul.mubr.bf16.gmra.mrb[40].mxu0 %v5074_v17  ;;  %1681 = vmatmul.mubr.bf16.gmra.mrb[40].mxu1 %v4999_v0 }
  0x81   : > { %998 = vmatprep.mubr.bf16.mxu0 %v5077_v18  ;;  %1688 = vmatprep.mubr.bf16.mxu1 %v5003_v1 }
  0x88   : > { %999 = vmatmul.mubr.bf16.gmra.mrb[44].mxu0 %v5084_v19  ;;  %1689 = vmatmul.mubr.bf16.gmra.mrb[44].mxu1 %v5013_v3 }
  0x89   : > { %1006 = vmatprep.mubr.bf16.mxu0 %v5087_v20  ;;  %1696 = vmatprep.mubr.bf16.mxu1 %v5022_v6 }
  0x90   : > { %1007 = vmatmul.mubr.bf16.gmra.mrb[48].mxu0 %v5094_v21  ;;  %1697 = vmatmul.mubr.bf16.gmra.mrb[48].mxu1 %v5035_v9 }
  0x91   : > { %1014 = vmatprep.mubr.bf16.mxu0 %v5097_v22  ;;  %1704 = vmatprep.mubr.bf16.mxu1 %v5038_v10 }
  0x98   : > { %1015 = vmatmul.mubr.bf16.gmra.mrb[52].mxu0 %v5104_v23  ;;  %1705 = vmatmul.mubr.bf16.gmra.mrb[52].mxu1 %v5048_v12 }
  0x99   : > { %1022 = vmatprep.mubr.bf16.mxu0 %v5107_v24  ;;  %1712 = vmatprep.mubr.bf16.mxu1 %v5051_v13 }
  0xa0   : > { %1023 = vmatmul.mubr.bf16.gmra.mrb[56].mxu0 %v5114_v25  ;;  %1713 = vmatmul.mubr.bf16.gmra.mrb[56].mxu1 %v5058_v14 }
  0xa1   : > { %1030 = vmatprep.mubr.bf16.mxu0 %v5117_v26  ;;  %1720 = vmatprep.mubr.bf16.mxu1 %v5061_v15 }
  0xa8   : > { %1031 = vmatmul.mubr.bf16.gmra.mrb[60].mxu0 %v5124_v27  ;;  %1721 = vmatmul.mubr.bf16.gmra.mrb[60].mxu1 %v5074_v17 }
  0xa9   : > { %4190 = vmatprep.mubr.bf16.mxu0 %v4624_v28  ;;  %1728 = vmatprep.mubr.bf16.mxu1 %v5077_v18  ;;  %v4666_v28 = vld [vmem:[%s4853_s11 + $0x110] ss:$12 sps:$4 sm:$0xff]  }
  0xb0   : > { %4191 = vmatmul.mubr.bf16.vlgmr.msra.gmra.mrb[64].mxu0 %v4625_v29  ;;  %1729 = vmatmul.mubr.bf16.gmra.mrb[64].mxu1 %v5084_v19  ;;  %v4668_v29 = vld [vmem:[%s4853_s11 + $0x128] ss:$12 sps:$4 sm:$0xff]  }
  0xb1   : > { %4039 = vmatpush3.bf16.msra.mxu0 %v4627_v30  ;;  %4194 = vmatprep.mubr.bf16.mxu0 %v4631_v32  ;;  %v4672_v30 = vld [vmem:[%s4853_s11 + $0x170] ss:$12 sps:$4 sm:$0xff]  }
  0xb2   : > { %4040 = vmatprep.subr.bf16.mxu0 %v4629_v33  ;;  %1736 = vmatprep.mubr.bf16.mxu1 %v5087_v20 }
  0xb5   : > { %4041 = vmatpush3.bf16.msra.mxu0 %v4630_v35 }
  0xb6   : > { %4042 = vmatprep.subr.bf16.mxu0 %v4633_v36 }
  0xb8   : > { %4195 = vmatmul.mubr.bf16.gmra.mrb[68].mxu0 %v4632_v37  ;;  %1737 = vmatmul.mubr.bf16.gmra.mrb[68].mxu1 %v5094_v21 }
  0xb9   : > { %4043 = vmatpush3.bf16.msra.mxu0 %v4634_v38  ;;  %4198 = vmatprep.mubr.bf16.mxu0 %v4637_v40  ;;  %v4676_v40 = vld [vmem:[%s4853_s11 + $0x68] ss:$12 sps:$4 sm:$0xff]  }
  0xba   : > { %4044 = vmatprep.subr.bf16.mxu0 %v4635_v41  ;;  %1744 = vmatprep.mubr.bf16.mxu1 %v5097_v22 }
  0xbd   : > { %4045 = vmatpush3.bf16.msra.mxu0 %v4636_v43 }
  0xbe   : > { %4046 = vmatprep.subr.bf16.mxu0 %v4639_v44  ;;  %v4677_v44 = vld [vmem:[%s4853_s11 + $0x80] ss:$12 sps:$4 sm:$0xff]  }
  0xc0   : > { %4199 = vmatmul.mubr.bf16.gmra.mrb[72].mxu0 %v4638_v45  ;;  %1745 = vmatmul.mubr.bf16.gmra.mrb[72].mxu1 %v5104_v23 }
  0xc1   : > { %4047 = vmatpush3.bf16.msra.mxu0 %v4640_v46  ;;  %4202 = vmatprep.mubr.bf16.mxu0 %v4644_v48  ;;  %v4678_v48 = vld [vmem:[%s4853_s11 + $0x98] ss:$12 sps:$4 sm:$0xff]  }
  0xc2   : > { %4048 = vmatprep.subr.bf16.mxu0 %v4642_v49  ;;  %1752 = vmatprep.mubr.bf16.mxu1 %v5107_v24 }
  0xc5   : > { %4049 = vmatpush3.bf16.msra.mxu0 %v4643_v50 }
  0xc6   : > { %4050 = vmatprep.subr.bf16.mxu0 %v4646_v52  ;;  %v4679_v52 = vld [vmem:[%s4853_s11 + $0xb0] ss:$12 sps:$4 sm:$0xff]  }
  0xc8   : > { %4203 = vmatmul.mubr.bf16.gmra.mrb[76].mxu0 %v4645_v53  ;;  %1753 = vmatmul.mubr.bf16.gmra.mrb[76].mxu1 %v5114_v25 }
  0xc9   : > { %4051 = vmatpush3.bf16.msra.mxu0 %v4647_v54  ;;  %4238 = vmatprep.mubr.bf16.mxu1 %v4650_v56  ;;  %v4680_v56 = vld [vmem:[%s4853_s11 + $0xc8] ss:$12 sps:$4 sm:$0xff]  }
  0xca   : > { %4052 = vmatprep.subr.bf16.mxu0 %v4648_v57  ;;  %2473 = vmatprep.mubr.bf16.mxu0 %v4891_v31  ;;  %v4658_v31 = vld [vmem:[%s5611_s1 + $0x210] sm:$0xff]  }
  0xcd   : > { %4053 = vmatpush3.bf16.msra.mxu0 %v4649_v58 }
  0xd0   : > { %4239 = vmatmul.mubr.bf16.vlgmr.msra.gmra.mrb[80].mxu1 %v4651_v59  ;;  %2474 = vmatmul.mubr.bf16.vlgmr.msra.gmra.mrb[80].mxu0 %v4901_v34  ;;  %v4661_v34 = vld [vmem:[%s5611_s1 + $0x218] sm:$0xff]  }
  0xd1   : > { %4271 = vmatpush3.bf16.msra.mxu1 %v5066_v16  ;;  %4242 = vmatprep.mubr.bf16.mxu1 %v4653_v62  ;;  %v4665_v16 = vld [vmem:[%s4853_s11 + $0xf8] ss:$12 sps:$4 sm:$0xff]  }
  0xd2   : > { %2481 = vmatprep.mubr.bf16.mxu0 %v4915_v39  ;;  %4272 = vmatprep.subr.bf16.mxu1 %v4655_v63  ;;  %v4664_v39 = vld [vmem:[%s5611_s1 + $0x220] sm:$0xff]  }
  0xd5   : > { %4273 = vmatpush3.bf16.msra.mxu1 %v4655_v63  ;;  %v4681_v63 = vld [vmem:[%s4853_s11 + $0xe0] ss:$12 sps:$4 sm:$0xff]  }
  0xd6   : > { %4274 = vmatprep.subr.bf16.mxu1 %v4658_v31 }
  0xd8   : > { %4243 = vmatmul.mubr.bf16.gmra.mrb[84].mxu1 %v4654_v2  ;;  %2482 = vmatmul.mubr.bf16.gmra.mrb[84].mxu0 %v4926_v42  ;;  %v4670_v42 = vld [vmem:[%s5611_s1 + $0x230] sm:$0xff]  }
  0xd9   : > { %4246 = vmatprep.mubr.bf16.mxu1 %v4656_v4  ;;  %2489 = vmatprep.mubr.bf16.mxu0 %v4941_v47  ;;  %v4660_v47 = vld [vmem:[%s4853_s11 + $0xb0] ss:$12 sps:$4 sm:$0xff]  }
  0xda   : > { %4275 = vmatpush3.bf16.msra.mxu1 %v4658_v31 }
  0xdb   : > { %4276 = vmatprep.subr.bf16.mxu1 %v4661_v34 }
  0xde   : > { %4277 = vmatpush3.bf16.msra.mxu1 %v4661_v34 }
  0xdf   : > { %4278 = vmatprep.subr.bf16.mxu1 %v4664_v39 }
  0xe0   : > { %4247 = vmatmul.mubr.bf16.gmra.mrb[88].mxu1 %v4657_v5  ;;  %2490 = vmatmul.mubr.bf16.gmra.mrb[88].mxu0 %v4954_v51  ;;  %v4673_v51 = vld [vmem:[%s5611_s1 + $0x238] sm:$0xff]  }
  0xe1   : > { %4250 = vmatprep.mubr.bf16.mxu1 %v4659_v7  ;;  %2497 = vmatprep.mubr.bf16.mxu0 %v4966_v55  ;;  %v4663_v55 = vld [vmem:[%s4853_s11 + $0xe0] ss:$12 sps:$4 sm:$0xff]  }
  0xe2   : > { %4279 = vmatpush3.bf16.msra.mxu1 %v4664_v39  ;;  %v4682_v39 = vld [vmem:[%s4853_s11 + $0xf8] ss:$12 sps:$4 sm:$0xff]  }
  0xe3   : > { %4280 = vmatprep.subr.bf16.mxu1 %v4667_v8 }
  0xe6   : > { %4281 = vmatpush3.bf16.msra.mxu1 %v4667_v8 }
  0xe7   : > { %4282 = vmatprep.subr.bf16.mxu1 %v4670_v42 }
  0xe8   : > { %4251 = vmatmul.mubr.bf16.gmra.mrb[92].mxu1 %v4660_v47  ;;  %2498 = vmatmul.mubr.bf16.gmra.mrb[92].mxu0 %v4981_v60  ;;  %v4669_v60 = vld [vmem:[%s4853_s11 + $0x140] ss:$12 sps:$4 sm:$0xff]  }
  0xe9   : > { %4254 = vmatprep.mubr.bf16.mxu1 %v4662_v11  ;;  %2505 = vmatprep.mubr.bf16.mxu0 %v4985_v61  ;;  %v4671_v61 = vld [vmem:[%s4853_s11 + $0x158] ss:$12 sps:$4 sm:$0xff]  }
  0xea   : > { %4283 = vmatpush3.bf16.msra.mxu1 %v4670_v42 }
  0xeb   : > { %4284 = vmatprep.subr.bf16.mxu1 %v4673_v51 }
  0xee   : > { %4285 = vmatpush3.bf16.msra.mxu1 %v4673_v51  ;;  %v4683_v51 = vld [vmem:[%s4853_s11 + $0x110] ss:$12 sps:$4 sm:$0xff]  }
  0xf0   : > { %4255 = vmatmul.mubr.bf16.gmra.mrb[0].mxu1 %v4663_v55  ;;  %2506 = vmatmul.mubr.bf16.gmra.mrb[96].mxu0 %v4999_v0 }
  0xf1   : > { %4258 = vmatprep.mubr.bf16.mxu1 %v4665_v16  ;;  %2513 = vmatprep.mubr.bf16.mxu0 %v5003_v1 }
  0xf8   : > { %4259 = vmatmul.mubr.bf16.gmra.mrb[4].mxu1 %v4666_v28  ;;  %2514 = vmatmul.mubr.bf16.gmra.mrb[100].mxu0 %v5013_v3  ;;  %v4674_v3 = vld [vmem:[%s4853_s11 + $0x38] ss:$12 sps:$4 sm:$0xff]  }
  0xf9   : > { %4262 = vmatprep.mubr.bf16.mxu1 %v4668_v29  ;;  %2521 = vmatprep.mubr.bf16.mxu0 %v5022_v6 }
 0x100   : > { %4263 = vmatmul.mubr.bf16.gmra.mrb[8].mxu1 %v4669_v60  ;;  %2522 = vmatmul.mubr.bf16.gmra.mrb[104].mxu0 %v5035_v9  ;;  %v4684_v60 = vld [vmem:[%s4853_s11 + $0x128] ss:$12 sps:$4 sm:$0xff]  }
 0x101   : > { %4266 = vmatprep.mubr.bf16.mxu1 %v4671_v61  ;;  %2529 = vmatprep.mubr.bf16.mxu0 %v5038_v10  ;;  %v4675_v10 = vld [vmem:[%s4853_s11 + $0x50] ss:$12 sps:$4 sm:$0xff]  }
 0x103   : > { %v3782_v0 = vpop.f32.mrb[0].mxu0 }
 0x104   : > { %v3783_v1 = vpop.f32.mrb[1].mxu0 }
 0x105   : > { %v5242_v32 = vadd.f32 %v3783_v1, %v3782_v0  ;;  %v3785_v33 = vpop.f32.mrb[2].mxu0 }
 0x106   : > { %v3786_v35 = vpop.f32.mrb[3].mxu0 }
 0x107   : > { %v5245_v36 = vadd.f32 %v3786_v35, %v3785_v33  ;;  %v4685_v35 = vld [vmem:[%s4853_s11 + $0x140] ss:$12 sps:$4 sm:$0xff]  }
 0x108   : > { %4267 = vmatmul.mubr.bf16.gmra.mrb[12].mxu1 %v4672_v30  ;;  %2530 = vmatmul.mubr.bf16.gmra.mrb[108].mxu0 %v5048_v12 }
 0x109   : > { %2537 = vmatprep.mubr.bf16.mxu0 %v5051_v13  ;;  %4286 = vmatprep.mubr.bf16.mxu1 %v4674_v3 }
 0x10b   : > { %v3788_v6 = vpop.f32.mrb[4].mxu0 }
 0x10c   : > { %v3789_v9 = vpop.f32.mrb[5].mxu0 }
 0x10d   : > { %v5250_v37 = vadd.f32 %v3789_v9, %v3788_v6  ;;  %v3791_v38 = vpop.f32.mrb[6].mxu0 }
 0x10e   : > { %v3792_v41 = vpop.f32.mrb[7].mxu0 }
 0x10f   : > { %v5253_v43 = vadd.f32 %v3792_v41, %v3791_v38 }
 0x110   : > { %2538 = vmatmul.mubr.bf16.gmra.mrb[112].mxu0 %v5058_v14  ;;  %4287 = vmatmul.mubr.bf16.vlgmr.msra.gmra.mrb[80].mxu1 %v4675_v10 }
 0x111   : > { %2545 = vmatprep.mubr.bf16.mxu0 %v5061_v15  ;;  %4290 = vmatprep.mubr.bf16.mxu1 %v4676_v40  ;;  %v4686_v40 = vld [vmem:[%s4853_s11 + $0x158] ss:$12 sps:$4 sm:$0xff]  }
 0x113   : > { %v3794_v12 = vpop.f32.mrb[8].mxu0 }
 0x114   : > { %v3795_v13 = vpop.f32.mrb[9].mxu0 }
 0x115   : > { %v5258_v45 = vadd.f32 %v3795_v13, %v3794_v12  ;;  %v3797_v46 = vpop.f32.mrb[10].mxu0 }
 0x116   : > { %v3798_v49 = vpop.f32.mrb[11].mxu0 }
 0x117   : > { %v5261_v50 = vadd.f32 %v3798_v49, %v3797_v46  ;;  %v4687_v49 = vld [vmem:[%s4853_s11 + $0x170] ss:$12 sps:$4 sm:$0xff]  }
 0x118   : > { %2546 = vmatmul.mubr.bf16.gmra.mrb[116].mxu0 %v5074_v17  ;;  %4291 = vmatmul.mubr.bf16.gmra.mrb[84].mxu1 %v4677_v44 }
 0x119   : > { %2553 = vmatprep.mubr.bf16.mxu0 %v5077_v18  ;;  %4294 = vmatprep.mubr.bf16.mxu1 %v4678_v48 }
 0x11b   : > { %v3800_v14 = vpop.f32.mrb[12].mxu0 }
 0x11c   : > { %v3801_v15 = vpop.f32.mrb[13].mxu0 }
 0x11d   : > { %v5266_v53 = vadd.f32 %v3801_v15, %v3800_v14  ;;  %v3803_v54 = vpop.f32.mrb[14].mxu0 }
 0x11e   : > { %v3804_v57 = vpop.f32.mrb[15].mxu0 }
 0x11f   : > { %v5269_v58 = vadd.f32 %v3804_v57, %v3803_v54  ;;  %v4690_v57 = vld [vmem:[%s4853_s11 + $0x188] ss:$12 sps:$4 sm:$0xff]  }
 0x120   : > { %2554 = vmatmul.mubr.bf16.gmra.mrb[120].mxu0 %v5084_v19  ;;  %4295 = vmatmul.mubr.bf16.gmra.mrb[88].mxu1 %v4679_v52 }
 0x121   : > { %2561 = vmatprep.mubr.bf16.mxu0 %v5087_v20  ;;  %4298 = vmatprep.mubr.bf16.mxu1 %v4680_v56  ;;  %v4688_v56 = vld [vmem:[%s4853_s11 + $0x19c] ss:$12 sps:$4 sm:$0xff]  }
 0x123   : > { %v3806_v17 = vpop.f32.mrb[16].mxu0  ;;  %v3918_v18 = vpop.f32.mrb[16].mxu1 }
 0x124   : > { %v3807_v59 = vpop.f32.mrb[17].mxu0  ;;  %v3919_v62 = vpop.f32.mrb[17].mxu1 }
 0x125   : > { %v5274_v31 = vadd.f32 %v3807_v59, %v3806_v17  ;;  %v3809_v2 = vpop.f32.mrb[18].mxu0  ;;  %v5276_v4 = vadd.f32 %v3919_v62, %v3918_v18  ;;  %v3921_v34 = vpop.f32.mrb[18].mxu1 }
 0x126   : > { %v3810_v5 = vpop.f32.mrb[19].mxu0  ;;  %v3922_v7 = vpop.f32.mrb[19].mxu1 }
 0x127   : > { %v5279_v19 = vadd.f32 %v3810_v5, %v3809_v2  ;;  %v5281_v20 = vadd.f32 %v3922_v7, %v3921_v34  ;;  %v4691_v34 = vld [vmem:[%s4853_s11 + $0x198] ss:$12 sps:$4 sm:$0xff]  }
 0x128   : > { %2562 = vmatmul.mubr.bf16.gmra.mrb[124].mxu0 %v5094_v21  ;;  %4299 = vmatmul.mubr.bf16.gmra.mrb[92].mxu1 %v4681_v63 }
 0x129   : > { %2569 = vmatprep.mubr.bf16.mxu0 %v5097_v22  ;;  %4302 = vmatprep.mubr.bf16.mxu1 %v4682_v39  ;;  %v4692_v39 = vld [vmem:[%s4853_s11 + $0x1a0] ss:$12 sps:$4 sm:$0xff]  }
 0x12b   : > { %v3812_v8 = vpop.f32.mrb[20].mxu0  ;;  %v3924_v42 = vpop.f32.mrb[20].mxu1 }
 0x12c   : > { %v3813_v47 = vpop.f32.mrb[21].mxu0  ;;  %v3925_v11 = vpop.f32.mrb[21].mxu1 }
 0x12d   : > { %v5286_v55 = vadd.f32 %v3813_v47, %v3812_v8  ;;  %v3815_v16 = vpop.f32.mrb[22].mxu0  ;;  %v5288_v28 = vadd.f32 %v3925_v11, %v3924_v42  ;;  %v3927_v29 = vpop.f32.mrb[22].mxu1 }
 0x12e   : > { %v3816_v61 = vpop.f32.mrb[23].mxu0  ;;  %v3928_v0 = vpop.f32.mrb[23].mxu1 }
 0x12f   : > { %v5291_v21 = vadd.f32 %v3816_v61, %v3815_v16  ;;  %v5293_v22 = vadd.f32 %v3928_v0, %v3927_v29 }
 0x130   : > { %2570 = vmatmul.mubr.bf16.gmra.mrb[128].mxu0 %v5104_v23  ;;  %4303 = vmatmul.mubr.bf16.gmra.mrb[0].mxu1 %v4683_v51 }
 0x131   : > { %2577 = vmatprep.mubr.bf16.mxu0 %v5107_v24  ;;  %4306 = vmatprep.mubr.bf16.mxu1 %v4684_v60 }
 0x133   : > { %v3818_v1 = vpop.f32.mrb[24].mxu0  ;;  %v3930_v30 = vpop.f32.mrb[24].mxu1 }
 0x134   : > { %v3819_v33 = vpop.f32.mrb[25].mxu0  ;;  %v3931_v3 = vpop.f32.mrb[25].mxu1 }
 0x135   : > { %v5298_v6 = vadd.f32 %v3819_v33, %v3818_v1  ;;  %v3821_v9 = vpop.f32.mrb[26].mxu0  ;;  %v5300_v10 = vadd.f32 %v3931_v3, %v3930_v30  ;;  %v3933_v38 = vpop.f32.mrb[26].mxu1 }
 0x136   : > { %v3822_v41 = vpop.f32.mrb[27].mxu0  ;;  %v3934_v12 = vpop.f32.mrb[27].mxu1 }
 0x137   : > { %v5303_v23 = vadd.f32 %v3822_v41, %v3821_v9  ;;  %v5305_v24 = vadd.f32 %v3934_v12, %v3933_v38 }
 0x138   : > { %2578 = vmatmul.mubr.bf16.gmra.mrb[132].mxu0 %v5114_v25  ;;  %4307 = vmatmul.mubr.bf16.gmra.mrb[4].mxu1 %v4685_v35 }
 0x139   : > { %2585 = vmatprep.mubr.bf16.mxu0 %v5117_v26  ;;  %4310 = vmatprep.mubr.bf16.mxu1 %v4686_v40 }
 0x13b   : > { %v3824_v13 = vpop.f32.mrb[28].mxu0  ;;  %v3936_v44 = vpop.f32.mrb[28].mxu1 }
 0x13c   : > { %v3825_v46 = vpop.f32.mrb[29].mxu0  ;;  %v3937_v48 = vpop.f32.mrb[29].mxu1 }
 0x13d   : > { %v5310_v14 = vadd.f32 %v3825_v46, %v3824_v13  ;;  %v3827_v15 = vpop.f32.mrb[30].mxu0  ;;  %v5312_v52 = vadd.f32 %v3937_v48, %v3936_v44  ;;  %v3939_v54 = vpop.f32.mrb[30].mxu1 }
 0x13e   : > { %v3828_v25 = vpop.f32.mrb[31].mxu0  ;;  %v3940_v17 = vpop.f32.mrb[31].mxu1 }
 0x13f   : > { %v5316_v18 = vadd.f32 %v3828_v25, %v3827_v15  ;;  %v5318_v26 = vadd.f32 %v3940_v17, %v3939_v54 }
 0x140   : > { %2586 = vmatmul.mubr.bf16.gmra.mrb[136].mxu0 %v5124_v27  ;;  %4311 = vmatmul.mubr.bf16.gmra.mrb[8].mxu1 %v4687_v49 }
 0x141   : > { %2593 = vmatprep.mubr.bf16.mxu0 %v4688_v56  ;;  %4314 = vmatprep.mubr.bf16.mxu1 %v4690_v57 }
 0x143   : > { %v3830_v59 = vpop.f32.mrb[32].mxu0  ;;  %v3942_v62 = vpop.f32.mrb[32].mxu1 }
 0x144   : > { %v3831_v63 = vpop.f32.mrb[33].mxu0  ;;  %v3943_v2 = vpop.f32.mrb[33].mxu1 }
 0x145   : > { %v3832_v5 = vadd.f32 %v3831_v63, %v3830_v59  ;;  %v3833_v7 = vpop.f32.mrb[34].mxu0  ;;  %v5323_v8 = vadd.f32 %v3943_v2, %v3942_v62  ;;  %v3945_v42 = vpop.f32.mrb[34].mxu1 }
 0x146   : > { %v3834_v47 = vpop.f32.mrb[35].mxu0  ;;  %v3946_v11 = vpop.f32.mrb[35].mxu1 }
 0x147   : > { %v3835_v51 = vadd.f32 %v3834_v47, %v3833_v7  ;;  %v5325_v16 = vadd.f32 %v3946_v11, %v3945_v42 }
 0x148   : > { %2594 = vmatmul.mubr.bf16.gmra.mrb[140].mxu0 %v4691_v34  ;;  %4315 = vmatmul.mubr.bf16.gmra.mrb[12].mxu1 %v4692_v39 }
 0x14b   : > { %v3836_v27 = vpop.f32.mrb[36].mxu0  ;;  %v3948_v29 = vpop.f32.mrb[36].mxu1 }
 0x14c   : > { %v3837_v60 = vpop.f32.mrb[37].mxu0  ;;  %v3949_v61 = vpop.f32.mrb[37].mxu1 }
 0x14d   : > { %v3838_v0 = vadd.f32 %v3837_v60, %v3836_v27  ;;  %v3839_v1 = vpop.f32.mrb[38].mxu0  ;;  %v5327_v30 = vadd.f32 %v3949_v61, %v3948_v29  ;;  %v3951_v33 = vpop.f32.mrb[38].mxu1 }
 0x14e   : > { %v3840_v3 = vpop.f32.mrb[39].mxu0  ;;  %v3952_v35 = vpop.f32.mrb[39].mxu1 }
 0x14f   : > { %v3841_v9 = vadd.f32 %v3840_v3, %v3839_v1  ;;  %v5329_v38 = vadd.f32 %v3952_v35, %v3951_v33 }
 0x153   : > { %v3842_v40 = vpop.f32.mrb[40].mxu0  ;;  %v3954_v41 = vpop.f32.mrb[40].mxu1 }
 0x154   : > { %v3843_v12 = vpop.f32.mrb[41].mxu0  ;;  %v3955_v13 = vpop.f32.mrb[41].mxu1 }
 0x155   : > { %v3844_v44 = vadd.f32 %v3843_v12, %v3842_v40  ;;  %v3845_v46 = vpop.f32.mrb[42].mxu0  ;;  %v5331_v48 = vadd.f32 %v3955_v13, %v3954_v41  ;;  %v3957_v49 = vpop.f32.mrb[42].mxu1 }
 0x156   : > { %v3846_v15 = vpop.f32.mrb[43].mxu0  ;;  %v3958_v54 = vpop.f32.mrb[43].mxu1 }
 0x157   : > { %v3847_v56 = vadd.f32 %v3846_v15, %v3845_v46  ;;  %v5333_v57 = vadd.f32 %v3958_v54, %v3957_v49 }
 0x15b   : > { %v3848_v25 = vpop.f32.mrb[44].mxu0  ;;  %v3960_v17 = vpop.f32.mrb[44].mxu1 }
 0x15c   : > { %v3849_v59 = vpop.f32.mrb[45].mxu0  ;;  %v3961_v62 = vpop.f32.mrb[45].mxu1 }
 0x15d   : > { %v3850_v63 = vadd.f32 %v3849_v59, %v3848_v25  ;;  %v3851_v2 = vpop.f32.mrb[46].mxu0  ;;  %v5335_v34 = vadd.f32 %v3961_v62, %v3960_v17  ;;  %v3963_v39 = vpop.f32.mrb[46].mxu1 }
 0x15e   : > { %v3852_v7 = vpop.f32.mrb[47].mxu0  ;;  %v3964_v42 = vpop.f32.mrb[47].mxu1 }
 0x15f   : > { %v3853_v47 = vadd.f32 %v3852_v7, %v3851_v2  ;;  %v5337_v11 = vadd.f32 %v3964_v42, %v3963_v39 }
 0x163   : > { %v3854_v27 = vpop.f32.mrb[48].mxu0  ;;  %v3966_v29 = vpop.f32.mrb[48].mxu1 }
 0x164   : > { %v3855_v60 = vpop.f32.mrb[49].mxu0  ;;  %v3967_v61 = vpop.f32.mrb[49].mxu1 }
 0x165   : > { %v5339_v1 = vadd.f32 %v3855_v60, %v3854_v27  ;;  %v3968_v33 = vadd.f32 %v3967_v61, %v3966_v29  ;;  %v3857_v3 = vpop.f32.mrb[50].mxu0  ;;  %v3969_v35 = vpop.f32.mrb[50].mxu1 }
 0x166   : > { %v3858_v40 = vpop.f32.mrb[51].mxu0  ;;  %v3970_v41 = vpop.f32.mrb[51].mxu1 }
 0x167   : > { %v5341_v12 = vadd.f32 %v3968_v33, %v3832_v5  ;;  %v5343_v13 = vadd.f32 %v3858_v40, %v3857_v3  ;;  %v3971_v46 = vadd.f32 %v3970_v41, %v3969_v35 }
 0x169   : > { %v5345_v49 = vadd.f32 %v3971_v46, %v3835_v51 }
 0x16b   : > { %v3860_v15 = vpop.f32.mrb[52].mxu0  ;;  %v3972_v54 = vpop.f32.mrb[52].mxu1 }
 0x16c   : > { %v3861_v25 = vpop.f32.mrb[53].mxu0  ;;  %v3973_v17 = vpop.f32.mrb[53].mxu1 }
 0x16d   : > { %v5347_v59 = vadd.f32 %v3861_v25, %v3860_v15  ;;  %v3974_v62 = vadd.f32 %v3973_v17, %v3972_v54  ;;  %v3863_v2 = vpop.f32.mrb[54].mxu0  ;;  %v3975_v39 = vpop.f32.mrb[54].mxu1 }
 0x16e   : > { %v3864_v7 = vpop.f32.mrb[55].mxu0  ;;  %v3976_v42 = vpop.f32.mrb[55].mxu1 }
 0x16f   : > { %v5349_v27 = vadd.f32 %v3974_v62, %v3838_v0  ;;  %v5351_v5 = vadd.f32 %v3864_v7, %v3863_v2  ;;  %v3977_v29 = vadd.f32 %v3976_v42, %v3975_v39 }
 0x171   : > { %v5353_v60 = vadd.f32 %v3977_v29, %v3841_v9 }
 0x173   : > { %5614 = vst [vmem:[#allocation2_spill] sm:$0xff] %v5353_v60  ;;  %v3866_v51 = vpop.f32.mrb[56].mxu0  ;;  %v3978_v61 = vpop.f32.mrb[56].mxu1 }
 0x174   : > { %v3867_v33 = vpop.f32.mrb[57].mxu0  ;;  %v3979_v3 = vpop.f32.mrb[57].mxu1 }
 0x175   : > { %v5355_v35 = vadd.f32 %v3867_v33, %v3866_v51  ;;  %v3980_v40 = vadd.f32 %v3979_v3, %v3978_v61  ;;  %v3869_v41 = vpop.f32.mrb[58].mxu0  ;;  %v3981_v46 = vpop.f32.mrb[58].mxu1 }
 0x176   : > { %v3870_v15 = vpop.f32.mrb[59].mxu0  ;;  %v3982_v54 = vpop.f32.mrb[59].mxu1 }
 0x177   : > { %v5357_v25 = vadd.f32 %v3980_v40, %v3844_v44  ;;  %v5359_v0 = vadd.f32 %v3870_v15, %v3869_v41  ;;  %v3983_v17 = vadd.f32 %v3982_v54, %v3981_v46 }
 0x179   : > { %v5361_v62 = vadd.f32 %v3983_v17, %v3847_v56 }
 0x17b   : > { %5615 = vst [vmem:[#allocation3_spill] sm:$0xff] %v5361_v62  ;;  %v3872_v9 = vpop.f32.mrb[60].mxu0  ;;  %v3984_v2 = vpop.f32.mrb[60].mxu1 }
 0x17c   : > { %v3873_v39 = vpop.f32.mrb[61].mxu0  ;;  %v3985_v7 = vpop.f32.mrb[61].mxu1 }
 0x17d   : > { %v5363_v42 = vadd.f32 %v3873_v39, %v3872_v9  ;;  %v3986_v29 = vadd.f32 %v3985_v7, %v3984_v2  ;;  %v3875_v51 = vpop.f32.mrb[62].mxu0  ;;  %v3987_v61 = vpop.f32.mrb[62].mxu1 }
 0x17e   : > { %v3876_v33 = vpop.f32.mrb[63].mxu0  ;;  %v3988_v3 = vpop.f32.mrb[63].mxu1 }
 0x17f   : > { %v5365_v60 = vadd.f32 %v3986_v29, %v3850_v63  ;;  %v5367_v44 = vadd.f32 %v3876_v33, %v3875_v51  ;;  %v3989_v40 = vadd.f32 %v3988_v3, %v3987_v61 }
 0x181   : > { %v5369_v41 = vadd.f32 %v3989_v40, %v3853_v47 }
 0x183   : > { %v4192_v56 = vpop.f32.mrb[64].mxu0  ;;  %v3990_v46 = vpop.f32.mrb[64].mxu1 }
 0x184   : > { %v1082_v15 = vadd.f32 %v4192_v56, %v5250_v37  ;;  %v1073_v54 = vpop.f32.mrb[65].mxu0  ;;  %v3991_v17 = vpop.f32.mrb[65].mxu1 }
 0x185   : > { %v1074_v9 = vadd.f32 %v5242_v32, %v1073_v54  ;;  %v3992_v2 = vadd.f32 %v3991_v17, %v3990_v46  ;;  %v4193_v39 = vpop.f32.mrb[66].mxu0  ;;  %v3993_v7 = vpop.f32.mrb[66].mxu1 }
 0x186   : > { %v5374_v62 = vadd.f32 %v5288_v28, %v1082_v15  ;;  %v1085_v63 = vadd.f32 %v4193_v39, %v5253_v43  ;;  %v1076_v29 = vpop.f32.mrb[67].mxu0  ;;  %v3994_v51 = vpop.f32.mrb[67].mxu1 }
 0x187   : > { %v5378_v47 = vadd.f32 %v5276_v4, %v1074_v9  ;;  %v5381_v61 = vadd.f32 %v3992_v2, %v5339_v1  ;;  %v1077_v37 = vadd.f32 %v5245_v36, %v1076_v29  ;;  %v3995_v33 = vadd.f32 %v3994_v51, %v3993_v7 }
 0x188   : > { %v5385_v32 = vadd.f32 %v5293_v22, %v1085_v63 }
 0x189   : > { %v5388_v3 = vadd.f32 %v5281_v20, %v1077_v37  ;;  %v5391_v28 = vadd.f32 %v3995_v33, %v5343_v13 }
 0x18b   : > { %v4196_v43 = vpop.f32.mrb[68].mxu0  ;;  %v3996_v40 = vpop.f32.mrb[68].mxu1 }
 0x18c   : > { %v1098_v4 = vadd.f32 %v4196_v43, %v5266_v53  ;;  %v1089_v56 = vpop.f32.mrb[69].mxu0  ;;  %v3997_v46 = vpop.f32.mrb[69].mxu1 }
 0x18d   : > { %v1090_v1 = vadd.f32 %v5258_v45, %v1089_v56  ;;  %v3998_v15 = vadd.f32 %v3997_v46, %v3996_v40  ;;  %v4197_v36 = vpop.f32.mrb[70].mxu0  ;;  %v3999_v54 = vpop.f32.mrb[70].mxu1 }
 0x18e   : > { %v5396_v22 = vadd.f32 %v5312_v52, %v1098_v4  ;;  %v1101_v20 = vadd.f32 %v4197_v36, %v5269_v58  ;;  %v1092_v17 = vpop.f32.mrb[71].mxu0  ;;  %v4000_v9 = vpop.f32.mrb[71].mxu1 }
 0x18f   : > { %v5400_v13 = vadd.f32 %v5300_v10, %v1090_v1  ;;  %v5403_v2 = vadd.f32 %v3998_v15, %v5347_v59  ;;  %v1093_v53 = vadd.f32 %v5261_v50, %v1092_v17  ;;  %v4001_v39 = vadd.f32 %v4000_v9, %v3999_v54 }
 0x190   : > { %v5407_v45 = vadd.f32 %v5318_v26, %v1101_v20 }
 0x191   : > { %v5410_v7 = vadd.f32 %v5305_v24, %v1093_v53  ;;  %v5413_v52 = vadd.f32 %v4001_v39, %v5351_v5 }
 0x193   : > { %v4200_v58 = vpop.f32.mrb[72].mxu0  ;;  %v4002_v63 = vpop.f32.mrb[72].mxu1 }
 0x194   : > { %v1114_v10 = vadd.f32 %v4200_v58, %v5286_v55  ;;  %v1105_v29 = vpop.f32.mrb[73].mxu0  ;;  %v4003_v51 = vpop.f32.mrb[73].mxu1 }
 0x195   : > { %v1106_v59 = vadd.f32 %v5274_v31, %v1105_v29  ;;  %v4004_v37 = vadd.f32 %v4003_v51, %v4002_v63  ;;  %v4201_v50 = vpop.f32.mrb[74].mxu0  ;;  %v4005_v33 = vpop.f32.mrb[74].mxu1 }
 0x196   : > { %v5418_v26 = vadd.f32 %v5327_v30, %v1114_v10  ;;  %v1117_v24 = vadd.f32 %v4201_v50, %v5291_v21  ;;  %v1108_v43 = vpop.f32.mrb[75].mxu0  ;;  %v4006_v40 = vpop.f32.mrb[75].mxu1 }
 0x197   : > { %v5422_v5 = vadd.f32 %v5323_v8, %v1106_v59  ;;  %v5425_v4 = vadd.f32 %v4004_v37, %v5355_v35  ;;  %v1109_v55 = vadd.f32 %v5279_v19, %v1108_v43  ;;  %v4007_v56 = vadd.f32 %v4006_v40, %v4005_v33 }
 0x198   : > { %v5429_v31 = vadd.f32 %v5329_v38, %v1117_v24 }
 0x199   : > { %v1670_v46 = vadd.f32 %v5325_v16, %v1109_v55  ;;  %v5433_v30 = vadd.f32 %v4007_v56, %v5359_v0 }
 0x19b   : > { %v4204_v21 = vpop.f32.mrb[76].mxu0  ;;  %v4008_v1 = vpop.f32.mrb[76].mxu1 }
 0x19c   : > { %v1130_v15 = vadd.f32 %v4204_v21, %v5310_v14  ;;  %v1121_v8 = vpop.f32.mrb[77].mxu0  ;;  %v4009_v36 = vpop.f32.mrb[77].mxu1 }
 0x19d   : > { %v1122_v35 = vadd.f32 %v5298_v6, %v1121_v8  ;;  %v4010_v54 = vadd.f32 %v4009_v36, %v4008_v1  ;;  %v4205_v20 = vpop.f32.mrb[78].mxu0  ;;  %v4011_v19 = vpop.f32.mrb[78].mxu1 }
 0x19e   : > { %v5438_v17 = vadd.f32 %v5335_v34, %v1130_v15  ;;  %v1133_v38 = vadd.f32 %v4205_v20, %v5316_v18  ;;  %v1124_v16 = vpop.f32.mrb[79].mxu0  ;;  %v4012_v9 = vpop.f32.mrb[79].mxu1 }
 0x19f   : > { %v1683_v0 = vadd.f32 %v5331_v48, %v1122_v35  ;;  %v5443_v53 = vadd.f32 %v4010_v54, %v5363_v42  ;;  %v1125_v14 = vadd.f32 %v5303_v23, %v1124_v16  ;;  %v4013_v39 = vadd.f32 %v4012_v9, %v4011_v19 }
 0x1a0   : > { %v5447_v6 = vadd.f32 %v5337_v11, %v1133_v38 }
 0x1a1   : > { %v1686_v58 = vadd.f32 %v5333_v57, %v1125_v14  ;;  %v5451_v34 = vadd.f32 %v4013_v39, %v5367_v44 }
 0x1a3   : > { %v4054_v63 = vpop.f32.mrb[80].mxu0 }
 0x1a4   : > { %v4055_v18 = vpop.f32.mrb[81].mxu0 }
 0x1a5   : > { %v4056_v10 = vadd.f32 %v4055_v18, %v4054_v63  ;;  %v4057_v29 = vpop.f32.mrb[82].mxu0 }
 0x1a6   : > { %v4058_v51 = vpop.f32.mrb[83].mxu0 }
 0x1a7   : > { %v4059_v48 = vadd.f32 %v4058_v51, %v4057_v29  ;;  %v5454_v42 = vadd.f32 %v4056_v10, %v5378_v47 }
 0x1a9   : > { %v5457_v23 = vadd.f32 %v4059_v48, %v5388_v3 }
 0x1ab   : > { %v4060_v59 = vpop.f32.mrb[84].mxu0 }
 0x1ac   : > { %v4061_v11 = vpop.f32.mrb[85].mxu0 }
 0x1ad   : > { %v4062_v37 = vadd.f32 %v4061_v11, %v4060_v59  ;;  %v4063_v50 = vpop.f32.mrb[86].mxu0 }
 0x1ae   : > { %v4064_v57 = vpop.f32.mrb[87].mxu0 }
 0x1af   : > { %v4065_v33 = vadd.f32 %v4064_v57, %v4063_v50  ;;  %v4336_v44 = vadd.f32 %v4062_v37, %v5374_v62 }
 0x1b1   : > { %v4344_v24 = vadd.f32 %v4065_v33, %v5385_v32 }
 0x1b3   : > { %v4066_v43 = vpop.f32.mrb[88].mxu0 }
 0x1b4   : > { %v4067_v40 = vpop.f32.mrb[89].mxu0 }
 0x1b5   : > { %v4068_v55 = vadd.f32 %v4067_v40, %v4066_v43  ;;  %v4069_v56 = vpop.f32.mrb[90].mxu0 }
 0x1b6   : > { %v4070_v21 = vpop.f32.mrb[91].mxu0 }
 0x1b7   : > { %v4071_v47 = vadd.f32 %v4070_v21, %v4069_v56  ;;  %v5462_v1 = vadd.f32 %v4068_v55, %v5400_v13 }
 0x1b9   : > { %v5465_v3 = vadd.f32 %v4071_v47, %v5410_v7 }
 0x1bb   : > { %v4072_v15 = vpop.f32.mrb[92].mxu0 }
 0x1bc   : > { %v4073_v8 = vpop.f32.mrb[93].mxu0 }
 0x1bd   : > { %v4074_v36 = vadd.f32 %v4073_v8, %v4072_v15  ;;  %v4075_v35 = vpop.f32.mrb[94].mxu0 }
 0x1be   : > { %v4076_v54 = vpop.f32.mrb[95].mxu0 }
 0x1bf   : > { %v4077_v62 = vadd.f32 %v4076_v54, %v4075_v35  ;;  %v5468_v32 = vadd.f32 %v4074_v36, %v5396_v22 }
 0x1c1   : > { %v5471_v20 = vadd.f32 %v4077_v62, %v5407_v45 }
 0x1c3   : > { %v4078_v19 = vpop.f32.mrb[96].mxu0 }
 0x1c4   : > { %v4079_v38 = vpop.f32.mrb[97].mxu0 }
 0x1c5   : > { %v4080_v16 = vadd.f32 %v4079_v38, %v4078_v19  ;;  %v4081_v13 = vpop.f32.mrb[98].mxu0 }
 0x1c6   : > { %v4082_v9 = vpop.f32.mrb[99].mxu0 }
 0x1c7   : > { %v4083_v14 = vadd.f32 %v4082_v9, %v4081_v13  ;;  %v5474_v7 = vadd.f32 %v4080_v16, %v5422_v5 }
 0x1c9   : > { %v5476_v39 = vadd.f32 %v4083_v14, %v1670_v46 }
 0x1cb   : > { %v4084_v63 = vpop.f32.mrb[100].mxu0 }
 0x1cc   : > { %v4085_v18 = vpop.f32.mrb[101].mxu0 }
 0x1cd   : > { %v4086_v10 = vadd.f32 %v4085_v18, %v4084_v63  ;;  %v4087_v29 = vpop.f32.mrb[102].mxu0 }
 0x1ce   : > { %v4088_v22 = vpop.f32.mrb[103].mxu0 }
 0x1cf   : > { %v4089_v51 = vadd.f32 %v4088_v22, %v4087_v29  ;;  %v5479_v45 = vadd.f32 %v4086_v10, %v5418_v26 }
 0x1d1   : > { %v5482_v48 = vadd.f32 %v4089_v51, %v5429_v31 }
 0x1d3   : > { %v4090_v59 = vpop.f32.mrb[104].mxu0 }
 0x1d4   : > { %v4091_v11 = vpop.f32.mrb[105].mxu0 }
 0x1d5   : > { %v4092_v37 = vadd.f32 %v4091_v11, %v4090_v59  ;;  %v4093_v50 = vpop.f32.mrb[106].mxu0 }
 0x1d6   : > { %v4094_v5 = vpop.f32.mrb[107].mxu0 }
 0x1d7   : > { %v4095_v57 = vadd.f32 %v4094_v5, %v4093_v50  ;;  %v5484_v46 = vadd.f32 %v4092_v37, %v1683_v0  ;;  %v5497_v0 = vld [vmem:[%s5612_s2] ss:$0 sm:$0xff] }
 0x1d9   : > { %v5486_v33 = vadd.f32 %v4095_v57, %v1686_v58 }
 0x1db   : > { %v4096_v43 = vpop.f32.mrb[108].mxu0 }
 0x1dc   : > { %v4097_v40 = vpop.f32.mrb[109].mxu0 }
 0x1dd   : > { %v4098_v55 = vadd.f32 %v4097_v40, %v4096_v43  ;;  %v4099_v56 = vpop.f32.mrb[110].mxu0 }
 0x1de   : > { %v4100_v21 = vpop.f32.mrb[111].mxu0 }
 0x1df   : > { %v4101_v26 = vadd.f32 %v4100_v21, %v4099_v56  ;;  %v5489_v47 = vadd.f32 %v4098_v55, %v5438_v17 }
 0x1e1   : > { %v5492_v31 = vadd.f32 %v4101_v26, %v5447_v6 }
 0x1e3   : > { %v4102_v15 = vpop.f32.mrb[112].mxu0  ;;  %v4288_v8 = vpop.f32.mrb[80].mxu1 }
 0x1e4   : > { %v4337_v58 = vadd.f32 %v4336_v44, %v4288_v8  ;;  %v4103_v36 = vpop.f32.mrb[113].mxu0  ;;  %v2636_v35 = vpop.f32.mrb[81].mxu1 }
 0x1e5   : > { %v4104_v54 = vadd.f32 %v4103_v36, %v4102_v15  ;;  %v4341_v62 = vadd.f32 %v5454_v42, %v2636_v35  ;;  %v4105_v19 = vpop.f32.mrb[114].mxu0  ;;  %v4289_v17 = vpop.f32.mrb[82].mxu1  ;;  %v5616_v35 = vld [vmem:[#allocation2_spill] sm:$0xff] }
 0x1e6   : > { %v2804_v38 = vadd.f32 %v4337_v58, %v5497_v0  ;;  %v4345_v6 = vadd.f32 %v4344_v24, %v4289_v17  ;;  %v4106_v16 = vpop.f32.mrb[115].mxu0  ;;  %v2639_v13 = vpop.f32.mrb[83].mxu1 }
 0x1e7   : > { %v2802_v9 = vadd.f32 %v4341_v62, %v5497_v0  ;;  %v4107_v14 = vadd.f32 %v4106_v16, %v4105_v19  ;;  %v4349_v63 = vadd.f32 %v5457_v23, %v2639_v13  ;;  %v5504_v18 = vadd.f32 %v5341_v12, %v4104_v54 }
 0x1e8   : > { %v2805_v44 = vadd.f32 %v4345_v6, %v5497_v0  ;;  %v2836_v29 = vmax.f32 %v2804_v38, 0.0 }
 0x1e9   : > { %v2803_v42 = vadd.f32 %v4349_v63, %v5497_v0  ;;  %v5510_v10 = vadd.f32 %v5345_v49, %v4107_v14  ;;  %v2834_v22 = vmax.f32 %v2802_v9, 0.0 }
 0x1ea   : > { %v2837_v24 = vmax.f32 %v2805_v44, 0.0 }
 0x1eb   : > { %v2835_v23 = vmax.f32 %v2803_v42, 0.0  ;;  %v4108_v12 = vpop.f32.mrb[116].mxu0  ;;  %v4292_v51 = vpop.f32.mrb[84].mxu1 }
 0x1ec   : > { %v3679_v59 = vpack.c.bf16 %v2837_v24, %v2836_v29  ;;  %v4353_v11 = vadd.f32 %v5468_v32, %v4292_v51  ;;  %v4109_v37 = vpop.f32.mrb[117].mxu0  ;;  %v2652_v50 = vpop.f32.mrb[85].mxu1 }
 0x1ed   : > { %v3674_v49 = vpack.c.bf16 %v2835_v23, %v2834_v22  ;;  %v4110_v5 = vadd.f32 %v4109_v37, %v4108_v12  ;;  %v4357_v57 = vadd.f32 %v5462_v1, %v2652_v50  ;;  %v4111_v43 = vpop.f32.mrb[118].mxu0  ;;  %v4293_v40 = vpop.f32.mrb[86].mxu1  ;;  %v5617_v37 = vld [vmem:[#allocation3_spill] sm:$0xff] }
 0x1ee   : > { %3751 = vst [vmem:[%s5515_s7 + $0x8] sm:$0xff] %v3679_v59   ;;  %v2808_v55 = vadd.f32 %v4353_v11, %v5497_v0  ;;  %v4361_v56 = vadd.f32 %v5471_v20, %v4293_v40  ;;  %v4112_v21 = vpop.f32.mrb[119].mxu0  ;;  %v2655_v26 = vpop.f32.mrb[87].mxu1 }
 0x1ef   : > { %3675 = vst [vmem:[%s5515_s7] sm:$0xff] %v3674_v49   ;;  %v2806_v15 = vadd.f32 %v4357_v57, %v5497_v0  ;;  %v4113_v8 = vadd.f32 %v4112_v21, %v4111_v43  ;;  %v4365_v32 = vadd.f32 %v5465_v3, %v2655_v26  ;;  %v5526_v58 = vadd.f32 %v5349_v27, %v4110_v5 }
 0x1f0   : > { %v2809_v1 = vadd.f32 %v4361_v56, %v5497_v0  ;;  %v2840_v20 = vmax.f32 %v2808_v55, 0.0 }
 0x1f1   : > { %v2807_v36 = vadd.f32 %v4365_v32, %v5497_v0  ;;  %v5531_v54 = vadd.f32 %v5616_v35, %v4113_v8  ;;  %v2838_v19 = vmax.f32 %v2806_v15, 0.0 }
 0x1f2   : > { %v2841_v62 = vmax.f32 %v2809_v1, 0.0 }
 0x1f3   : > { %v2839_v17 = vmax.f32 %v2807_v36, 0.0  ;;  %v4114_v38 = vpop.f32.mrb[120].mxu0  ;;  %v4296_v6 = vpop.f32.mrb[88].mxu1 }
 0x1f4   : > { %v3689_v16 = vpack.c.bf16 %v2841_v62, %v2840_v20  ;;  %v4369_v3 = vadd.f32 %v5479_v45, %v4296_v6  ;;  %v4115_v27 = vpop.f32.mrb[121].mxu0  ;;  %v2668_v13 = vpop.f32.mrb[89].mxu1 }
 0x1f5   : > { %v3684_v9 = vpack.c.bf16 %v2839_v17, %v2838_v19  ;;  %v4116_v14 = vadd.f32 %v4115_v27, %v4114_v38  ;;  %v4373_v63 = vadd.f32 %v5474_v7, %v2668_v13  ;;  %v4117_v44 = vpop.f32.mrb[122].mxu0  ;;  %v4297_v42 = vpop.f32.mrb[90].mxu1 }
 0x1f6   : > { %3753 = vst [vmem:[%s5515_s7 + $0x18] sm:$0xff] %v3689_v16   ;;  %v2812_v29 = vadd.f32 %v4369_v3, %v5497_v0  ;;  %v4377_v24 = vadd.f32 %v5482_v48, %v4297_v42  ;;  %v4118_v22 = vpop.f32.mrb[123].mxu0  ;;  %v2671_v23 = vpop.f32.mrb[91].mxu1 }
 0x1f7   : > { %3752 = vst [vmem:[%s5515_s7 + $0x10] sm:$0xff] %v3684_v9   ;;  %v2810_v12 = vadd.f32 %v4373_v63, %v5497_v0  ;;  %v4119_v51 = vadd.f32 %v4118_v22, %v4117_v44  ;;  %v4381_v45 = vadd.f32 %v5476_v39, %v2671_v23  ;;  %v5542_v59 = vadd.f32 %v5357_v25, %v4116_v14 }
 0x1f8   : > { %v2813_v7 = vadd.f32 %v4377_v24, %v5497_v0  ;;  %v2844_v48 = vmax.f32 %v2812_v29, 0.0 }
 0x1f9   : > { %v2811_v11 = vadd.f32 %v4381_v45, %v5497_v0  ;;  %v5547_v50 = vadd.f32 %v5617_v37, %v4119_v51  ;;  %v2842_v5 = vmax.f32 %v2810_v12, 0.0 }
 0x1fa   : > { %v2845_v49 = vmax.f32 %v2813_v7, 0.0 }
 0x1fb   : > { %v2843_v57 = vmax.f32 %v2811_v11, 0.0  ;;  %v4120_v43 = vpop.f32.mrb[124].mxu0  ;;  %v4300_v40 = vpop.f32.mrb[92].mxu1 }
 0x1fc   : > { %v3699_v55 = vpack.c.bf16 %v2845_v49, %v2844_v48  ;;  %v4385_v39 = vadd.f32 %v5489_v47, %v4300_v40  ;;  %v4121_v25 = vpop.f32.mrb[125].mxu0  ;;  %v2684_v56 = vpop.f32.mrb[93].mxu1 }
 0x1fd   : > { %v3694_v21 = vpack.c.bf16 %v2843_v57, %v2842_v5  ;;  %v4122_v26 = vadd.f32 %v4121_v25, %v4120_v43  ;;  %v4389_v15 = vadd.f32 %v5484_v46, %v2684_v56  ;;  %v4123_v8 = vpop.f32.mrb[126].mxu0  ;;  %v4301_v32 = vpop.f32.mrb[94].mxu1 }
 0x1fe   : > { %3755 = vst [vmem:[%s5515_s7 + $0x28] sm:$0xff] %v3699_v55   ;;  %v2816_v1 = vadd.f32 %v4385_v39, %v5497_v0  ;;  %v4393_v36 = vadd.f32 %v5492_v31, %v4301_v32  ;;  %v4124_v35 = vpop.f32.mrb[127].mxu0  ;;  %v2687_v20 = vpop.f32.mrb[95].mxu1 }
 0x1ff   : > { %3754 = vst [vmem:[%s5515_s7 + $0x20] sm:$0xff] %v3694_v21   ;;  %v2814_v62 = vadd.f32 %v4389_v15, %v5497_v0  ;;  %v4125_v19 = vadd.f32 %v4124_v35, %v4123_v8  ;;  %v4397_v47 = vadd.f32 %v5486_v33, %v2687_v20  ;;  %v4411_v17 = vadd.f32 %v5365_v60, %v4122_v26 }
 0x200   : > { %v2817_v38 = vadd.f32 %v4393_v36, %v5497_v0  ;;  %v2848_v16 = vmax.f32 %v2816_v1, 0.0 }
 0x201   : > { %v2815_v46 = vadd.f32 %v4397_v47, %v5497_v0  ;;  %v4417_v6 = vadd.f32 %v5369_v41, %v4125_v19  ;;  %v2846_v31 = vmax.f32 %v2814_v62, 0.0 }
 0x202   : > { %v2849_v3 = vmax.f32 %v2817_v38, 0.0 }
 0x203   : > { %v2847_v27 = vmax.f32 %v2815_v46, 0.0  ;;  %v4126_v13 = vpop.f32.mrb[128].mxu0  ;;  %v4304_v9 = vpop.f32.mrb[0].mxu1 }
 0x204   : > { %v3709_v14 = vpack.c.bf16 %v2849_v3, %v2848_v16  ;;  %v4400_v63 = vadd.f32 %v5526_v58, %v4304_v9  ;;  %v4127_v33 = vpop.f32.mrb[129].mxu0  ;;  %v2700_v44 = vpop.f32.mrb[1].mxu1 }
 0x205   : > { %v3704_v60 = vpack.c.bf16 %v2847_v27, %v2846_v31  ;;  %v4128_v42 = vadd.f32 %v4127_v33, %v4126_v13  ;;  %v4403_v29 = vadd.f32 %v5504_v18, %v2700_v44  ;;  %v4129_v24 = vpop.f32.mrb[130].mxu0  ;;  %v4305_v22 = vpop.f32.mrb[2].mxu1 }
 0x206   : > { %3757 = vst [vmem:[%s5515_s7 + $0x38] sm:$0xff] %v3709_v14   ;;  %v2820_v41 = vadd.f32 %v4400_v63, %v5497_v0  ;;  %v4406_v23 = vadd.f32 %v5531_v54, %v4305_v22  ;;  %v4130_v12 = vpop.f32.mrb[131].mxu0  ;;  %v2703_v51 = vpop.f32.mrb[3].mxu1 }
 0x207   : > { %3756 = vst [vmem:[%s5515_s7 + $0x30] sm:$0xff] %v3704_v60   ;;  %v2818_v45 = vadd.f32 %v4403_v29, %v5497_v0  ;;  %v4131_v7 = vadd.f32 %v4130_v12, %v4129_v24  ;;  %v4409_v58 = vadd.f32 %v5510_v10, %v2703_v51  ;;  %v4426_v11 = vadd.f32 %v5381_v61, %v4128_v42 }
 0x208   : > { %v2821_v37 = vadd.f32 %v4406_v23, %v5497_v0  ;;  %v2852_v49 = vmax.f32 %v2820_v41, 0.0 }
 0x209   : > { %v2819_v18 = vadd.f32 %v4409_v58, %v5497_v0  ;;  %v4432_v48 = vadd.f32 %v5391_v28, %v4131_v7  ;;  %v2850_v54 = vmax.f32 %v2818_v45, 0.0 }
 0x20a   : > { %v2853_v5 = vmax.f32 %v2821_v37, 0.0 }
 0x20b   : > { %v2851_v57 = vmax.f32 %v2819_v18, 0.0  ;;  %v4132_v43 = vpop.f32.mrb[132].mxu0  ;;  %v4308_v40 = vpop.f32.mrb[4].mxu1 }
 0x20c   : > { %v3719_v55 = vpack.c.bf16 %v2853_v5, %v2852_v49  ;;  %v4412_v39 = vadd.f32 %v4411_v17, %v4308_v40  ;;  %v4133_v25 = vpop.f32.mrb[133].mxu0  ;;  %v2716_v10 = vpop.f32.mrb[5].mxu1 }
 0x20d   : > { %v3714_v56 = vpack.c.bf16 %v2851_v57, %v2850_v54  ;;  %v4134_v61 = vadd.f32 %v4133_v25, %v4132_v43  ;;  %v4415_v21 = vadd.f32 %v5542_v59, %v2716_v10  ;;  %v4135_v26 = vpop.f32.mrb[134].mxu0  ;;  %v4309_v15 = vpop.f32.mrb[6].mxu1 }
 0x20e   : > { %3759 = vst [vmem:[%s5515_s7 + $0x48] sm:$0xff] %v3719_v55   ;;  %v2824_v28 = vadd.f32 %v4412_v39, %v5497_v0  ;;  %v4418_v8 = vadd.f32 %v4417_v6, %v4309_v15  ;;  %v4136_v32 = vpop.f32.mrb[135].mxu0  ;;  %v2719_v1 = vpop.f32.mrb[7].mxu1 }
 0x20f   : > { %3758 = vst [vmem:[%s5515_s7 + $0x40] sm:$0xff] %v3714_v56   ;;  %v2822_v36 = vadd.f32 %v4415_v21, %v5497_v0  ;;  %v4137_v35 = vadd.f32 %v4136_v32, %v4135_v26  ;;  %v4421_v20 = vadd.f32 %v5547_v50, %v2719_v1  ;;  %v4423_v62 = vadd.f32 %v5403_v2, %v4134_v61 }
 0x210   : > { %v2825_v19 = vadd.f32 %v4418_v8, %v5497_v0  ;;  %v2856_v17 = vmax.f32 %v2824_v28, 0.0 }
 0x211   : > { %v2823_v59 = vadd.f32 %v4421_v20, %v5497_v0  ;;  %v4429_v47 = vadd.f32 %v5413_v52, %v4137_v35  ;;  %v2854_v46 = vmax.f32 %v2822_v36, 0.0 }
 0x212   : > { %v2857_v38 = vmax.f32 %v2825_v19, 0.0 }
 0x213   : > { %v2855_v6 = vmax.f32 %v2823_v59, 0.0  ;;  %v4138_v16 = vpop.f32.mrb[136].mxu0  ;;  %v4312_v3 = vpop.f32.mrb[8].mxu1 }
 0x214   : > { %v3729_v31 = vpack.c.bf16 %v2857_v38, %v2856_v17  ;;  %v4424_v27 = vadd.f32 %v4423_v62, %v4312_v3  ;;  %v4139_v13 = vpop.f32.mrb[137].mxu0  ;;  %v2732_v50 = vpop.f32.mrb[9].mxu1 }
 0x215   : > { %v3724_v9 = vpack.c.bf16 %v2855_v6, %v2854_v46  ;;  %v4140_v2 = vadd.f32 %v4139_v13, %v4138_v16  ;;  %v4427_v14 = vadd.f32 %v4426_v11, %v2732_v50  ;;  %v4141_v63 = vpop.f32.mrb[138].mxu0  ;;  %v4313_v33 = vpop.f32.mrb[10].mxu1 }
 0x216   : > { %3761 = vst [vmem:[%s5515_s7 + $0x58] sm:$0xff] %v3729_v31   ;;  %v2828_v52 = vadd.f32 %v4424_v27, %v5497_v0  ;;  %v4430_v44 = vadd.f32 %v4429_v47, %v4313_v33  ;;  %v4142_v60 = vpop.f32.mrb[139].mxu0  ;;  %v2735_v42 = vpop.f32.mrb[11].mxu1 }
 0x217   : > { %3760 = vst [vmem:[%s5515_s7 + $0x50] sm:$0xff] %v3724_v9   ;;  %v2826_v29 = vadd.f32 %v4427_v14, %v5497_v0  ;;  %v4143_v24 = vadd.f32 %v4142_v60, %v4141_v63  ;;  %v4433_v22 = vadd.f32 %v4432_v48, %v2735_v42  ;;  %v4438_v41 = vadd.f32 %v5425_v4, %v4140_v2 }
 0x218   : > { %v2829_v23 = vadd.f32 %v4430_v44, %v5497_v0  ;;  %v2860_v45 = vmax.f32 %v2828_v52, 0.0 }
 0x219   : > { %v2827_v12 = vadd.f32 %v4433_v22, %v5497_v0  ;;  %v4444_v51 = vadd.f32 %v5433_v30, %v4143_v24  ;;  %v2858_v58 = vmax.f32 %v2826_v29, 0.0 }
 0x21a   : > { %v2861_v7 = vmax.f32 %v2829_v23, 0.0 }
 0x21b   : > { %v2859_v11 = vmax.f32 %v2827_v12, 0.0  ;;  %v4144_v37 = vpop.f32.mrb[140].mxu0  ;;  %v4316_v18 = vpop.f32.mrb[12].mxu1 }
 0x21c   : > { %v3739_v49 = vpack.c.bf16 %v2861_v7, %v2860_v45  ;;  %v4145_v5 = vpop.f32.mrb[141].mxu0  ;;  %v2748_v54 = vpop.f32.mrb[13].mxu1 }
 0x21d   : > { %v3734_v48 = vpack.c.bf16 %v2859_v11, %v2858_v58  ;;  %v4146_v57 = vadd.f32 %v4145_v5, %v4144_v37  ;;  %v4439_v4 = vadd.f32 %v4438_v41, %v2748_v54  ;;  %v4147_v43 = vpop.f32.mrb[142].mxu0  ;;  %v4317_v40 = vpop.f32.mrb[14].mxu1 }
 0x21e   : > { %3763 = vst [vmem:[%s5515_s7 + $0x68] sm:$0xff] %v3739_v49   ;;  %v4148_v55 = vpop.f32.mrb[143].mxu0  ;;  %v2751_v39 = vpop.f32.mrb[15].mxu1 }
 0x21f   : > { %3762 = vst [vmem:[%s5515_s7 + $0x60] sm:$0xff] %v3734_v48   ;;  %v4435_v30 = vadd.f32 %v5443_v53, %v4146_v57  ;;  %v2830_v25 = vadd.f32 %v4439_v4, %v5497_v0  ;;  %v4149_v10 = vadd.f32 %v4148_v55, %v4147_v43  ;;  %v4445_v56 = vadd.f32 %v4444_v51, %v2751_v39 }
 0x221   : > { %v4436_v61 = vadd.f32 %v4435_v30, %v4316_v18  ;;  %v4441_v21 = vadd.f32 %v5451_v34, %v4149_v10  ;;  %v2831_v26 = vadd.f32 %v4445_v56, %v5497_v0  ;;  %v2862_v28 = vmax.f32 %v2830_v25, 0.0 }
 0x223   : > { %v2832_v15 = vadd.f32 %v4436_v61, %v5497_v0  ;;  %v4442_v8 = vadd.f32 %v4441_v21, %v4317_v40  ;;  %v2863_v32 = vmax.f32 %v2831_v26, 0.0 }
 0x225   : > { %v2833_v1 = vadd.f32 %v4442_v8, %v5497_v0  ;;  %v3744_v36 = vpack.c.bf16 %v2863_v32, %v2862_v28  ;;  %v2864_v35 = vmax.f32 %v2832_v15, 0.0 }
 0x227   : > { %v2865_v53 = vmax.f32 %v2833_v1, 0.0  ;;  %3764 = vst [vmem:[%s5515_s7 + $0x70] sm:$0xff] %v3744_v36  }
 0x229   : > { %v3749_v20 = vpack.c.bf16 %v2865_v53, %v2864_v35 }
 0x22b   : > { %3765 = vst [vmem:[%s5515_s7 + $0x78] sm:$0xff] %v3749_v20  }
 0x22c PF: > { %s13_s14 = sadd.s32 1, %s4715_s14   ;;  %s5618_s12 = smov %s4711_s13 }
 0x22d   : > { %p10_p5 = scmp.ge.s32.totalorder %s13_s14, 4   ;;  %s5619_s13 = smov %s5621_s15 }
 0x22f   :  { %12 = sbr.rel (!%p10_p5) target bundleno = 2 (0x2), region = 73 }

</bundles_post_ra>
